<compile_context>
chip_gen: v7x
topology: tpu7x:2x2x1
jax: 0.10.0
libtpu: 0.0.40
codegen_flags: <defaults>
</compile_context>

<pallas_src>
import jax
import jax.numpy as jnp
from jax.experimental import pallas as pl
from jax.experimental.pallas import tpu as pltpu

LEAKY_SLOPE = 0.01   # torch.nn.LeakyReLU default negative_slope
BN_EPS = 1e-5        # torch.nn.BatchNorm1d default eps

K = 8                # conv kernel size
PAD = 8              # conv padding
POOL = 4             # max-pool kernel size
C_IN = 40            # real input channels
C_PAD = 128          # input channels zero-padded to a full lane width
C_HID = 128
N_OUT = 10
N_OUT_PAD = 128      # output lanes padded 10 -> 128 for a lane-dense store
N_HIDDEN_REPEATS = 5


# ---------------------------------------------------------------- kernel -----

def _conv_block(x, w_ref, scale_ref, shift_ref, pad_scratch):
    """Conv1d(k=K, pad=PAD) + folded eval BN(+bias) + LeakyReLU + MaxPool1d(POOL).

    x: (L, C) f32 value for ONE sample.
    w_ref: (K*C, C_out) bf16 VMEM ref (sliced per tap, never hoisted whole).
    scale_ref / shift_ref: (1, C_out) f32 VMEM refs.
    pad_scratch: (L_scr, C) f32 VMEM scratch; rows [0:PAD) already zero.
    """
    L, c_in = x.shape
    c_out = w_ref.shape[1]
    L_conv = L + 2 * PAD - K + 1
    L_pool = L_conv // POOL
    L_scr = pad_scratch.shape[0]

    # Write the activation into the persistent zero-halo scratch; refresh every
    # row at/after the right halo (stale rows left over from a longer layer).
    pad_scratch[PAD:PAD + L, :] = x
    if PAD + L < L_scr:
        pad_scratch[PAD + L:L_scr, :] = jnp.zeros((L_scr - PAD - L, c_in),
                                                  pad_scratch.dtype)

    # Conv1d as K accumulating per-tap MXU matmuls (no im2col concat / reshape /
    # batch-fold).  Weight taps are read from VMEM one (c_in, c_out) slice at a
    # time; bf16 MXU operands, f32 accumulation.
    acc = jnp.zeros((L_conv, c_out), jnp.float32)
    for k in range(K):
        tap = pad_scratch[k:k + L_conv, :].astype(jnp.bfloat16)   # (L_conv, c_in)
        w_k = w_ref[k * c_in:(k + 1) * c_in, :]                   # (c_in, c_out) bf16
        acc = acc + jnp.dot(tap, w_k, preferred_element_type=jnp.float32)

    y = acc * scale_ref[...] + shift_ref[...]        # folded eval BN (+conv bias), f32
    y = jnp.where(y > 0, y, LEAKY_SLOPE * y)         # LeakyReLU
    y = y[:L_pool * POOL, :].reshape(L_pool, POOL, c_out)
    return jnp.max(y, axis=1)                        # MaxPool1d(4), floor mode


def fused_forward_kernel(x_ref, bn0_scale_ref, bn0_shift_ref,
                         w_in_ref, in_scale_ref, in_shift_ref,
                         w_hid_ref, hid_scale_ref, hid_shift_ref,
                         w_out_ref, b_out_ref, out_ref, pad_scratch):
    # Zero the left halo once per sample (the right halo / tail is refreshed by
    # every _conv_block before it is read, so no stale cross-step state).
    pad_scratch[0:PAD, :] = jnp.zeros((PAD, pad_scratch.shape[1]),
                                      pad_scratch.dtype)

    # input BatchNorm1d (eval mode); channels pre-padded 40 -> 128 (pad rows = 0)
    h = x_ref[0] * bn0_scale_ref[...] + bn0_shift_ref[...]        # (T, 128) f32

    # input_layer
    h = _conv_block(h, w_in_ref, in_scale_ref, in_shift_ref, pad_scratch)
    # hidden_layer applied 5x with SHARED weights (re-read from VMEM per block,
    # never held live across blocks).
    for _ in range(N_HIDDEN_REPEATS):
        h = _conv_block(h, w_hid_ref, hid_scale_ref, hid_shift_ref, pad_scratch)

    # channel-major flatten (torch (B, C, L).view(B, -1)) fused with
    # Linear(384 -> 10): lane-concat the L_fin rows -> (1, L_fin*C) and ONE MXU
    # matmul against the host-side permuted, lane-padded weight.  Lane-dense
    # (1, 128) output store; the wrapper slices the 10 real outputs.
    L_fin = h.shape[0]
    flat = jnp.concatenate([h[l:l + 1, :] for l in range(L_fin)], axis=-1)
    out = jnp.dot(flat, w_out_ref[...], preferred_element_type=jnp.float32)
    out_ref[0] = out + b_out_ref[...]


# --------------------------------------------------------------- wrapper -----

@jax.jit
def vanilla_conv1d_forward(x, params):
    """x: (B, T, 40) — the module's own input layout (it transposes internally)."""
    B, T, _ = x.shape
    x = jnp.pad(x, ((0, 0), (0, 0), (0, C_PAD - x.shape[-1])))
    L_scr = T + 2 * PAD   # longest padded activation; later layers are shorter

    args = (x,
            params['bn0_scale'], params['bn0_shift'],
            params['w_in'], params['in_scale'], params['in_shift'],
            params['w_hid'], params['hid_scale'], params['hid_shift'],
            params['w_out'], params['b_out'])

    # Constant index maps on every weight / scale: same block every grid step,
    # so Pallas DMAs them exactly once.  Only the activation and output blocks
    # are indexed by the batch coordinate.
    vec_spec = pl.BlockSpec((1, C_PAD), lambda b: (0, 0))
    in_specs = [
        pl.BlockSpec((1, T, C_PAD), lambda b: (b, 0, 0)),          # x (per sample)
        vec_spec, vec_spec,                                        # bn0 scale/shift
        pl.BlockSpec(params['w_in'].shape, lambda b: (0, 0)),      # w_in
        vec_spec, vec_spec,                                        # in scale/shift
        pl.BlockSpec(params['w_hid'].shape, lambda b: (0, 0)),     # w_hid (shared)
        vec_spec, vec_spec,                                        # hid scale/shift
        pl.BlockSpec(params['w_out'].shape, lambda b: (0, 0)),     # w_out
        vec_spec,                                                  # b_out
    ]

    # Advisory cost estimate (helps XLA schedule the surrounding pad/slice ops).
    flops = 0
    L = T
    for _ in range(1 + N_HIDDEN_REPEATS):
        L_conv = L + 2 * PAD - K + 1
        flops += 2 * L_conv * (K * C_PAD) * C_HID
        L = L_conv // POOL
    flops += 2 * (L * C_HID) * N_OUT_PAD
    flops *= B
    bytes_accessed = int(x.size) * 4 + B * N_OUT_PAD * 4 + sum(
        int(p.size) * p.dtype.itemsize for p in args[1:])

    out = pl.pallas_call(
        fused_forward_kernel,
        out_shape=jax.ShapeDtypeStruct((B, 1, N_OUT_PAD), jnp.float32),
        grid=(B,),
        in_specs=in_specs,
        out_specs=pl.BlockSpec((1, 1, N_OUT_PAD), lambda b: (b, 0, 0)),
        scratch_shapes=[pltpu.VMEM((L_scr, C_PAD), jnp.float32)],
        compiler_params=pltpu.CompilerParams(
            dimension_semantics=("parallel",)),   # shards batch over v7x's 2 TCs
        cost_estimate=pl.CostEstimate(flops=int(flops), transcendentals=0,
                                      bytes_accessed=int(bytes_accessed)),
    )(*args)
    return out[:, 0, :N_OUT]


def fold_bn(gamma, beta, mean, var, conv_bias=None):
    """Eval-mode BatchNorm1d (+ optional conv bias) folded into y = x*scale + shift."""
    scale = gamma / jnp.sqrt(var + BN_EPS)
    shift = beta - mean * scale
    if conv_bias is not None:
        shift = shift + conv_bias * scale
    return scale[None, :], shift[None, :]


def reference_forward(x, params):
    """Pure-JAX reference with identical math (same bf16 operand casts)."""
    x = jnp.pad(x, ((0, 0), (0, 0), (0, C_PAD - x.shape[-1])))
    h = x * params['bn0_scale'] + params['bn0_shift']

    def block(h, w2d, scale, shift):
        B, L, c_in = h.shape
        c_out = w2d.shape[1]
        L_conv = L + 2 * PAD - K + 1
        L_pool = L_conv // POOL
        hp = jnp.pad(h, ((0, 0), (PAD, PAD), (0, 0))).astype(jnp.bfloat16)
        acc = jnp.zeros((B, L_conv, c_out), jnp.float32)
        for k in range(K):
            acc = acc + jax.lax.dot_general(
                hp[:, k:k + L_conv, :], w2d[k * c_in:(k + 1) * c_in, :],
                dimension_numbers=(((2,), (0,)), ((), ())),
                preferred_element_type=jnp.float32)
        y = acc * scale + shift
        y = jnp.where(y > 0, y, LEAKY_SLOPE * y)
        y = y[:, :L_pool * POOL, :].reshape(B, L_pool, POOL, c_out)
        return jnp.max(y, axis=2)

    h = block(h, params['w_in'], params['in_scale'], params['in_shift'])
    for _ in range(N_HIDDEN_REPEATS):
        h = block(h, params['w_hid'], params['hid_scale'], params['hid_shift'])
    B, L_fin, C = h.shape
    flat = h.reshape(B, L_fin * C)                       # index order l*C + c
    out = jnp.dot(flat, params['w_out'],
                  preferred_element_type=jnp.float32) + params['b_out']
    return out[:, :N_OUT]


# ------------------------------------------------------------------ main -----

if __name__ == "__main__":
    key = jax.random.PRNGKey(0)
    ks = jax.random.split(key, 20)

    B, T = 2, 16   # lengths: 16 -> 6 -> 3 -> 3 -> 3 -> 3 -> flatten 128*3 = 384

    x = jax.random.normal(ks[0], (B, T, C_IN), jnp.float32)

    # input BatchNorm1d(40), eval mode -> folded scale/shift, zero-padded to 128 ch
    g0 = 1.0 + 0.1 * jax.random.normal(ks[1], (C_IN,), jnp.float32)
    b0 = 0.1 * jax.random.normal(ks[2], (C_IN,), jnp.float32)
    m0 = 0.1 * jax.random.normal(ks[3], (C_IN,), jnp.float32)
    v0 = 1.0 + 0.1 * jax.random.uniform(ks[4], (C_IN,), jnp.float32)
    bn0_scale, bn0_shift = fold_bn(g0, b0, m0, v0)
    bn0_scale = jnp.pad(bn0_scale, ((0, 0), (0, C_PAD - C_IN)))
    bn0_shift = jnp.pad(bn0_shift, ((0, 0), (0, C_PAD - C_IN)))

    # input_layer: Conv1d(40->128, k=8, pad=8) + BN(128) + LeakyReLU + MaxPool(4)
    w_in3 = 0.05 * jax.random.normal(ks[5], (K, C_IN, C_HID), jnp.float32)
    bias_in = 0.05 * jax.random.normal(ks[6], (C_HID,), jnp.float32)
    g1 = 1.0 + 0.1 * jax.random.normal(ks[7], (C_HID,), jnp.float32)
    b1 = 0.1 * jax.random.normal(ks[8], (C_HID,), jnp.float32)
    m1 = 0.1 * jax.random.normal(ks[9], (C_HID,), jnp.float32)
    v1 = 1.0 + 0.1 * jax.random.uniform(ks[10], (C_HID,), jnp.float32)
    in_scale, in_shift = fold_bn(g1, b1, m1, v1, bias_in)
    # zero-pad C_in 40 -> 128 (extra rows exactly zero), reshape (K*C_in, C_out), bf16
    w_in = jnp.pad(w_in3, ((0, 0), (0, C_PAD - C_IN), (0, 0)))
    w_in = w_in.reshape(K * C_PAD, C_HID).astype(jnp.bfloat16)

    # hidden_layer (SHARED 5x): Conv1d(128->128, k=8, pad=8) + BN + LeakyReLU + MaxPool(4)
    w_hid3 = 0.05 * jax.random.normal(ks[11], (K, C_HID, C_HID), jnp.float32)
    bias_hid = 0.05 * jax.random.normal(ks[12], (C_HID,), jnp.float32)
    g2 = 1.0 + 0.1 * jax.random.normal(ks[13], (C_HID,), jnp.float32)
    b2 = 0.1 * jax.random.normal(ks[14], (C_HID,), jnp.float32)
    m2 = 0.1 * jax.random.normal(ks[15], (C_HID,), jnp.float32)
    v2 = 1.0 + 0.1 * jax.random.uniform(ks[16], (C_HID,), jnp.float32)
    hid_scale, hid_shift = fold_bn(g2, b2, m2, v2, bias_hid)
    w_hid = w_hid3.reshape(K * C_HID, C_HID).astype(jnp.bfloat16)

    # out_linear: Linear(384 -> 10).  torch flattens (B, C, L) channel-major
    # (index c*L + l); the kernel flattens (L, C) row-major (index l*C + c), so
    # the weight rows are permuted host-side and the 10 outputs are padded to
    # 128 lanes for a lane-dense output store.
    L_FIN = T
    for _ in range(1 + N_HIDDEN_REPEATS):
        L_FIN = (L_FIN + 2 * PAD - K + 1) // POOL     # -> 3 for T=16
    w_out_flat = 0.05 * jax.random.normal(ks[17], (C_HID * L_FIN, N_OUT), jnp.float32)
    b_out = 0.05 * jax.random.normal(ks[18], (1, N_OUT), jnp.float32)
    w_out = jnp.transpose(w_out_flat.reshape(C_HID, L_FIN, N_OUT), (1, 0, 2))
    w_out = w_out.reshape(L_FIN * C_HID, N_OUT)
    w_out = jnp.pad(w_out, ((0, 0), (0, N_OUT_PAD - N_OUT)))
    b_out = jnp.pad(b_out, ((0, 0), (0, N_OUT_PAD - N_OUT)))

    params = dict(
        bn0_scale=bn0_scale, bn0_shift=bn0_shift,
        w_in=w_in, in_scale=in_scale, in_shift=in_shift,
        w_hid=w_hid, hid_scale=hid_scale, hid_shift=hid_shift,
        w_out=w_out, b_out=b_out,
    )

    out = jax.block_until_ready(vanilla_conv1d_forward(x, params))
    ref = jax.block_until_ready(reference_forward(x, params))

    assert out.shape == (B, N_OUT), out.shape
    assert bool(jnp.all(jnp.isfinite(out)))
    assert bool(jnp.allclose(out, ref, rtol=2e-2, atol=2e-2)), \
        float(jnp.max(jnp.abs(out - ref)))
    print("KERNEL_OK")
</pallas_src>

<mosaic_0001>
module attributes {stable_mosaic.version = 11 : i64} {
  func.func @fused_forward_kernel(%arg0: i32, %arg1: memref<1x16x128xf32, #tpu.memory_space<vmem>>, %arg2: memref<1x128xf32, #tpu.memory_space<vmem>>, %arg3: memref<1x128xf32, #tpu.memory_space<vmem>>, %arg4: memref<1024x128xbf16, #tpu.memory_space<vmem>>, %arg5: memref<1x128xf32, #tpu.memory_space<vmem>>, %arg6: memref<1x128xf32, #tpu.memory_space<vmem>>, %arg7: memref<1024x128xbf16, #tpu.memory_space<vmem>>, %arg8: memref<1x128xf32, #tpu.memory_space<vmem>>, %arg9: memref<1x128xf32, #tpu.memory_space<vmem>>, %arg10: memref<384x128xf32, #tpu.memory_space<vmem>>, %arg11: memref<1x128xf32, #tpu.memory_space<vmem>>, %arg12: memref<1x1x128xf32, #tpu.memory_space<vmem>>, %arg13: memref<32x128xf32, #tpu.memory_space<vmem>>) attributes {dimension_semantics = [#tpu.dimension_semantics<parallel>], iteration_bounds = array<i64: 2>, scalar_prefetch = 0 : i64, scratch_operands = 1 : i64, tpu.core_type = #tpu.core_type<tc>, window_params = [{transform_indices = @transform_0, window_bounds = array<i64: 1, 16, 128>}, {pipeline_mode = #tpu.pipeline_mode<synchronous>, transform_indices = @transform_1, window_bounds = array<i64: 1, 128>}, {pipeline_mode = #tpu.pipeline_mode<synchronous>, transform_indices = @transform_2, window_bounds = array<i64: 1, 128>}, {pipeline_mode = #tpu.pipeline_mode<synchronous>, transform_indices = @transform_3, window_bounds = array<i64: 1024, 128>}, {pipeline_mode = #tpu.pipeline_mode<synchronous>, transform_indices = @transform_4, window_bounds = array<i64: 1, 128>}, {pipeline_mode = #tpu.pipeline_mode<synchronous>, transform_indices = @transform_5, window_bounds = array<i64: 1, 128>}, {pipeline_mode = #tpu.pipeline_mode<synchronous>, transform_indices = @transform_6, window_bounds = array<i64: 1024, 128>}, {pipeline_mode = #tpu.pipeline_mode<synchronous>, transform_indices = @transform_7, window_bounds = array<i64: 1, 128>}, {pipeline_mode = #tpu.pipeline_mode<synchronous>, transform_indices = @transform_8, window_bounds = array<i64: 1, 128>}, {pipeline_mode = #tpu.pipeline_mode<synchronous>, transform_indices = @transform_9, window_bounds = array<i64: 384, 128>}, {pipeline_mode = #tpu.pipeline_mode<synchronous>, transform_indices = @transform_10, window_bounds = array<i64: 1, 128>}, {transform_indices = @transform_11, window_bounds = array<i64: 1, 1, 128>}]} {
    %cst = arith.constant 0.000000e+00 : f32
    %0 = vector.broadcast %cst : f32 to vector<8x128xf32>
    %c0 = arith.constant 0 : index
    %c0_0 = arith.constant 0 : index
    %1 = vector.load %arg13[%c0, %c0_0] : memref<32x128xf32, #tpu.memory_space<vmem>>, vector<8x128xf32>
    tpu.vector_store %arg13[%c0, %c0_0], %0 {strides = array<i32>} : memref<32x128xf32, #tpu.memory_space<vmem>>, vector<8x128xf32>,
    %c0_1 = arith.constant 0 : index
    %c0_2 = arith.constant 0 : index
    %c0_3 = arith.constant 0 : index
    %2 = vector.load %arg1[%c0_1, %c0_2, %c0_3] : memref<1x16x128xf32, #tpu.memory_space<vmem>>, vector<1x16x128xf32>
    %3 = vector.shape_cast %2 : vector<1x16x128xf32> to vector<16x128xf32>
    %c0_4 = arith.constant 0 : index
    %c0_5 = arith.constant 0 : index
    %4 = vector.load %arg2[%c0_4, %c0_5] : memref<1x128xf32, #tpu.memory_space<vmem>>, vector<1x128xf32>
    %5 = vector.broadcast %4 : vector<1x128xf32> to vector<16x128xf32>
    %6 = arith.mulf %3, %5 : vector<16x128xf32>
    %c0_6 = arith.constant 0 : index
    %c0_7 = arith.constant 0 : index
    %7 = vector.load %arg3[%c0_6, %c0_7] : memref<1x128xf32, #tpu.memory_space<vmem>>, vector<1x128xf32>
    %8 = vector.broadcast %7 : vector<1x128xf32> to vector<16x128xf32>
    %9 = arith.addf %6, %8 : vector<16x128xf32>
    %c8 = arith.constant 8 : index
    %c0_8 = arith.constant 0 : index
    %10 = vector.load %arg13[%c8, %c0_8] : memref<32x128xf32, #tpu.memory_space<vmem>>, vector<16x128xf32>
    tpu.vector_store %arg13[%c8, %c0_8], %9 {strides = array<i32>} : memref<32x128xf32, #tpu.memory_space<vmem>>, vector<16x128xf32>,
    %cst_9 = arith.constant 0.000000e+00 : f32
    %11 = vector.broadcast %cst_9 : f32 to vector<8x128xf32>
    %c24 = arith.constant 24 : index
    %c0_10 = arith.constant 0 : index
    %12 = vector.load %arg13[%c24, %c0_10] : memref<32x128xf32, #tpu.memory_space<vmem>>, vector<8x128xf32>
    tpu.vector_store %arg13[%c24, %c0_10], %11 {strides = array<i32>} : memref<32x128xf32, #tpu.memory_space<vmem>>, vector<8x128xf32>,
    %cst_11 = arith.constant 0.000000e+00 : f32
    %13 = vector.broadcast %cst_11 : f32 to vector<25x128xf32>
    %c0_12 = arith.constant 0 : index
    %c0_13 = arith.constant 0 : index
    %14 = vector.load %arg13[%c0_12, %c0_13] : memref<32x128xf32, #tpu.memory_space<vmem>>, vector<25x128xf32>
    %15 = arith.truncf %14 : vector<25x128xf32> to vector<25x128xbf16>
    %c0_14 = arith.constant 0 : index
    %c0_15 = arith.constant 0 : index
    %16 = vector.load %arg4[%c0_14, %c0_15] : memref<1024x128xbf16, #tpu.memory_space<vmem>>, vector<128x128xbf16>
    %cst_16 = arith.constant dense<0.000000e+00> : vector<25x128xf32>
    %17 = tpu.matmul %15, %16, %cst_16 {dimension_numbers = #tpu.dot_dimension_numbers<[1], [0], [0], [1], [0, 0, 1, 1], [], []>} : vector<25x128xbf16>, vector<128x128xbf16>, vector<25x128xf32> -> vector<25x128xf32>
    %18 = arith.addf %13, %17 : vector<25x128xf32>
    %c1 = arith.constant 1 : index
    %c0_17 = arith.constant 0 : index
    %19 = vector.load %arg13[%c1, %c0_17] : memref<32x128xf32, #tpu.memory_space<vmem>>, vector<25x128xf32>
    %20 = arith.truncf %19 : vector<25x128xf32> to vector<25x128xbf16>
    %c128 = arith.constant 128 : index
    %c0_18 = arith.constant 0 : index
    %21 = vector.load %arg4[%c128, %c0_18] : memref<1024x128xbf16, #tpu.memory_space<vmem>>, vector<128x128xbf16>
    %cst_19 = arith.constant dense<0.000000e+00> : vector<25x128xf32>
    %22 = tpu.matmul %20, %21, %cst_19 {dimension_numbers = #tpu.dot_dimension_numbers<[1], [0], [0], [1], [0, 0, 1, 1], [], []>} : vector<25x128xbf16>, vector<128x128xbf16>, vector<25x128xf32> -> vector<25x128xf32>
    %23 = arith.addf %18, %22 : vector<25x128xf32>
    %c2 = arith.constant 2 : index
    %c0_20 = arith.constant 0 : index
    %24 = vector.load %arg13[%c2, %c0_20] : memref<32x128xf32, #tpu.memory_space<vmem>>, vector<25x128xf32>
    %25 = arith.truncf %24 : vector<25x128xf32> to vector<25x128xbf16>
    %c256 = arith.constant 256 : index
    %c0_21 = arith.constant 0 : index
    %26 = vector.load %arg4[%c256, %c0_21] : memref<1024x128xbf16, #tpu.memory_space<vmem>>, vector<128x128xbf16>
    %cst_22 = arith.constant dense<0.000000e+00> : vector<25x128xf32>
    %27 = tpu.matmul %25, %26, %cst_22 {dimension_numbers = #tpu.dot_dimension_numbers<[1], [0], [0], [1], [0, 0, 1, 1], [], []>} : vector<25x128xbf16>, vector<128x128xbf16>, vector<25x128xf32> -> vector<25x128xf32>
    %28 = arith.addf %23, %27 : vector<25x128xf32>
    %c3 = arith.constant 3 : index
    %c0_23 = arith.constant 0 : index
    %29 = vector.load %arg13[%c3, %c0_23] : memref<32x128xf32, #tpu.memory_space<vmem>>, vector<25x128xf32>
    %30 = arith.truncf %29 : vector<25x128xf32> to vector<25x128xbf16>
    %c384 = arith.constant 384 : index
    %c0_24 = arith.constant 0 : index
    %31 = vector.load %arg4[%c384, %c0_24] : memref<1024x128xbf16, #tpu.memory_space<vmem>>, vector<128x128xbf16>
    %cst_25 = arith.constant dense<0.000000e+00> : vector<25x128xf32>
    %32 = tpu.matmul %30, %31, %cst_25 {dimension_numbers = #tpu.dot_dimension_numbers<[1], [0], [0], [1], [0, 0, 1, 1], [], []>} : vector<25x128xbf16>, vector<128x128xbf16>, vector<25x128xf32> -> vector<25x128xf32>
    %33 = arith.addf %28, %32 : vector<25x128xf32>
    %c4 = arith.constant 4 : index
    %c0_26 = arith.constant 0 : index
    %34 = vector.load %arg13[%c4, %c0_26] : memref<32x128xf32, #tpu.memory_space<vmem>>, vector<25x128xf32>
    %35 = arith.truncf %34 : vector<25x128xf32> to vector<25x128xbf16>
    %c512 = arith.constant 512 : index
    %c0_27 = arith.constant 0 : index
    %36 = vector.load %arg4[%c512, %c0_27] : memref<1024x128xbf16, #tpu.memory_space<vmem>>, vector<128x128xbf16>
    %cst_28 = arith.constant dense<0.000000e+00> : vector<25x128xf32>
    %37 = tpu.matmul %35, %36, %cst_28 {dimension_numbers = #tpu.dot_dimension_numbers<[1], [0], [0], [1], [0, 0, 1, 1], [], []>} : vector<25x128xbf16>, vector<128x128xbf16>, vector<25x128xf32> -> vector<25x128xf32>
    %38 = arith.addf %33, %37 : vector<25x128xf32>
    %c5 = arith.constant 5 : index
    %c0_29 = arith.constant 0 : index
    %39 = vector.load %arg13[%c5, %c0_29] : memref<32x128xf32, #tpu.memory_space<vmem>>, vector<25x128xf32>
    %40 = arith.truncf %39 : vector<25x128xf32> to vector<25x128xbf16>
    %c640 = arith.constant 640 : index
    %c0_30 = arith.constant 0 : index
    %41 = vector.load %arg4[%c640, %c0_30] : memref<1024x128xbf16, #tpu.memory_space<vmem>>, vector<128x128xbf16>
    %cst_31 = arith.constant dense<0.000000e+00> : vector<25x128xf32>
    %42 = tpu.matmul %40, %41, %cst_31 {dimension_numbers = #tpu.dot_dimension_numbers<[1], [0], [0], [1], [0, 0, 1, 1], [], []>} : vector<25x128xbf16>, vector<128x128xbf16>, vector<25x128xf32> -> vector<25x128xf32>
    %43 = arith.addf %38, %42 : vector<25x128xf32>
    %c6 = arith.constant 6 : index
    %c0_32 = arith.constant 0 : index
    %44 = vector.load %arg13[%c6, %c0_32] : memref<32x128xf32, #tpu.memory_space<vmem>>, vector<25x128xf32>
    %45 = arith.truncf %44 : vector<25x128xf32> to vector<25x128xbf16>
    %c768 = arith.constant 768 : index
    %c0_33 = arith.constant 0 : index
    %46 = vector.load %arg4[%c768, %c0_33] : memref<1024x128xbf16, #tpu.memory_space<vmem>>, vector<128x128xbf16>
    %cst_34 = arith.constant dense<0.000000e+00> : vector<25x128xf32>
    %47 = tpu.matmul %45, %46, %cst_34 {dimension_numbers = #tpu.dot_dimension_numbers<[1], [0], [0], [1], [0, 0, 1, 1], [], []>} : vector<25x128xbf16>, vector<128x128xbf16>, vector<25x128xf32> -> vector<25x128xf32>
    %48 = arith.addf %43, %47 : vector<25x128xf32>
    %c7 = arith.constant 7 : index
    %c0_35 = arith.constant 0 : index
    %49 = vector.load %arg13[%c7, %c0_35] : memref<32x128xf32, #tpu.memory_space<vmem>>, vector<25x128xf32>
    %50 = arith.truncf %49 : vector<25x128xf32> to vector<25x128xbf16>
    %c896 = arith.constant 896 : index
    %c0_36 = arith.constant 0 : index
    %51 = vector.load %arg4[%c896, %c0_36] : memref<1024x128xbf16, #tpu.memory_space<vmem>>, vector<128x128xbf16>
    %cst_37 = arith.constant dense<0.000000e+00> : vector<25x128xf32>
    %52 = tpu.matmul %50, %51, %cst_37 {dimension_numbers = #tpu.dot_dimension_numbers<[1], [0], [0], [1], [0, 0, 1, 1], [], []>} : vector<25x128xbf16>, vector<128x128xbf16>, vector<25x128xf32> -> vector<25x128xf32>
    %53 = arith.addf %48, %52 : vector<25x128xf32>
    %c0_38 = arith.constant 0 : index
    %c0_39 = arith.constant 0 : index
    %54 = vector.load %arg5[%c0_38, %c0_39] : memref<1x128xf32, #tpu.memory_space<vmem>>, vector<1x128xf32>
    %55 = vector.broadcast %54 : vector<1x128xf32> to vector<25x128xf32>
    %56 = arith.mulf %53, %55 : vector<25x128xf32>
    %c0_40 = arith.constant 0 : index
    %c0_41 = arith.constant 0 : index
    %57 = vector.load %arg6[%c0_40, %c0_41] : memref<1x128xf32, #tpu.memory_space<vmem>>, vector<1x128xf32>
    %58 = vector.broadcast %57 : vector<1x128xf32> to vector<25x128xf32>
    %59 = arith.addf %56, %58 : vector<25x128xf32>
    %cst_42 = arith.constant 0.000000e+00 : f32
    %60 = vector.broadcast %cst_42 : f32 to vector<25x128xf32>
    %61 = arith.cmpf ogt, %59, %60 : vector<25x128xf32>
    %cst_43 = arith.constant 0.00999999977 : f32
    %62 = vector.broadcast %cst_43 : f32 to vector<25x128xf32>
    %63 = arith.mulf %62, %59 : vector<25x128xf32>
    %64 = arith.select %61, %59, %63 : vector<25x128xi1>, vector<25x128xf32>
    %65 = vector.extract_strided_slice %64 {offsets = [0, 0], sizes = [24, 128], strides = [1, 1]} : vector<25x128xf32> to vector<24x128xf32>
    %66 = vector.shape_cast %65 : vector<24x128xf32> to vector<6x4x128xf32>
    %cst_44 = arith.constant dense<0xFF800000> : vector<6x128xf32>
    %67 = vector.multi_reduction <maximumf>, %66, %cst_44 [1] : vector<6x4x128xf32> to vector<6x128xf32>
    %c8_45 = arith.constant 8 : index
    %c0_46 = arith.constant 0 : index
    %68 = vector.load %arg13[%c8_45, %c0_46] : memref<32x128xf32, #tpu.memory_space<vmem>>, vector<6x128xf32>
    tpu.vector_store %arg13[%c8_45, %c0_46], %67 {strides = array<i32>} : memref<32x128xf32, #tpu.memory_space<vmem>>, vector<6x128xf32>,
    %cst_47 = arith.constant 0.000000e+00 : f32
    %69 = vector.broadcast %cst_47 : f32 to vector<18x128xf32>
    %c14 = arith.constant 14 : index
    %c0_48 = arith.constant 0 : index
    %70 = vector.load %arg13[%c14, %c0_48] : memref<32x128xf32, #tpu.memory_space<vmem>>, vector<18x128xf32>
    tpu.vector_store %arg13[%c14, %c0_48], %69 {strides = array<i32>} : memref<32x128xf32, #tpu.memory_space<vmem>>, vector<18x128xf32>,
    %cst_49 = arith.constant 0.000000e+00 : f32
    %71 = vector.broadcast %cst_49 : f32 to vector<15x128xf32>
    %c0_50 = arith.constant 0 : index
    %c0_51 = arith.constant 0 : index
    %72 = vector.load %arg13[%c0_50, %c0_51] : memref<32x128xf32, #tpu.memory_space<vmem>>, vector<15x128xf32>
    %73 = arith.truncf %72 : vector<15x128xf32> to vector<15x128xbf16>
    %c0_52 = arith.constant 0 : index
    %c0_53 = arith.constant 0 : index
    %74 = vector.load %arg7[%c0_52, %c0_53] : memref<1024x128xbf16, #tpu.memory_space<vmem>>, vector<128x128xbf16>
    %cst_54 = arith.constant dense<0.000000e+00> : vector<15x128xf32>
    %75 = tpu.matmul %73, %74, %cst_54 {dimension_numbers = #tpu.dot_dimension_numbers<[1], [0], [0], [1], [0, 0, 1, 1], [], []>} : vector<15x128xbf16>, vector<128x128xbf16>, vector<15x128xf32> -> vector<15x128xf32>
    %76 = arith.addf %71, %75 : vector<15x128xf32>
    %c1_55 = arith.constant 1 : index
    %c0_56 = arith.constant 0 : index
    %77 = vector.load %arg13[%c1_55, %c0_56] : memref<32x128xf32, #tpu.memory_space<vmem>>, vector<15x128xf32>
    %78 = arith.truncf %77 : vector<15x128xf32> to vector<15x128xbf16>
    %c128_57 = arith.constant 128 : index
    %c0_58 = arith.constant 0 : index
    %79 = vector.load %arg7[%c128_57, %c0_58] : memref<1024x128xbf16, #tpu.memory_space<vmem>>, vector<128x128xbf16>
    %cst_59 = arith.constant dense<0.000000e+00> : vector<15x128xf32>
    %80 = tpu.matmul %78, %79, %cst_59 {dimension_numbers = #tpu.dot_dimension_numbers<[1], [0], [0], [1], [0, 0, 1, 1], [], []>} : vector<15x128xbf16>, vector<128x128xbf16>, vector<15x128xf32> -> vector<15x128xf32>
    %81 = arith.addf %76, %80 : vector<15x128xf32>
    %c2_60 = arith.constant 2 : index
    %c0_61 = arith.constant 0 : index
    %82 = vector.load %arg13[%c2_60, %c0_61] : memref<32x128xf32, #tpu.memory_space<vmem>>, vector<15x128xf32>
    %83 = arith.truncf %82 : vector<15x128xf32> to vector<15x128xbf16>
    %c256_62 = arith.constant 256 : index
    %c0_63 = arith.constant 0 : index
    %84 = vector.load %arg7[%c256_62, %c0_63] : memref<1024x128xbf16, #tpu.memory_space<vmem>>, vector<128x128xbf16>
    %cst_64 = arith.constant dense<0.000000e+00> : vector<15x128xf32>
    %85 = tpu.matmul %83, %84, %cst_64 {dimension_numbers = #tpu.dot_dimension_numbers<[1], [0], [0], [1], [0, 0, 1, 1], [], []>} : vector<15x128xbf16>, vector<128x128xbf16>, vector<15x128xf32> -> vector<15x128xf32>
    %86 = arith.addf %81, %85 : vector<15x128xf32>
    %c3_65 = arith.constant 3 : index
    %c0_66 = arith.constant 0 : index
    %87 = vector.load %arg13[%c3_65, %c0_66] : memref<32x128xf32, #tpu.memory_space<vmem>>, vector<15x128xf32>
    %88 = arith.truncf %87 : vector<15x128xf32> to vector<15x128xbf16>
    %c384_67 = arith.constant 384 : index
    %c0_68 = arith.constant 0 : index
    %89 = vector.load %arg7[%c384_67, %c0_68] : memref<1024x128xbf16, #tpu.memory_space<vmem>>, vector<128x128xbf16>
    %cst_69 = arith.constant dense<0.000000e+00> : vector<15x128xf32>
    %90 = tpu.matmul %88, %89, %cst_69 {dimension_numbers = #tpu.dot_dimension_numbers<[1], [0], [0], [1], [0, 0, 1, 1], [], []>} : vector<15x128xbf16>, vector<128x128xbf16>, vector<15x128xf32> -> vector<15x128xf32>
    %91 = arith.addf %86, %90 : vector<15x128xf32>
    %c4_70 = arith.constant 4 : index
    %c0_71 = arith.constant 0 : index
    %92 = vector.load %arg13[%c4_70, %c0_71] : memref<32x128xf32, #tpu.memory_space<vmem>>, vector<15x128xf32>
    %93 = arith.truncf %92 : vector<15x128xf32> to vector<15x128xbf16>
    %c512_72 = arith.constant 512 : index
    %c0_73 = arith.constant 0 : index
    %94 = vector.load %arg7[%c512_72, %c0_73] : memref<1024x128xbf16, #tpu.memory_space<vmem>>, vector<128x128xbf16>
    %cst_74 = arith.constant dense<0.000000e+00> : vector<15x128xf32>
    %95 = tpu.matmul %93, %94, %cst_74 {dimension_numbers = #tpu.dot_dimension_numbers<[1], [0], [0], [1], [0, 0, 1, 1], [], []>} : vector<15x128xbf16>, vector<128x128xbf16>, vector<15x128xf32> -> vector<15x128xf32>
    %96 = arith.addf %91, %95 : vector<15x128xf32>
    %c5_75 = arith.constant 5 : index
    %c0_76 = arith.constant 0 : index
    %97 = vector.load %arg13[%c5_75, %c0_76] : memref<32x128xf32, #tpu.memory_space<vmem>>, vector<15x128xf32>
    %98 = arith.truncf %97 : vector<15x128xf32> to vector<15x128xbf16>
    %c640_77 = arith.constant 640 : index
    %c0_78 = arith.constant 0 : index
    %99 = vector.load %arg7[%c640_77, %c0_78] : memref<1024x128xbf16, #tpu.memory_space<vmem>>, vector<128x128xbf16>
    %cst_79 = arith.constant dense<0.000000e+00> : vector<15x128xf32>
    %100 = tpu.matmul %98, %99, %cst_79 {dimension_numbers = #tpu.dot_dimension_numbers<[1], [0], [0], [1], [0, 0, 1, 1], [], []>} : vector<15x128xbf16>, vector<128x128xbf16>, vector<15x128xf32> -> vector<15x128xf32>
    %101 = arith.addf %96, %100 : vector<15x128xf32>
    %c6_80 = arith.constant 6 : index
    %c0_81 = arith.constant 0 : index
    %102 = vector.load %arg13[%c6_80, %c0_81] : memref<32x128xf32, #tpu.memory_space<vmem>>, vector<15x128xf32>
    %103 = arith.truncf %102 : vector<15x128xf32> to vector<15x128xbf16>
    %c768_82 = arith.constant 768 : index
    %c0_83 = arith.constant 0 : index
    %104 = vector.load %arg7[%c768_82, %c0_83] : memref<1024x128xbf16, #tpu.memory_space<vmem>>, vector<128x128xbf16>
    %cst_84 = arith.constant dense<0.000000e+00> : vector<15x128xf32>
    %105 = tpu.matmul %103, %104, %cst_84 {dimension_numbers = #tpu.dot_dimension_numbers<[1], [0], [0], [1], [0, 0, 1, 1], [], []>} : vector<15x128xbf16>, vector<128x128xbf16>, vector<15x128xf32> -> vector<15x128xf32>
    %106 = arith.addf %101, %105 : vector<15x128xf32>
    %c7_85 = arith.constant 7 : index
    %c0_86 = arith.constant 0 : index
    %107 = vector.load %arg13[%c7_85, %c0_86] : memref<32x128xf32, #tpu.memory_space<vmem>>, vector<15x128xf32>
    %108 = arith.truncf %107 : vector<15x128xf32> to vector<15x128xbf16>
    %c896_87 = arith.constant 896 : index
    %c0_88 = arith.constant 0 : index
    %109 = vector.load %arg7[%c896_87, %c0_88] : memref<1024x128xbf16, #tpu.memory_space<vmem>>, vector<128x128xbf16>
    %cst_89 = arith.constant dense<0.000000e+00> : vector<15x128xf32>
    %110 = tpu.matmul %108, %109, %cst_89 {dimension_numbers = #tpu.dot_dimension_numbers<[1], [0], [0], [1], [0, 0, 1, 1], [], []>} : vector<15x128xbf16>, vector<128x128xbf16>, vector<15x128xf32> -> vector<15x128xf32>
    %111 = arith.addf %106, %110 : vector<15x128xf32>
    %c0_90 = arith.constant 0 : index
    %c0_91 = arith.constant 0 : index
    %112 = vector.load %arg8[%c0_90, %c0_91] : memref<1x128xf32, #tpu.memory_space<vmem>>, vector<1x128xf32>
    %113 = vector.broadcast %112 : vector<1x128xf32> to vector<15x128xf32>
    %114 = arith.mulf %111, %113 : vector<15x128xf32>
    %c0_92 = arith.constant 0 : index
    %c0_93 = arith.constant 0 : index
    %115 = vector.load %arg9[%c0_92, %c0_93] : memref<1x128xf32, #tpu.memory_space<vmem>>, vector<1x128xf32>
    %116 = vector.broadcast %115 : vector<1x128xf32> to vector<15x128xf32>
    %117 = arith.addf %114, %116 : vector<15x128xf32>
    %cst_94 = arith.constant 0.000000e+00 : f32
    %118 = vector.broadcast %cst_94 : f32 to vector<15x128xf32>
    %119 = arith.cmpf ogt, %117, %118 : vector<15x128xf32>
    %cst_95 = arith.constant 0.00999999977 : f32
    %120 = vector.broadcast %cst_95 : f32 to vector<15x128xf32>
    %121 = arith.mulf %120, %117 : vector<15x128xf32>
    %122 = arith.select %119, %117, %121 : vector<15x128xi1>, vector<15x128xf32>
    %123 = vector.extract_strided_slice %122 {offsets = [0, 0], sizes = [12, 128], strides = [1, 1]} : vector<15x128xf32> to vector<12x128xf32>
    %124 = vector.shape_cast %123 : vector<12x128xf32> to vector<3x4x128xf32>
    %cst_96 = arith.constant dense<0xFF800000> : vector<3x128xf32>
    %125 = vector.multi_reduction <maximumf>, %124, %cst_96 [1] : vector<3x4x128xf32> to vector<3x128xf32>
    %c8_97 = arith.constant 8 : index
    %c0_98 = arith.constant 0 : index
    %126 = vector.load %arg13[%c8_97, %c0_98] : memref<32x128xf32, #tpu.memory_space<vmem>>, vector<3x128xf32>
    tpu.vector_store %arg13[%c8_97, %c0_98], %125 {strides = array<i32>} : memref<32x128xf32, #tpu.memory_space<vmem>>, vector<3x128xf32>,
    %cst_99 = arith.constant 0.000000e+00 : f32
    %127 = vector.broadcast %cst_99 : f32 to vector<21x128xf32>
    %c11 = arith.constant 11 : index
    %c0_100 = arith.constant 0 : index
    %128 = vector.load %arg13[%c11, %c0_100] : memref<32x128xf32, #tpu.memory_space<vmem>>, vector<21x128xf32>
    tpu.vector_store %arg13[%c11, %c0_100], %127 {strides = array<i32>} : memref<32x128xf32, #tpu.memory_space<vmem>>, vector<21x128xf32>,
    %cst_101 = arith.constant 0.000000e+00 : f32
    %129 = vector.broadcast %cst_101 : f32 to vector<12x128xf32>
    %c0_102 = arith.constant 0 : index
    %c0_103 = arith.constant 0 : index
    %130 = vector.load %arg13[%c0_102, %c0_103] : memref<32x128xf32, #tpu.memory_space<vmem>>, vector<12x128xf32>
    %131 = arith.truncf %130 : vector<12x128xf32> to vector<12x128xbf16>
    %c0_104 = arith.constant 0 : index
    %c0_105 = arith.constant 0 : index
    %132 = vector.load %arg7[%c0_104, %c0_105] : memref<1024x128xbf16, #tpu.memory_space<vmem>>, vector<128x128xbf16>
    %cst_106 = arith.constant dense<0.000000e+00> : vector<12x128xf32>
    %133 = tpu.matmul %131, %132, %cst_106 {dimension_numbers = #tpu.dot_dimension_numbers<[1], [0], [0], [1], [0, 0, 1, 1], [], []>} : vector<12x128xbf16>, vector<128x128xbf16>, vector<12x128xf32> -> vector<12x128xf32>
    %134 = arith.addf %129, %133 : vector<12x128xf32>
    %c1_107 = arith.constant 1 : index
    %c0_108 = arith.constant 0 : index
    %135 = vector.load %arg13[%c1_107, %c0_108] : memref<32x128xf32, #tpu.memory_space<vmem>>, vector<12x128xf32>
    %136 = arith.truncf %135 : vector<12x128xf32> to vector<12x128xbf16>
    %c128_109 = arith.constant 128 : index
    %c0_110 = arith.constant 0 : index
    %137 = vector.load %arg7[%c128_109, %c0_110] : memref<1024x128xbf16, #tpu.memory_space<vmem>>, vector<128x128xbf16>
    %cst_111 = arith.constant dense<0.000000e+00> : vector<12x128xf32>
    %138 = tpu.matmul %136, %137, %cst_111 {dimension_numbers = #tpu.dot_dimension_numbers<[1], [0], [0], [1], [0, 0, 1, 1], [], []>} : vector<12x128xbf16>, vector<128x128xbf16>, vector<12x128xf32> -> vector<12x128xf32>
    %139 = arith.addf %134, %138 : vector<12x128xf32>
    %c2_112 = arith.constant 2 : index
    %c0_113 = arith.constant 0 : index
    %140 = vector.load %arg13[%c2_112, %c0_113] : memref<32x128xf32, #tpu.memory_space<vmem>>, vector<12x128xf32>
    %141 = arith.truncf %140 : vector<12x128xf32> to vector<12x128xbf16>
    %c256_114 = arith.constant 256 : index
    %c0_115 = arith.constant 0 : index
    %142 = vector.load %arg7[%c256_114, %c0_115] : memref<1024x128xbf16, #tpu.memory_space<vmem>>, vector<128x128xbf16>
    %cst_116 = arith.constant dense<0.000000e+00> : vector<12x128xf32>
    %143 = tpu.matmul %141, %142, %cst_116 {dimension_numbers = #tpu.dot_dimension_numbers<[1], [0], [0], [1], [0, 0, 1, 1], [], []>} : vector<12x128xbf16>, vector<128x128xbf16>, vector<12x128xf32> -> vector<12x128xf32>
    %144 = arith.addf %139, %143 : vector<12x128xf32>
    %c3_117 = arith.constant 3 : index
    %c0_118 = arith.constant 0 : index
    %145 = vector.load %arg13[%c3_117, %c0_118] : memref<32x128xf32, #tpu.memory_space<vmem>>, vector<12x128xf32>
    %146 = arith.truncf %145 : vector<12x128xf32> to vector<12x128xbf16>
    %c384_119 = arith.constant 384 : index
    %c0_120 = arith.constant 0 : index
    %147 = vector.load %arg7[%c384_119, %c0_120] : memref<1024x128xbf16, #tpu.memory_space<vmem>>, vector<128x128xbf16>
    %cst_121 = arith.constant dense<0.000000e+00> : vector<12x128xf32>
    %148 = tpu.matmul %146, %147, %cst_121 {dimension_numbers = #tpu.dot_dimension_numbers<[1], [0], [0], [1], [0, 0, 1, 1], [], []>} : vector<12x128xbf16>, vector<128x128xbf16>, vector<12x128xf32> -> vector<12x128xf32>
    %149 = arith.addf %144, %148 : vector<12x128xf32>
    %c4_122 = arith.constant 4 : index
    %c0_123 = arith.constant 0 : index
    %150 = vector.load %arg13[%c4_122, %c0_123] : memref<32x128xf32, #tpu.memory_space<vmem>>, vector<12x128xf32>
    %151 = arith.truncf %150 : vector<12x128xf32> to vector<12x128xbf16>
    %c512_124 = arith.constant 512 : index
    %c0_125 = arith.constant 0 : index
    %152 = vector.load %arg7[%c512_124, %c0_125] : memref<1024x128xbf16, #tpu.memory_space<vmem>>, vector<128x128xbf16>
    %cst_126 = arith.constant dense<0.000000e+00> : vector<12x128xf32>
    %153 = tpu.matmul %151, %152, %cst_126 {dimension_numbers = #tpu.dot_dimension_numbers<[1], [0], [0], [1], [0, 0, 1, 1], [], []>} : vector<12x128xbf16>, vector<128x128xbf16>, vector<12x128xf32> -> vector<12x128xf32>
    %154 = arith.addf %149, %153 : vector<12x128xf32>
    %c5_127 = arith.constant 5 : index
    %c0_128 = arith.constant 0 : index
    %155 = vector.load %arg13[%c5_127, %c0_128] : memref<32x128xf32, #tpu.memory_space<vmem>>, vector<12x128xf32>
    %156 = arith.truncf %155 : vector<12x128xf32> to vector<12x128xbf16>
    %c640_129 = arith.constant 640 : index
    %c0_130 = arith.constant 0 : index
    %157 = vector.load %arg7[%c640_129, %c0_130] : memref<1024x128xbf16, #tpu.memory_space<vmem>>, vector<128x128xbf16>
    %cst_131 = arith.constant dense<0.000000e+00> : vector<12x128xf32>
    %158 = tpu.matmul %156, %157, %cst_131 {dimension_numbers = #tpu.dot_dimension_numbers<[1], [0], [0], [1], [0, 0, 1, 1], [], []>} : vector<12x128xbf16>, vector<128x128xbf16>, vector<12x128xf32> -> vector<12x128xf32>
    %159 = arith.addf %154, %158 : vector<12x128xf32>
    %c6_132 = arith.constant 6 : index
    %c0_133 = arith.constant 0 : index
    %160 = vector.load %arg13[%c6_132, %c0_133] : memref<32x128xf32, #tpu.memory_space<vmem>>, vector<12x128xf32>
    %161 = arith.truncf %160 : vector<12x128xf32> to vector<12x128xbf16>
    %c768_134 = arith.constant 768 : index
    %c0_135 = arith.constant 0 : index
    %162 = vector.load %arg7[%c768_134, %c0_135] : memref<1024x128xbf16, #tpu.memory_space<vmem>>, vector<128x128xbf16>
    %cst_136 = arith.constant dense<0.000000e+00> : vector<12x128xf32>
    %163 = tpu.matmul %161, %162, %cst_136 {dimension_numbers = #tpu.dot_dimension_numbers<[1], [0], [0], [1], [0, 0, 1, 1], [], []>} : vector<12x128xbf16>, vector<128x128xbf16>, vector<12x128xf32> -> vector<12x128xf32>
    %164 = arith.addf %159, %163 : vector<12x128xf32>
    %c7_137 = arith.constant 7 : index
    %c0_138 = arith.constant 0 : index
    %165 = vector.load %arg13[%c7_137, %c0_138] : memref<32x128xf32, #tpu.memory_space<vmem>>, vector<12x128xf32>
    %166 = arith.truncf %165 : vector<12x128xf32> to vector<12x128xbf16>
    %c896_139 = arith.constant 896 : index
    %c0_140 = arith.constant 0 : index
    %167 = vector.load %arg7[%c896_139, %c0_140] : memref<1024x128xbf16, #tpu.memory_space<vmem>>, vector<128x128xbf16>
    %cst_141 = arith.constant dense<0.000000e+00> : vector<12x128xf32>
    %168 = tpu.matmul %166, %167, %cst_141 {dimension_numbers = #tpu.dot_dimension_numbers<[1], [0], [0], [1], [0, 0, 1, 1], [], []>} : vector<12x128xbf16>, vector<128x128xbf16>, vector<12x128xf32> -> vector<12x128xf32>
    %169 = arith.addf %164, %168 : vector<12x128xf32>
    %c0_142 = arith.constant 0 : index
    %c0_143 = arith.constant 0 : index
    %170 = vector.load %arg8[%c0_142, %c0_143] : memref<1x128xf32, #tpu.memory_space<vmem>>, vector<1x128xf32>
    %171 = vector.broadcast %170 : vector<1x128xf32> to vector<12x128xf32>
    %172 = arith.mulf %169, %171 : vector<12x128xf32>
    %c0_144 = arith.constant 0 : index
    %c0_145 = arith.constant 0 : index
    %173 = vector.load %arg9[%c0_144, %c0_145] : memref<1x128xf32, #tpu.memory_space<vmem>>, vector<1x128xf32>
    %174 = vector.broadcast %173 : vector<1x128xf32> to vector<12x128xf32>
    %175 = arith.addf %172, %174 : vector<12x128xf32>
    %cst_146 = arith.constant 0.000000e+00 : f32
    %176 = vector.broadcast %cst_146 : f32 to vector<12x128xf32>
    %177 = arith.cmpf ogt, %175, %176 : vector<12x128xf32>
    %cst_147 = arith.constant 0.00999999977 : f32
    %178 = vector.broadcast %cst_147 : f32 to vector<12x128xf32>
    %179 = arith.mulf %178, %175 : vector<12x128xf32>
    %180 = arith.select %177, %175, %179 : vector<12x128xi1>, vector<12x128xf32>
    %181 = vector.shape_cast %180 : vector<12x128xf32> to vector<3x4x128xf32>
    %cst_148 = arith.constant dense<0xFF800000> : vector<3x128xf32>
    %182 = vector.multi_reduction <maximumf>, %181, %cst_148 [1] : vector<3x4x128xf32> to vector<3x128xf32>
    %c8_149 = arith.constant 8 : index
    %c0_150 = arith.constant 0 : index
    %183 = vector.load %arg13[%c8_149, %c0_150] : memref<32x128xf32, #tpu.memory_space<vmem>>, vector<3x128xf32>
    tpu.vector_store %arg13[%c8_149, %c0_150], %182 {strides = array<i32>} : memref<32x128xf32, #tpu.memory_space<vmem>>, vector<3x128xf32>,
    %cst_151 = arith.constant 0.000000e+00 : f32
    %184 = vector.broadcast %cst_151 : f32 to vector<21x128xf32>
    %c11_152 = arith.constant 11 : index
    %c0_153 = arith.constant 0 : index
    %185 = vector.load %arg13[%c11_152, %c0_153] : memref<32x128xf32, #tpu.memory_space<vmem>>, vector<21x128xf32>
    tpu.vector_store %arg13[%c11_152, %c0_153], %184 {strides = array<i32>} : memref<32x128xf32, #tpu.memory_space<vmem>>, vector<21x128xf32>,
    %cst_154 = arith.constant 0.000000e+00 : f32
    %186 = vector.broadcast %cst_154 : f32 to vector<12x128xf32>
    %c0_155 = arith.constant 0 : index
    %c0_156 = arith.constant 0 : index
    %187 = vector.load %arg13[%c0_155, %c0_156] : memref<32x128xf32, #tpu.memory_space<vmem>>, vector<12x128xf32>
    %188 = arith.truncf %187 : vector<12x128xf32> to vector<12x128xbf16>
    %c0_157 = arith.constant 0 : index
    %c0_158 = arith.constant 0 : index
    %189 = vector.load %arg7[%c0_157, %c0_158] : memref<1024x128xbf16, #tpu.memory_space<vmem>>, vector<128x128xbf16>
    %cst_159 = arith.constant dense<0.000000e+00> : vector<12x128xf32>
    %190 = tpu.matmul %188, %189, %cst_159 {dimension_numbers = #tpu.dot_dimension_numbers<[1], [0], [0], [1], [0, 0, 1, 1], [], []>} : vector<12x128xbf16>, vector<128x128xbf16>, vector<12x128xf32> -> vector<12x128xf32>
    %191 = arith.addf %186, %190 : vector<12x128xf32>
    %c1_160 = arith.constant 1 : index
    %c0_161 = arith.constant 0 : index
    %192 = vector.load %arg13[%c1_160, %c0_161] : memref<32x128xf32, #tpu.memory_space<vmem>>, vector<12x128xf32>
    %193 = arith.truncf %192 : vector<12x128xf32> to vector<12x128xbf16>
    %c128_162 = arith.constant 128 : index
    %c0_163 = arith.constant 0 : index
    %194 = vector.load %arg7[%c128_162, %c0_163] : memref<1024x128xbf16, #tpu.memory_space<vmem>>, vector<128x128xbf16>
    %cst_164 = arith.constant dense<0.000000e+00> : vector<12x128xf32>
    %195 = tpu.matmul %193, %194, %cst_164 {dimension_numbers = #tpu.dot_dimension_numbers<[1], [0], [0], [1], [0, 0, 1, 1], [], []>} : vector<12x128xbf16>, vector<128x128xbf16>, vector<12x128xf32> -> vector<12x128xf32>
    %196 = arith.addf %191, %195 : vector<12x128xf32>
    %c2_165 = arith.constant 2 : index
    %c0_166 = arith.constant 0 : index
    %197 = vector.load %arg13[%c2_165, %c0_166] : memref<32x128xf32, #tpu.memory_space<vmem>>, vector<12x128xf32>
    %198 = arith.truncf %197 : vector<12x128xf32> to vector<12x128xbf16>
    %c256_167 = arith.constant 256 : index
    %c0_168 = arith.constant 0 : index
    %199 = vector.load %arg7[%c256_167, %c0_168] : memref<1024x128xbf16, #tpu.memory_space<vmem>>, vector<128x128xbf16>
    %cst_169 = arith.constant dense<0.000000e+00> : vector<12x128xf32>
    %200 = tpu.matmul %198, %199, %cst_169 {dimension_numbers = #tpu.dot_dimension_numbers<[1], [0], [0], [1], [0, 0, 1, 1], [], []>} : vector<12x128xbf16>, vector<128x128xbf16>, vector<12x128xf32> -> vector<12x128xf32>
    %201 = arith.addf %196, %200 : vector<12x128xf32>
    %c3_170 = arith.constant 3 : index
    %c0_171 = arith.constant 0 : index
    %202 = vector.load %arg13[%c3_170, %c0_171] : memref<32x128xf32, #tpu.memory_space<vmem>>, vector<12x128xf32>
    %203 = arith.truncf %202 : vector<12x128xf32> to vector<12x128xbf16>
    %c384_172 = arith.constant 384 : index
    %c0_173 = arith.constant 0 : index
    %204 = vector.load %arg7[%c384_172, %c0_173] : memref<1024x128xbf16, #tpu.memory_space<vmem>>, vector<128x128xbf16>
    %cst_174 = arith.constant dense<0.000000e+00> : vector<12x128xf32>
    %205 = tpu.matmul %203, %204, %cst_174 {dimension_numbers = #tpu.dot_dimension_numbers<[1], [0], [0], [1], [0, 0, 1, 1], [], []>} : vector<12x128xbf16>, vector<128x128xbf16>, vector<12x128xf32> -> vector<12x128xf32>
    %206 = arith.addf %201, %205 : vector<12x128xf32>
    %c4_175 = arith.constant 4 : index
    %c0_176 = arith.constant 0 : index
    %207 = vector.load %arg13[%c4_175, %c0_176] : memref<32x128xf32, #tpu.memory_space<vmem>>, vector<12x128xf32>
    %208 = arith.truncf %207 : vector<12x128xf32> to vector<12x128xbf16>
    %c512_177 = arith.constant 512 : index
    %c0_178 = arith.constant 0 : index
    %209 = vector.load %arg7[%c512_177, %c0_178] : memref<1024x128xbf16, #tpu.memory_space<vmem>>, vector<128x128xbf16>
    %cst_179 = arith.constant dense<0.000000e+00> : vector<12x128xf32>
    %210 = tpu.matmul %208, %209, %cst_179 {dimension_numbers = #tpu.dot_dimension_numbers<[1], [0], [0], [1], [0, 0, 1, 1], [], []>} : vector<12x128xbf16>, vector<128x128xbf16>, vector<12x128xf32> -> vector<12x128xf32>
    %211 = arith.addf %206, %210 : vector<12x128xf32>
    %c5_180 = arith.constant 5 : index
    %c0_181 = arith.constant 0 : index
    %212 = vector.load %arg13[%c5_180, %c0_181] : memref<32x128xf32, #tpu.memory_space<vmem>>, vector<12x128xf32>
    %213 = arith.truncf %212 : vector<12x128xf32> to vector<12x128xbf16>
    %c640_182 = arith.constant 640 : index
    %c0_183 = arith.constant 0 : index
    %214 = vector.load %arg7[%c640_182, %c0_183] : memref<1024x128xbf16, #tpu.memory_space<vmem>>, vector<128x128xbf16>
    %cst_184 = arith.constant dense<0.000000e+00> : vector<12x128xf32>
    %215 = tpu.matmul %213, %214, %cst_184 {dimension_numbers = #tpu.dot_dimension_numbers<[1], [0], [0], [1], [0, 0, 1, 1], [], []>} : vector<12x128xbf16>, vector<128x128xbf16>, vector<12x128xf32> -> vector<12x128xf32>
    %216 = arith.addf %211, %215 : vector<12x128xf32>
    %c6_185 = arith.constant 6 : index
    %c0_186 = arith.constant 0 : index
    %217 = vector.load %arg13[%c6_185, %c0_186] : memref<32x128xf32, #tpu.memory_space<vmem>>, vector<12x128xf32>
    %218 = arith.truncf %217 : vector<12x128xf32> to vector<12x128xbf16>
    %c768_187 = arith.constant 768 : index
    %c0_188 = arith.constant 0 : index
    %219 = vector.load %arg7[%c768_187, %c0_188] : memref<1024x128xbf16, #tpu.memory_space<vmem>>, vector<128x128xbf16>
    %cst_189 = arith.constant dense<0.000000e+00> : vector<12x128xf32>
    %220 = tpu.matmul %218, %219, %cst_189 {dimension_numbers = #tpu.dot_dimension_numbers<[1], [0], [0], [1], [0, 0, 1, 1], [], []>} : vector<12x128xbf16>, vector<128x128xbf16>, vector<12x128xf32> -> vector<12x128xf32>
    %221 = arith.addf %216, %220 : vector<12x128xf32>
    %c7_190 = arith.constant 7 : index
    %c0_191 = arith.constant 0 : index
    %222 = vector.load %arg13[%c7_190, %c0_191] : memref<32x128xf32, #tpu.memory_space<vmem>>, vector<12x128xf32>
    %223 = arith.truncf %222 : vector<12x128xf32> to vector<12x128xbf16>
    %c896_192 = arith.constant 896 : index
    %c0_193 = arith.constant 0 : index
    %224 = vector.load %arg7[%c896_192, %c0_193] : memref<1024x128xbf16, #tpu.memory_space<vmem>>, vector<128x128xbf16>
    %cst_194 = arith.constant dense<0.000000e+00> : vector<12x128xf32>
    %225 = tpu.matmul %223, %224, %cst_194 {dimension_numbers = #tpu.dot_dimension_numbers<[1], [0], [0], [1], [0, 0, 1, 1], [], []>} : vector<12x128xbf16>, vector<128x128xbf16>, vector<12x128xf32> -> vector<12x128xf32>
    %226 = arith.addf %221, %225 : vector<12x128xf32>
    %c0_195 = arith.constant 0 : index
    %c0_196 = arith.constant 0 : index
    %227 = vector.load %arg8[%c0_195, %c0_196] : memref<1x128xf32, #tpu.memory_space<vmem>>, vector<1x128xf32>
    %228 = vector.broadcast %227 : vector<1x128xf32> to vector<12x128xf32>
    %229 = arith.mulf %226, %228 : vector<12x128xf32>
    %c0_197 = arith.constant 0 : index
    %c0_198 = arith.constant 0 : index
    %230 = vector.load %arg9[%c0_197, %c0_198] : memref<1x128xf32, #tpu.memory_space<vmem>>, vector<1x128xf32>
    %231 = vector.broadcast %230 : vector<1x128xf32> to vector<12x128xf32>
    %232 = arith.addf %229, %231 : vector<12x128xf32>
    %cst_199 = arith.constant 0.000000e+00 : f32
    %233 = vector.broadcast %cst_199 : f32 to vector<12x128xf32>
    %234 = arith.cmpf ogt, %232, %233 : vector<12x128xf32>
    %cst_200 = arith.constant 0.00999999977 : f32
    %235 = vector.broadcast %cst_200 : f32 to vector<12x128xf32>
    %236 = arith.mulf %235, %232 : vector<12x128xf32>
    %237 = arith.select %234, %232, %236 : vector<12x128xi1>, vector<12x128xf32>
    %238 = vector.shape_cast %237 : vector<12x128xf32> to vector<3x4x128xf32>
    %cst_201 = arith.constant dense<0xFF800000> : vector<3x128xf32>
    %239 = vector.multi_reduction <maximumf>, %238, %cst_201 [1] : vector<3x4x128xf32> to vector<3x128xf32>
    %c8_202 = arith.constant 8 : index
    %c0_203 = arith.constant 0 : index
    %240 = vector.load %arg13[%c8_202, %c0_203] : memref<32x128xf32, #tpu.memory_space<vmem>>, vector<3x128xf32>
    tpu.vector_store %arg13[%c8_202, %c0_203], %239 {strides = array<i32>} : memref<32x128xf32, #tpu.memory_space<vmem>>, vector<3x128xf32>,
    %cst_204 = arith.constant 0.000000e+00 : f32
    %241 = vector.broadcast %cst_204 : f32 to vector<21x128xf32>
    %c11_205 = arith.constant 11 : index
    %c0_206 = arith.constant 0 : index
    %242 = vector.load %arg13[%c11_205, %c0_206] : memref<32x128xf32, #tpu.memory_space<vmem>>, vector<21x128xf32>
    tpu.vector_store %arg13[%c11_205, %c0_206], %241 {strides = array<i32>} : memref<32x128xf32, #tpu.memory_space<vmem>>, vector<21x128xf32>,
    %cst_207 = arith.constant 0.000000e+00 : f32
    %243 = vector.broadcast %cst_207 : f32 to vector<12x128xf32>
    %c0_208 = arith.constant 0 : index
    %c0_209 = arith.constant 0 : index
    %244 = vector.load %arg13[%c0_208, %c0_209] : memref<32x128xf32, #tpu.memory_space<vmem>>, vector<12x128xf32>
    %245 = arith.truncf %244 : vector<12x128xf32> to vector<12x128xbf16>
    %c0_210 = arith.constant 0 : index
    %c0_211 = arith.constant 0 : index
    %246 = vector.load %arg7[%c0_210, %c0_211] : memref<1024x128xbf16, #tpu.memory_space<vmem>>, vector<128x128xbf16>
    %cst_212 = arith.constant dense<0.000000e+00> : vector<12x128xf32>
    %247 = tpu.matmul %245, %246, %cst_212 {dimension_numbers = #tpu.dot_dimension_numbers<[1], [0], [0], [1], [0, 0, 1, 1], [], []>} : vector<12x128xbf16>, vector<128x128xbf16>, vector<12x128xf32> -> vector<12x128xf32>
    %248 = arith.addf %243, %247 : vector<12x128xf32>
    %c1_213 = arith.constant 1 : index
    %c0_214 = arith.constant 0 : index
    %249 = vector.load %arg13[%c1_213, %c0_214] : memref<32x128xf32, #tpu.memory_space<vmem>>, vector<12x128xf32>
    %250 = arith.truncf %249 : vector<12x128xf32> to vector<12x128xbf16>
    %c128_215 = arith.constant 128 : index
    %c0_216 = arith.constant 0 : index
    %251 = vector.load %arg7[%c128_215, %c0_216] : memref<1024x128xbf16, #tpu.memory_space<vmem>>, vector<128x128xbf16>
    %cst_217 = arith.constant dense<0.000000e+00> : vector<12x128xf32>
    %252 = tpu.matmul %250, %251, %cst_217 {dimension_numbers = #tpu.dot_dimension_numbers<[1], [0], [0], [1], [0, 0, 1, 1], [], []>} : vector<12x128xbf16>, vector<128x128xbf16>, vector<12x128xf32> -> vector<12x128xf32>
    %253 = arith.addf %248, %252 : vector<12x128xf32>
    %c2_218 = arith.constant 2 : index
    %c0_219 = arith.constant 0 : index
    %254 = vector.load %arg13[%c2_218, %c0_219] : memref<32x128xf32, #tpu.memory_space<vmem>>, vector<12x128xf32>
    %255 = arith.truncf %254 : vector<12x128xf32> to vector<12x128xbf16>
    %c256_220 = arith.constant 256 : index
    %c0_221 = arith.constant 0 : index
    %256 = vector.load %arg7[%c256_220, %c0_221] : memref<1024x128xbf16, #tpu.memory_space<vmem>>, vector<128x128xbf16>
    %cst_222 = arith.constant dense<0.000000e+00> : vector<12x128xf32>
    %257 = tpu.matmul %255, %256, %cst_222 {dimension_numbers = #tpu.dot_dimension_numbers<[1], [0], [0], [1], [0, 0, 1, 1], [], []>} : vector<12x128xbf16>, vector<128x128xbf16>, vector<12x128xf32> -> vector<12x128xf32>
    %258 = arith.addf %253, %257 : vector<12x128xf32>
    %c3_223 = arith.constant 3 : index
    %c0_224 = arith.constant 0 : index
    %259 = vector.load %arg13[%c3_223, %c0_224] : memref<32x128xf32, #tpu.memory_space<vmem>>, vector<12x128xf32>
    %260 = arith.truncf %259 : vector<12x128xf32> to vector<12x128xbf16>
    %c384_225 = arith.constant 384 : index
    %c0_226 = arith.constant 0 : index
    %261 = vector.load %arg7[%c384_225, %c0_226] : memref<1024x128xbf16, #tpu.memory_space<vmem>>, vector<128x128xbf16>
    %cst_227 = arith.constant dense<0.000000e+00> : vector<12x128xf32>
    %262 = tpu.matmul %260, %261, %cst_227 {dimension_numbers = #tpu.dot_dimension_numbers<[1], [0], [0], [1], [0, 0, 1, 1], [], []>} : vector<12x128xbf16>, vector<128x128xbf16>, vector<12x128xf32> -> vector<12x128xf32>
    %263 = arith.addf %258, %262 : vector<12x128xf32>
    %c4_228 = arith.constant 4 : index
    %c0_229 = arith.constant 0 : index
    %264 = vector.load %arg13[%c4_228, %c0_229] : memref<32x128xf32, #tpu.memory_space<vmem>>, vector<12x128xf32>
    %265 = arith.truncf %264 : vector<12x128xf32> to vector<12x128xbf16>
    %c512_230 = arith.constant 512 : index
    %c0_231 = arith.constant 0 : index
    %266 = vector.load %arg7[%c512_230, %c0_231] : memref<1024x128xbf16, #tpu.memory_space<vmem>>, vector<128x128xbf16>
    %cst_232 = arith.constant dense<0.000000e+00> : vector<12x128xf32>
    %267 = tpu.matmul %265, %266, %cst_232 {dimension_numbers = #tpu.dot_dimension_numbers<[1], [0], [0], [1], [0, 0, 1, 1], [], []>} : vector<12x128xbf16>, vector<128x128xbf16>, vector<12x128xf32> -> vector<12x128xf32>
    %268 = arith.addf %263, %267 : vector<12x128xf32>
    %c5_233 = arith.constant 5 : index
    %c0_234 = arith.constant 0 : index
    %269 = vector.load %arg13[%c5_233, %c0_234] : memref<32x128xf32, #tpu.memory_space<vmem>>, vector<12x128xf32>
    %270 = arith.truncf %269 : vector<12x128xf32> to vector<12x128xbf16>
    %c640_235 = arith.constant 640 : index
    %c0_236 = arith.constant 0 : index
    %271 = vector.load %arg7[%c640_235, %c0_236] : memref<1024x128xbf16, #tpu.memory_space<vmem>>, vector<128x128xbf16>
    %cst_237 = arith.constant dense<0.000000e+00> : vector<12x128xf32>
    %272 = tpu.matmul %270, %271, %cst_237 {dimension_numbers = #tpu.dot_dimension_numbers<[1], [0], [0], [1], [0, 0, 1, 1], [], []>} : vector<12x128xbf16>, vector<128x128xbf16>, vector<12x128xf32> -> vector<12x128xf32>
    %273 = arith.addf %268, %272 : vector<12x128xf32>
    %c6_238 = arith.constant 6 : index
    %c0_239 = arith.constant 0 : index
    %274 = vector.load %arg13[%c6_238, %c0_239] : memref<32x128xf32, #tpu.memory_space<vmem>>, vector<12x128xf32>
    %275 = arith.truncf %274 : vector<12x128xf32> to vector<12x128xbf16>
    %c768_240 = arith.constant 768 : index
    %c0_241 = arith.constant 0 : index
    %276 = vector.load %arg7[%c768_240, %c0_241] : memref<1024x128xbf16, #tpu.memory_space<vmem>>, vector<128x128xbf16>
    %cst_242 = arith.constant dense<0.000000e+00> : vector<12x128xf32>
    %277 = tpu.matmul %275, %276, %cst_242 {dimension_numbers = #tpu.dot_dimension_numbers<[1], [0], [0], [1], [0, 0, 1, 1], [], []>} : vector<12x128xbf16>, vector<128x128xbf16>, vector<12x128xf32> -> vector<12x128xf32>
    %278 = arith.addf %273, %277 : vector<12x128xf32>
    %c7_243 = arith.constant 7 : index
    %c0_244 = arith.constant 0 : index
    %279 = vector.load %arg13[%c7_243, %c0_244] : memref<32x128xf32, #tpu.memory_space<vmem>>, vector<12x128xf32>
    %280 = arith.truncf %279 : vector<12x128xf32> to vector<12x128xbf16>
    %c896_245 = arith.constant 896 : index
    %c0_246 = arith.constant 0 : index
    %281 = vector.load %arg7[%c896_245, %c0_246] : memref<1024x128xbf16, #tpu.memory_space<vmem>>, vector<128x128xbf16>
    %cst_247 = arith.constant dense<0.000000e+00> : vector<12x128xf32>
    %282 = tpu.matmul %280, %281, %cst_247 {dimension_numbers = #tpu.dot_dimension_numbers<[1], [0], [0], [1], [0, 0, 1, 1], [], []>} : vector<12x128xbf16>, vector<128x128xbf16>, vector<12x128xf32> -> vector<12x128xf32>
    %283 = arith.addf %278, %282 : vector<12x128xf32>
    %c0_248 = arith.constant 0 : index
    %c0_249 = arith.constant 0 : index
    %284 = vector.load %arg8[%c0_248, %c0_249] : memref<1x128xf32, #tpu.memory_space<vmem>>, vector<1x128xf32>
    %285 = vector.broadcast %284 : vector<1x128xf32> to vector<12x128xf32>
    %286 = arith.mulf %283, %285 : vector<12x128xf32>
    %c0_250 = arith.constant 0 : index
    %c0_251 = arith.constant 0 : index
    %287 = vector.load %arg9[%c0_250, %c0_251] : memref<1x128xf32, #tpu.memory_space<vmem>>, vector<1x128xf32>
    %288 = vector.broadcast %287 : vector<1x128xf32> to vector<12x128xf32>
    %289 = arith.addf %286, %288 : vector<12x128xf32>
    %cst_252 = arith.constant 0.000000e+00 : f32
    %290 = vector.broadcast %cst_252 : f32 to vector<12x128xf32>
    %291 = arith.cmpf ogt, %289, %290 : vector<12x128xf32>
    %cst_253 = arith.constant 0.00999999977 : f32
    %292 = vector.broadcast %cst_253 : f32 to vector<12x128xf32>
    %293 = arith.mulf %292, %289 : vector<12x128xf32>
    %294 = arith.select %291, %289, %293 : vector<12x128xi1>, vector<12x128xf32>
    %295 = vector.shape_cast %294 : vector<12x128xf32> to vector<3x4x128xf32>
    %cst_254 = arith.constant dense<0xFF800000> : vector<3x128xf32>
    %296 = vector.multi_reduction <maximumf>, %295, %cst_254 [1] : vector<3x4x128xf32> to vector<3x128xf32>
    %c8_255 = arith.constant 8 : index
    %c0_256 = arith.constant 0 : index
    %297 = vector.load %arg13[%c8_255, %c0_256] : memref<32x128xf32, #tpu.memory_space<vmem>>, vector<3x128xf32>
    tpu.vector_store %arg13[%c8_255, %c0_256], %296 {strides = array<i32>} : memref<32x128xf32, #tpu.memory_space<vmem>>, vector<3x128xf32>,
    %cst_257 = arith.constant 0.000000e+00 : f32
    %298 = vector.broadcast %cst_257 : f32 to vector<21x128xf32>
    %c11_258 = arith.constant 11 : index
    %c0_259 = arith.constant 0 : index
    %299 = vector.load %arg13[%c11_258, %c0_259] : memref<32x128xf32, #tpu.memory_space<vmem>>, vector<21x128xf32>
    tpu.vector_store %arg13[%c11_258, %c0_259], %298 {strides = array<i32>} : memref<32x128xf32, #tpu.memory_space<vmem>>, vector<21x128xf32>,
    %cst_260 = arith.constant 0.000000e+00 : f32
    %300 = vector.broadcast %cst_260 : f32 to vector<12x128xf32>
    %c0_261 = arith.constant 0 : index
    %c0_262 = arith.constant 0 : index
    %301 = vector.load %arg13[%c0_261, %c0_262] : memref<32x128xf32, #tpu.memory_space<vmem>>, vector<12x128xf32>
    %302 = arith.truncf %301 : vector<12x128xf32> to vector<12x128xbf16>
    %c0_263 = arith.constant 0 : index
    %c0_264 = arith.constant 0 : index
    %303 = vector.load %arg7[%c0_263, %c0_264] : memref<1024x128xbf16, #tpu.memory_space<vmem>>, vector<128x128xbf16>
    %cst_265 = arith.constant dense<0.000000e+00> : vector<12x128xf32>
    %304 = tpu.matmul %302, %303, %cst_265 {dimension_numbers = #tpu.dot_dimension_numbers<[1], [0], [0], [1], [0, 0, 1, 1], [], []>} : vector<12x128xbf16>, vector<128x128xbf16>, vector<12x128xf32> -> vector<12x128xf32>
    %305 = arith.addf %300, %304 : vector<12x128xf32>
    %c1_266 = arith.constant 1 : index
    %c0_267 = arith.constant 0 : index
    %306 = vector.load %arg13[%c1_266, %c0_267] : memref<32x128xf32, #tpu.memory_space<vmem>>, vector<12x128xf32>
    %307 = arith.truncf %306 : vector<12x128xf32> to vector<12x128xbf16>
    %c128_268 = arith.constant 128 : index
    %c0_269 = arith.constant 0 : index
    %308 = vector.load %arg7[%c128_268, %c0_269] : memref<1024x128xbf16, #tpu.memory_space<vmem>>, vector<128x128xbf16>
    %cst_270 = arith.constant dense<0.000000e+00> : vector<12x128xf32>
    %309 = tpu.matmul %307, %308, %cst_270 {dimension_numbers = #tpu.dot_dimension_numbers<[1], [0], [0], [1], [0, 0, 1, 1], [], []>} : vector<12x128xbf16>, vector<128x128xbf16>, vector<12x128xf32> -> vector<12x128xf32>
    %310 = arith.addf %305, %309 : vector<12x128xf32>
    %c2_271 = arith.constant 2 : index
    %c0_272 = arith.constant 0 : index
    %311 = vector.load %arg13[%c2_271, %c0_272] : memref<32x128xf32, #tpu.memory_space<vmem>>, vector<12x128xf32>
    %312 = arith.truncf %311 : vector<12x128xf32> to vector<12x128xbf16>
    %c256_273 = arith.constant 256 : index
    %c0_274 = arith.constant 0 : index
    %313 = vector.load %arg7[%c256_273, %c0_274] : memref<1024x128xbf16, #tpu.memory_space<vmem>>, vector<128x128xbf16>
    %cst_275 = arith.constant dense<0.000000e+00> : vector<12x128xf32>
    %314 = tpu.matmul %312, %313, %cst_275 {dimension_numbers = #tpu.dot_dimension_numbers<[1], [0], [0], [1], [0, 0, 1, 1], [], []>} : vector<12x128xbf16>, vector<128x128xbf16>, vector<12x128xf32> -> vector<12x128xf32>
    %315 = arith.addf %310, %314 : vector<12x128xf32>
    %c3_276 = arith.constant 3 : index
    %c0_277 = arith.constant 0 : index
    %316 = vector.load %arg13[%c3_276, %c0_277] : memref<32x128xf32, #tpu.memory_space<vmem>>, vector<12x128xf32>
    %317 = arith.truncf %316 : vector<12x128xf32> to vector<12x128xbf16>
    %c384_278 = arith.constant 384 : index
    %c0_279 = arith.constant 0 : index
    %318 = vector.load %arg7[%c384_278, %c0_279] : memref<1024x128xbf16, #tpu.memory_space<vmem>>, vector<128x128xbf16>
    %cst_280 = arith.constant dense<0.000000e+00> : vector<12x128xf32>
    %319 = tpu.matmul %317, %318, %cst_280 {dimension_numbers = #tpu.dot_dimension_numbers<[1], [0], [0], [1], [0, 0, 1, 1], [], []>} : vector<12x128xbf16>, vector<128x128xbf16>, vector<12x128xf32> -> vector<12x128xf32>
    %320 = arith.addf %315, %319 : vector<12x128xf32>
    %c4_281 = arith.constant 4 : index
    %c0_282 = arith.constant 0 : index
    %321 = vector.load %arg13[%c4_281, %c0_282] : memref<32x128xf32, #tpu.memory_space<vmem>>, vector<12x128xf32>
    %322 = arith.truncf %321 : vector<12x128xf32> to vector<12x128xbf16>
    %c512_283 = arith.constant 512 : index
    %c0_284 = arith.constant 0 : index
    %323 = vector.load %arg7[%c512_283, %c0_284] : memref<1024x128xbf16, #tpu.memory_space<vmem>>, vector<128x128xbf16>
    %cst_285 = arith.constant dense<0.000000e+00> : vector<12x128xf32>
    %324 = tpu.matmul %322, %323, %cst_285 {dimension_numbers = #tpu.dot_dimension_numbers<[1], [0], [0], [1], [0, 0, 1, 1], [], []>} : vector<12x128xbf16>, vector<128x128xbf16>, vector<12x128xf32> -> vector<12x128xf32>
    %325 = arith.addf %320, %324 : vector<12x128xf32>
    %c5_286 = arith.constant 5 : index
    %c0_287 = arith.constant 0 : index
    %326 = vector.load %arg13[%c5_286, %c0_287] : memref<32x128xf32, #tpu.memory_space<vmem>>, vector<12x128xf32>
    %327 = arith.truncf %326 : vector<12x128xf32> to vector<12x128xbf16>
    %c640_288 = arith.constant 640 : index
    %c0_289 = arith.constant 0 : index
    %328 = vector.load %arg7[%c640_288, %c0_289] : memref<1024x128xbf16, #tpu.memory_space<vmem>>, vector<128x128xbf16>
    %cst_290 = arith.constant dense<0.000000e+00> : vector<12x128xf32>
    %329 = tpu.matmul %327, %328, %cst_290 {dimension_numbers = #tpu.dot_dimension_numbers<[1], [0], [0], [1], [0, 0, 1, 1], [], []>} : vector<12x128xbf16>, vector<128x128xbf16>, vector<12x128xf32> -> vector<12x128xf32>
    %330 = arith.addf %325, %329 : vector<12x128xf32>
    %c6_291 = arith.constant 6 : index
    %c0_292 = arith.constant 0 : index
    %331 = vector.load %arg13[%c6_291, %c0_292] : memref<32x128xf32, #tpu.memory_space<vmem>>, vector<12x128xf32>
    %332 = arith.truncf %331 : vector<12x128xf32> to vector<12x128xbf16>
    %c768_293 = arith.constant 768 : index
    %c0_294 = arith.constant 0 : index
    %333 = vector.load %arg7[%c768_293, %c0_294] : memref<1024x128xbf16, #tpu.memory_space<vmem>>, vector<128x128xbf16>
    %cst_295 = arith.constant dense<0.000000e+00> : vector<12x128xf32>
    %334 = tpu.matmul %332, %333, %cst_295 {dimension_numbers = #tpu.dot_dimension_numbers<[1], [0], [0], [1], [0, 0, 1, 1], [], []>} : vector<12x128xbf16>, vector<128x128xbf16>, vector<12x128xf32> -> vector<12x128xf32>
    %335 = arith.addf %330, %334 : vector<12x128xf32>
    %c7_296 = arith.constant 7 : index
    %c0_297 = arith.constant 0 : index
    %336 = vector.load %arg13[%c7_296, %c0_297] : memref<32x128xf32, #tpu.memory_space<vmem>>, vector<12x128xf32>
    %337 = arith.truncf %336 : vector<12x128xf32> to vector<12x128xbf16>
    %c896_298 = arith.constant 896 : index
    %c0_299 = arith.constant 0 : index
    %338 = vector.load %arg7[%c896_298, %c0_299] : memref<1024x128xbf16, #tpu.memory_space<vmem>>, vector<128x128xbf16>
    %cst_300 = arith.constant dense<0.000000e+00> : vector<12x128xf32>
    %339 = tpu.matmul %337, %338, %cst_300 {dimension_numbers = #tpu.dot_dimension_numbers<[1], [0], [0], [1], [0, 0, 1, 1], [], []>} : vector<12x128xbf16>, vector<128x128xbf16>, vector<12x128xf32> -> vector<12x128xf32>
    %340 = arith.addf %335, %339 : vector<12x128xf32>
    %c0_301 = arith.constant 0 : index
    %c0_302 = arith.constant 0 : index
    %341 = vector.load %arg8[%c0_301, %c0_302] : memref<1x128xf32, #tpu.memory_space<vmem>>, vector<1x128xf32>
    %342 = vector.broadcast %341 : vector<1x128xf32> to vector<12x128xf32>
    %343 = arith.mulf %340, %342 : vector<12x128xf32>
    %c0_303 = arith.constant 0 : index
    %c0_304 = arith.constant 0 : index
    %344 = vector.load %arg9[%c0_303, %c0_304] : memref<1x128xf32, #tpu.memory_space<vmem>>, vector<1x128xf32>
    %345 = vector.broadcast %344 : vector<1x128xf32> to vector<12x128xf32>
    %346 = arith.addf %343, %345 : vector<12x128xf32>
    %cst_305 = arith.constant 0.000000e+00 : f32
    %347 = vector.broadcast %cst_305 : f32 to vector<12x128xf32>
    %348 = arith.cmpf ogt, %346, %347 : vector<12x128xf32>
    %cst_306 = arith.constant 0.00999999977 : f32
    %349 = vector.broadcast %cst_306 : f32 to vector<12x128xf32>
    %350 = arith.mulf %349, %346 : vector<12x128xf32>
    %351 = arith.select %348, %346, %350 : vector<12x128xi1>, vector<12x128xf32>
    %352 = vector.shape_cast %351 : vector<12x128xf32> to vector<3x4x128xf32>
    %cst_307 = arith.constant dense<0xFF800000> : vector<3x128xf32>
    %353 = vector.multi_reduction <maximumf>, %352, %cst_307 [1] : vector<3x4x128xf32> to vector<3x128xf32>
    %354 = vector.extract_strided_slice %353 {offsets = [0, 0], sizes = [1, 128], strides = [1, 1]} : vector<3x128xf32> to vector<1x128xf32>
    %355 = vector.extract_strided_slice %353 {offsets = [1, 0], sizes = [1, 128], strides = [1, 1]} : vector<3x128xf32> to vector<1x128xf32>
    %356 = vector.extract_strided_slice %353 {offsets = [2, 0], sizes = [1, 128], strides = [1, 1]} : vector<3x128xf32> to vector<1x128xf32>
    %357 = tpu.concatenate %354, %355, %356 in 1 : vector<1x128xf32>, vector<1x128xf32>, vector<1x128xf32> -> vector<1x384xf32>
    %c0_308 = arith.constant 0 : index
    %c0_309 = arith.constant 0 : index
    %358 = vector.load %arg10[%c0_308, %c0_309] : memref<384x128xf32, #tpu.memory_space<vmem>>, vector<384x128xf32>
    %cst_310 = arith.constant dense<0.000000e+00> : vector<1x128xf32>
    %359 = tpu.matmul %357, %358, %cst_310 {dimension_numbers = #tpu.dot_dimension_numbers<[1], [0], [0], [1], [0, 0, 1, 1], [], []>} : vector<1x384xf32>, vector<384x128xf32>, vector<1x128xf32> -> vector<1x128xf32>
    %c0_311 = arith.constant 0 : index
    %c0_312 = arith.constant 0 : index
    %360 = vector.load %arg11[%c0_311, %c0_312] : memref<1x128xf32, #tpu.memory_space<vmem>>, vector<1x128xf32>
    %361 = arith.addf %359, %360 : vector<1x128xf32>
    %c0_313 = arith.constant 0 : index
    %c0_314 = arith.constant 0 : index
    %c0_315 = arith.constant 0 : index
    %362 = vector.load %arg12[%c0_313, %c0_314, %c0_315] : memref<1x1x128xf32, #tpu.memory_space<vmem>>, vector<1x1x128xf32>
    %363 = vector.shape_cast %362 : vector<1x1x128xf32> to vector<1x128xf32>
    %364 = vector.shape_cast %361 : vector<1x128xf32> to vector<1x1x128xf32>
    tpu.vector_store %arg12[%c0_313, %c0_314, %c0_315], %364 {strides = array<i32>} : memref<1x1x128xf32, #tpu.memory_space<vmem>>, vector<1x1x128xf32>,
    return
  }
  func.func @transform_0(%arg0: i32) -> (i32, i32, i32) {
    %c0_i32 = arith.constant 0 : i32
    %c0_i32_0 = arith.constant 0 : i32
    %c0_i32_1 = arith.constant 0 : i32
    return %arg0, %c0_i32, %c0_i32_0 : i32, i32, i32
  }
  func.func @transform_1(%arg0: i32) -> (i32, i32) {
    %c0_i32 = arith.constant 0 : i32
    %c0_i32_0 = arith.constant 0 : i32
    %c0_i32_1 = arith.constant 0 : i32
    return %c0_i32, %c0_i32_0 : i32, i32
  }
  func.func @transform_2(%arg0: i32) -> (i32, i32) {
    %c0_i32 = arith.constant 0 : i32
    %c0_i32_0 = arith.constant 0 : i32
    %c0_i32_1 = arith.constant 0 : i32
    return %c0_i32, %c0_i32_0 : i32, i32
  }
  func.func @transform_3(%arg0: i32) -> (i32, i32) {
    %c0_i32 = arith.constant 0 : i32
    %c0_i32_0 = arith.constant 0 : i32
    %c0_i32_1 = arith.constant 0 : i32
    return %c0_i32, %c0_i32_0 : i32, i32
  }
  func.func @transform_4(%arg0: i32) -> (i32, i32) {
    %c0_i32 = arith.constant 0 : i32
    %c0_i32_0 = arith.constant 0 : i32
    %c0_i32_1 = arith.constant 0 : i32
    return %c0_i32, %c0_i32_0 : i32, i32
  }
  func.func @transform_5(%arg0: i32) -> (i32, i32) {
    %c0_i32 = arith.constant 0 : i32
    %c0_i32_0 = arith.constant 0 : i32
    %c0_i32_1 = arith.constant 0 : i32
    return %c0_i32, %c0_i32_0 : i32, i32
  }
  func.func @transform_6(%arg0: i32) -> (i32, i32) {
    %c0_i32 = arith.constant 0 : i32
    %c0_i32_0 = arith.constant 0 : i32
    %c0_i32_1 = arith.constant 0 : i32
    return %c0_i32, %c0_i32_0 : i32, i32
  }
  func.func @transform_7(%arg0: i32) -> (i32, i32) {
    %c0_i32 = arith.constant 0 : i32
    %c0_i32_0 = arith.constant 0 : i32
    %c0_i32_1 = arith.constant 0 : i32
    return %c0_i32, %c0_i32_0 : i32, i32
  }
  func.func @transform_8(%arg0: i32) -> (i32, i32) {
    %c0_i32 = arith.constant 0 : i32
    %c0_i32_0 = arith.constant 0 : i32
    %c0_i32_1 = arith.constant 0 : i32
    return %c0_i32, %c0_i32_0 : i32, i32
  }
  func.func @transform_9(%arg0: i32) -> (i32, i32) {
    %c0_i32 = arith.constant 0 : i32
    %c0_i32_0 = arith.constant 0 : i32
    %c0_i32_1 = arith.constant 0 : i32
    return %c0_i32, %c0_i32_0 : i32, i32
  }
  func.func @transform_10(%arg0: i32) -> (i32, i32) {
    %c0_i32 = arith.constant 0 : i32
    %c0_i32_0 = arith.constant 0 : i32
    %c0_i32_1 = arith.constant 0 : i32
    return %c0_i32, %c0_i32_0 : i32, i32
  }
  func.func @transform_11(%arg0: i32) -> (i32, i32, i32) {
    %c0_i32 = arith.constant 0 : i32
    %c0_i32_0 = arith.constant 0 : i32
    %c0_i32_1 = arith.constant 0 : i32
    return %arg0, %c0_i32, %c0_i32_0 : i32, i32, i32
  }
}

</mosaic_0001>

<bundles_post_ra>
// kernel: vanilla_conv1d_forward.1
= control target key start
LH: loop header
LB: loop body
LE: loop exit
PB: predicated region body
PF: predicated region fallthrough
CT: control target
= control target key end

     0   :  { %s10147_s0 = inlined_call_operand.vmem [shape: f32[2,16,128], index: 0, kind: input, shape index: {}]   ;;  %s10148_s1 = inlined_call_operand.vmem [shape: f32[1,128], index: 1, kind: input, shape index: {}]   ;;  %s10149_s2 = inlined_call_operand.vmem [shape: f32[1,128], index: 2, kind: input, shape index: {}]   ;;  %s10150_s3 = inlined_call_operand.hbm [shape: bf16[1024,128], index: 3, kind: input, shape index: {}]   ;;  %s10151_s4 = inlined_call_operand.vmem [shape: f32[1,128], index: 4, kind: input, shape index: {}]   ;;  %s10152_s5 = inlined_call_operand.vmem [shape: f32[1,128], index: 5, kind: input, shape index: {}]   ;;  %s10153_s6 = inlined_call_operand.hbm [shape: bf16[1024,128], index: 6, kind: input, shape index: {}]   ;;  %s10154_s7 = inlined_call_operand.vmem [shape: f32[1,128], index: 7, kind: input, shape index: {}]   ;;  %s10155_s8 = inlined_call_operand.vmem [shape: f32[1,128], index: 8, kind: input, shape index: {}]   ;;  %s10156_s9 = inlined_call_operand.hbm [shape: f32[384,128], index: 9, kind: input, shape index: {}]   ;;  %s10157_s10 = inlined_call_operand.vmem [shape: f32[1,128], index: 10, kind: input, shape index: {}]   ;;  %s10158_s11 = inlined_call_operand.hbm [shape: f32[2,1,128], index: 11, kind: output, shape index: {}]  }
   0x1   :  { %10169 = sst [smem:[#allocation19_spill]] %s10158_s11 }
   0x2   :  { %16 = vsyncpa [#allocation4], 0 }
   0x3   :  { %17 = vsyncpa [#allocation7], 0 }
   0x4   :  { %18 = vsyncpa [#allocation5], 0 }
   0x5   :  { %20 = vsyncpa [#allocation5 + $0x1], 0  ;;  %s9282_s17 = smov 0   ;;  %s9284_s18 = smov 0  }
   0x6   :  { %s9286_s19 = smov 0   ;;  %s9288_s20 = smov 0  }
   0x7 LB: > { %10170 = sst [smem:[#allocation13_spill]] %s9197_s17  ;;  %s9303_s21 = sadd.s32 4294967295, %s9209_s20   ;;  %s9209_s20 = sphi %s9288_s20, %s10192_s20   ;;  %s9205_s19 = sphi %s9286_s19, %s10194_s19   ;;  %s9201_s18 = sphi %s9284_s18, %s10196_s18   ;;  %s9197_s17 = sphi %s9282_s17, %s10195_s17  }
   0x8   : > { %10171 = sst [smem:[#allocation14_spill]] %s9205_s19  ;;  %s6466_s22 = sadd.s32 4294967294, %s9209_s20  }
   0x9   : > { %10172 = sst [smem:[#allocation15_spill]] %s9209_s20  ;;  %s9307_s23 = sadd.s32 1, %s9209_s20  }
   0xa   : > { %10173 = sst [smem:[#allocation16_spill]] %s9307_s23  ;;  %s269_s24 = sadd.s32 1, %s9205_s19 }
   0xb   : > { %s266_s25 = ssub.s32 %s9209_s20, %s9307_s23  ;;  %p279_p0 = scmp.ne.s32.totalorder %s9205_s19, %s9201_s18 }
   0xc   : > { %p267_p1 = scmp.eq.s32.totalorder %s266_s25, 0  ;;  %p280_p2 = scmp.eq.s32.totalorder %s9303_s21, 1 }
   0xd   : > { %p285_p3 = scmp.ne.s32.totalorder %s9201_s18, %s9197_s17  ;;  %p286_p4 = scmp.eq.s32.totalorder %s6466_s22, 1 }
   0xe   : > { %s9318_s26 = scalar_select %p267_p1, %s9205_s19, %s269_s24  }
   0xf   : > { %p9320_p5 = por %p280_p2, %p279_p0  ;;  %p9324_p6 = por %p286_p4, %p285_p3 }
  0x10   : > { %10174 = sst [smem:[#allocation17_spill]] %s9318_s26  ;;  %p6467_p7 = scmp.ge.s32.totalorder %s9209_s20, 1 }
  0x11   : > { %s10175_s27 = scalar_select %p9320_p5, 1, 0 }
  0x12   : > { %s10176_s28 = scalar_select %p9324_p6, 1, 0 }
  0x13   : > { %p293_p8 = scmp.lt.s32.totalorder %s9209_s20, 3  ;;  %p10162_p9 = scmp.eq.s32.totalorder %s9303_s21, 0 }
  0x14   : > { %10177 = sst [smem:[#allocation18_spill]] %s10176_s28  ;;  %s9211_s30 = smov [#allocation6]  }
  0x15   : > { %p9331_p10 = pnand %p6467_p7, %p293_p8  ;;  %s330_s12 = sshll.u32 %s9211_s30, 4  ;;  %s9337_s12 = int_to_ptr.vmem [resolvable:$true] %s330_s12 }
  0x16   : > { %s9212_s14 = smov [#allocation3]   ;;  %s9213_s16 = smov [#allocation8]  }
  0x17   : > { %s10178_s29 = scalar_select %p9331_p10, 1, 0 }
  0x18   : > { %p8605_p11 = pneg %p9331_p10  ;;  %s311_s15 = sshll.u32 %s9212_s14, 4  ;;  %s9345_s15 = int_to_ptr.vmem [resolvable:$true] %s311_s15 }
  0x19   : > { %s9347_s22 = sshll.u32 %s9213_s16, 4  ;;  %s9055_s26 = scalar_lea.hbm %s10153_s6, 8192  ;;  %s350_s22 = int_to_ptr.vmem [resolvable:$true] %s9347_s22 }
  0x1a   : > { %p9341_p12 = pnand %p10162_p9, %p8605_p11  ;;  %p9056_p13 = scmp.ne.s32.totalorder %s10153_s6, %s9055_s26 }
  0x1b   : > { %p9062_p3 = scmp.lt.u32.totalorder %s9055_s26, %s10153_s6 }
  0x1c   : > { %p9357_p0 = pneg %p9341_p12 }
  0x1e   : > { %p9058_p1 = pnand %p9357_p0, %p9056_p13 }
  0x20   : > { %p9059_p2 = pneg %p9058_p1 }
  0x22   : > { %p9064_p4 = pnand %p9062_p3, %p9059_p2 }
  0x24   : > { %9067 = shalt.err (!%p9064_p4)
}
  0x25   : > { %s9068_s19 = scalar_lea.vmem %s9337_s12, 8192  ;;  %p9076_p9 = scmp.lt.s32.totalorder %s9337_s12, %s9337_s12 }
  0x26   : > { %p9069_p7 = scmp.ne.s32.totalorder %s9337_s12, %s9068_s19  ;;  %p9077_p6 = scmp.lt.s32.totalorder %s9068_s19, %s9068_s19 }
  0x28   : > { %p9071_p8 = pnand %p9069_p7, %p9357_p0  ;;  %p9078_p13 = por %p9077_p6, %p9076_p9 }
  0x2a   : > { %p9072_p11 = pneg %p9071_p8 }
  0x2c   : > { %p9079_p1 = pnand %p9078_p13, %p9072_p11 }
  0x2e   : > { %9082 = shalt.err (!%p9079_p1)
}
  0x2f   : > { %s9214_s24 = smov 64   ;;  %s9215_s26 = smov 4  }
  0x30   : > { %8611 = dma.hbm_to_vmem [thread:$0]  (!%p9341_p12), %s10153_s6, 8192, %s9337_s12, [#allocation7], %s9214_s24, %s9214_s24, %s9215_s26  }
  0x31   : > { %s9083_s28 = scalar_lea.hbm %s10150_s3, 8192 }
  0x32   : > { %p9084_p6 = scmp.ne.s32.totalorder %s10150_s3, %s9083_s28  ;;  %p9090_p3 = scmp.lt.u32.totalorder %s9083_s28, %s10150_s3 }
  0x34   : > { %p9086_p9 = pnand %p9084_p6, %p9357_p0 }
  0x36   : > { %p9087_p2 = pneg %p9086_p9 }
  0x38   : > { %p9092_p4 = pnand %p9090_p3, %p9087_p2 }
  0x3a   : > { %9095 = shalt.err (!%p9092_p4)
}
  0x3b   : > { %s9096_s12 = scalar_lea.vmem %s9345_s15, 8192  ;;  %p9104_p13 = scmp.lt.s32.totalorder %s9345_s15, %s9345_s15 }
  0x3c   : > { %p9097_p7 = scmp.ne.s32.totalorder %s9345_s15, %s9096_s12  ;;  %p9105_p1 = scmp.lt.s32.totalorder %s9096_s12, %s9096_s12 }
  0x3e   : > { %p9099_p8 = pnand %p9097_p7, %p9357_p0  ;;  %p9106_p6 = por %p9105_p1, %p9104_p13 }
  0x40   : > { %p9100_p11 = pneg %p9099_p8 }
  0x42   : > { %p9107_p9 = pnand %p9106_p6, %p9100_p11 }
  0x44   : > { %9110 = shalt.err (!%p9107_p9)
}
  0x45   : > { %8608 = dma.hbm_to_vmem [thread:$0]  (!%p9341_p12), %s10150_s3, 8192, %s9345_s15, [#allocation4], %s9214_s24, %s9214_s24, %s9215_s26  }
  0x46   : > { %s9111_s25 = scalar_lea.hbm %s10156_s9, 6144 }
  0x47   : > { %p9112_p2 = scmp.ne.s32.totalorder %s10156_s9, %s9111_s25  ;;  %p9118_p7 = scmp.lt.u32.totalorder %s9111_s25, %s10156_s9 }
  0x49   : > { %p9114_p3 = pnand %p9112_p2, %p9357_p0 }
  0x4b   : > { %p9115_p4 = pneg %p9114_p3 }
  0x4d   : > { %p9120_p8 = pnand %p9118_p7, %p9115_p4 }
  0x4f   : > { %9123 = shalt.err (!%p9120_p8)
}
  0x50   : > { %s9124_s12 = scalar_lea.vmem %s350_s22, 6144  ;;  %p9132_p6 = scmp.lt.s32.totalorder %s350_s22, %s350_s22 }
  0x51   : > { %p9125_p11 = scmp.ne.s32.totalorder %s350_s22, %s9124_s12  ;;  %p9133_p9 = scmp.lt.s32.totalorder %s9124_s12, %s9124_s12 }
  0x53   : > { %p9127_p13 = pnand %p9125_p11, %p9357_p0  ;;  %p9134_p5 = por %p9133_p9, %p9132_p6 }
  0x55   : > { %p9128_p1 = pneg %p9127_p13 }
  0x57   : > { %p9135_p10 = pnand %p9134_p5, %p9128_p1 }
  0x59   : > { %9138 = shalt.err (!%p9135_p10)
}
  0x5a   : > { %s9216_s15 = smov 128   ;;  %s9217_s24 = smov 8  }
  0x5b   : > { %8614 = dma.hbm_to_vmem [thread:$0]  (!%p9341_p12), %s10156_s9, 6144, %s350_s22, [#allocation7], %s9216_s15, %s9216_s15, %s9217_s24  }
  0x5c   : > { %p10181_p2 = scmp.ne.s32.totalorder %s10178_s29, 0 }
  0x5d   : > { %p10182_p3 = scmp.eq.s32.totalorder (!%p10181_p2), %s9303_s21, 0 }
  0x5e   : > { %376 = sbr.rel (%p10181_p2) target bundleno = 3186 (0xc72), region = 64 }
  0x65   : > { %9184 = dma.done.wait (%p10182_p3), [#allocation4], 8192   ;;  %p10183_p0 = pmov %p10182_p3 }
  0x67   : > { %9186 = vsyncadd (%p10183_p0), [#allocation4], 4294959104  ;;  %p10184_p5 = pmov %p10183_p0 }
  0x68   : > { %p10185_p10 = pmov %p10183_p0 }
  0x69   : > { %9188 = dma.done.wait (%p10184_p5), [#allocation7], 14336  }
  0x6a   : > { %9190 = vsyncadd (%p10185_p10), [#allocation7], 4294952960  ;;  %p423_p4 = scmp.lt.s32.totalorder %s9303_s21, 1  ;;  %v9218_v0 = vmov 0.0   ;;  %v8668_v1 = vld [vmem:[#allocation3 + $0x40] sm:$0xff]   ;;  %v8669_v2 = vld [vmem:[#allocation3 + $0x48] sm:$0xff]  }
  0x6b   : > { %429 = vst [vmem:[#allocation2] sm:$0xff] %v9218_v0  ;;  %452 = vst [vmem:[#allocation2 + $0x18] sm:$0xff] %v9218_v0  ;;  %7532 = vmatprep.subr.bf16.mxu1 %v9218_v0  ;;  %7372 = vmatprep.subr.bf16.mxu0 %v8668_v1  ;;  %v8670_v3 = vld [vmem:[#allocation3 + $0x50] sm:$0xff]   ;;  %v8671_v4 = vld [vmem:[#allocation3 + $0x58] sm:$0xff]   ;;  %vm9219_vm0 = vmmov 0   ;;  %vm1453_vm2 = vcmask 1043456  }
  0x6c   : > { %s424_s23 = scalar_select %p423_p4, %s9303_s21, 1  ;;  %7373 = vmatpush3.bf16.msra.mxu0 %v8668_v1  ;;  %v6478_v7 = vld [vmem:[%s10148_s1] ss:$0 sm:$0xff]  ;;  %v8673_v14 = vld [vmem:[#allocation3 + $0x68] sm:$0xff]   ;;  %v8674_v15 = vld [vmem:[#allocation3 + $0x70] sm:$0xff]   ;;  %vm1502_vm5 = vcmask 1041409  }
  0x6d   : > { %7374 = vmatprep.subr.bf16.mxu0 %v8669_v2  ;;  %v6479_v10 = vld [vmem:[%s10149_s2] ss:$0 sm:$0xff]  ;;  %v8675_v19 = vld [vmem:[#allocation3 + $0x78] sm:$0xff]   ;;  %v8677_v25 = vld [vmem:[#allocation3 + $0x8] sm:$0xff]   ;;  %vm1504_vm6 = vcmask 1042434   ;;  %vm1506_vm7 = vcmask 1043459  }
  0x6e   : > { %s6879_s29 = sshll.u32 %s424_s23, 4  ;;  %v8672_v13 = vld [vmem:[#allocation3 + $0x60] sm:$0xff]   ;;  %v8678_v26 = vld [vmem:[#allocation3 + $0x10] sm:$0xff]   ;;  %v8679_v27 = vld [vmem:[#allocation3 + $0x18] sm:$0xff]   ;;  %vm1508_vm8 = vcmask 1044484   ;;  %vm1510_vm9 = vcmask 1045509  }
  0x6f   : > { %s427_s17 = scalar_lea.vmem %s10147_s0, %s6879_s29  ;;  %v8676_v22 = vld [vmem:[#allocation3] sm:$0xff]   ;;  %v8681_v29 = vld [vmem:[#allocation3 + $0x28] sm:$0xff]   ;;  %v8682_v30 = vld [vmem:[#allocation3 + $0x30] sm:$0xff]   ;;  %s421_s30 = sand.u32 1, %s9201_s18  }
  0x70   : > { %7375 = vmatpush3.bf16.msra.mxu0 %v8669_v2  ;;  %v430_v5 = vld [vmem:[%s427_s17] sm:$0xff]  ;;  %v431_v6 = vld [vmem:[%s427_s17 + $0x8] sm:$0xff]  ;;  %v8683_v31 = vld [vmem:[#allocation3 + $0x38] sm:$0xff]   ;;  %s6876_s19 = sshll.u32 %s9303_s21, 4  ;;  %s422_s12 = scalar_lea.vmem [#allocation9], %s421_s30 }
  0x71   : > { %7376 = vmatprep.subr.bf16.mxu0 %v8670_v3  ;;  %v439_v8 = vmul.f32 %v6478_v7, %v430_v5  ;;  %v440_v9 = vmul.f32 %v6478_v7, %v431_v6  ;;  %v8680_v28 = vld [vmem:[#allocation3 + $0x20] sm:$0xff]   ;;  %v8685_v38 = vld [vmem:[#allocation3 + $0x88] sm:$0xff]   ;;  %v8686_v39 = vld [vmem:[#allocation3 + $0x90] sm:$0xff]   ;;  %s6380_s15 = sshll.u32 %s422_s12, 4  ;;  %s10186_s11 = sld [smem:[#allocation19_spill]]  ;;  %s10107_s15 = int_to_ptr.vmem [resolvable:$true] %s6380_s15 }
  0x72   : > { %v478_v21 = vld [vmem:[#allocation2 + $0x19] sm:$0x1]  ;;  %v456_v32 = vld [vmem:[#allocation2 + $0x18] sm:$0x1]  ;;  %v8684_v33 = vld [vmem:[#allocation3 + $0x80] sm:$0xff]   ;;  %s6368_s29 = scalar_lea.sflag [#allocation5], %s421_s30 }
  0x73   : > { %v448_v11 = vadd.f32 %v6479_v10, %v439_v8  ;;  %v449_v12 = vadd.f32 %v6479_v10, %v440_v9  ;;  %v8687_v40 = vld [vmem:[#allocation3 + $0x98] sm:$0xff]   ;;  %v8688_v41 = vld [vmem:[#allocation3 + $0xa0] sm:$0xff]   ;;  %v8689_v42 = vld [vmem:[#allocation3 + $0xa8] sm:$0xff]   ;;  %s9139_s13 = scalar_lea.vmem %s10107_s15, 16  ;;  %p10187_p7 = scmp.ne.s32.totalorder %s10175_s27, 0 }
  0x74   : > { %7377 = vmatpush3.bf16.msra.mxu0 %v8670_v3  ;;  %v8690_v43 = vld [vmem:[#allocation3 + $0xb0] sm:$0xff]   ;;  %v8691_v44 = vld [vmem:[#allocation3 + $0xb8] sm:$0xff]   ;;  %v8692_v47 = vld [vmem:[#allocation3 + $0xc0] sm:$0xff]   ;;  %p9140_p12 = scmp.ne.s32.totalorder %s10107_s15, %s9139_s13  ;;  %s9221_s21 = smov [#allocation9]  }
  0x75   : > { %7378 = vmatprep.subr.bf16.mxu0 %v8671_v4  ;;  %450 = vst [vmem:[#allocation2 + $0x8] sm:$0xff] %v448_v11  ;;  %451 = vst [vmem:[#allocation2 + $0x10] sm:$0xff] %v449_v12  ;;  %v457_v24 = vpack.c.bf16 %v448_v11, %v9218_v0  ;;  %v458_v36 = vpack.c.bf16 %v456_v32, %v449_v12  ;;  %v692_v46 = vld [vmem:[#allocation2 + $0x1a] sm:$0x1]  ;;  %v8693_v51 = vld [vmem:[#allocation3 + $0xc8] sm:$0xff]   ;;  %s9143_s22 = sshll.u32 %s9221_s21, 4  ;;  %s9144_s22 = int_to_ptr.vmem [resolvable:$false] %s9143_s22 }
  0x76   : > { %v9447_v54 = vld [vmem:[#allocation2 + $0x1e] sm:$0x1]  ;;  %v8694_v56 = vld [vmem:[#allocation3 + $0xd0] sm:$0xff]   ;;  %v8696_v58 = vld [vmem:[#allocation3 + $0xe0] sm:$0xff]   ;;  %p9141_p8 = pnand %p9140_p12, %p10187_p7  ;;  %s9145_s17 = scalar_lea.vmem %s9144_s22, 32 }
  0x77   : > { %v8695_v57 = vld [vmem:[#allocation3 + $0xd8] sm:$0xff]   ;;  %v8697_v59 = vld [vmem:[#allocation3 + $0xe8] sm:$0xff]   ;;  %v8698_v60 = vld [vmem:[#allocation3 + $0xf0] sm:$0xff]   ;;  %s10105_s23 = scalar_lea.hbm %s10186_s11, %s6876_s19  ;;  %p9146_p13 = scmp.lt.s32.totalorder %s10107_s15, %s9144_s22 }
  0x78   : > { %7379 = vmatpush3.bf16.msra.mxu0 %v8671_v4  ;;  %v8699_v61 = vld [vmem:[#allocation3 + $0xf8] sm:$0xff]   ;;  %v8700_v1 = vld [vmem:[#allocation3 + $0x100] sm:$0xff]   ;;  %v8701_v11 = vld [vmem:[#allocation3 + $0x108] sm:$0xff]   ;;  %p9142_p11 = pneg %p9141_p8  ;;  %p9147_p1 = scmp.lt.s32.totalorder %s9145_s17, %s9139_s13 }
  0x79   : > { %7380 = vmatprep.subr.bf16.mxu0 %v8672_v13  ;;  %v813_v63 = vld [vmem:[#allocation2 + $0x1b] sm:$0x1]  ;;  %v934_v8 = vld [vmem:[#allocation2 + $0x1c] sm:$0x1]  ;;  %v9455_v9 = vld [vmem:[#allocation2 + $0x1d] sm:$0x1] }
  0x7a   : > { %v8715_v32 = vld [vmem:[#allocation3 + $0x178] sm:$0xff]   ;;  %p9148_p6 = por %p9147_p1, %p9146_p13 }
  0x7c   : > { %7381 = vmatpush3.bf16.msra.mxu0 %v8672_v13  ;;  %v475_v16 = vld [vmem:[#allocation2 + $0x1] sm:$0xff]  ;;  %v476_v17 = vld [vmem:[#allocation2 + $0x9] sm:$0xff]  ;;  %v477_v20 = vld [vmem:[#allocation2 + $0x11] sm:$0xff]  ;;  %p9149_p9 = pnand %p9148_p6, %p9142_p11 }
  0x7d   : > { %7382 = vmatprep.subr.bf16.mxu0 %v8673_v14  ;;  %v479_v18 = vpack.c.bf16 %v476_v17, %v475_v16  ;;  %v480_v23 = vpack.c.bf16 %v478_v21, %v477_v20  ;;  %v689_v34 = vld [vmem:[#allocation2 + $0x2] sm:$0xff]  ;;  %v690_v35 = vld [vmem:[#allocation2 + $0xa] sm:$0xff]  ;;  %v691_v45 = vld [vmem:[#allocation2 + $0x12] sm:$0xff] }
  0x7e   : > { %v693_v37 = vpack.c.bf16 %v690_v35, %v689_v34  ;;  %v810_v48 = vld [vmem:[#allocation2 + $0x3] sm:$0xff]  ;;  %v811_v49 = vld [vmem:[#allocation2 + $0xb] sm:$0xff]  ;;  %v694_v50 = vpack.c.bf16 %v692_v46, %v691_v45  ;;  %v9445_v53 = vld [vmem:[#allocation2 + $0x16] sm:$0xff] }
  0x7f   : > { %7388 = vmatprep.mubr.bf16.mxu0 %v479_v18  ;;  %v814_v52 = vpack.c.bf16 %v811_v49, %v810_v48  ;;  %v1178_v55 = vpack.c.bf16 %v9447_v54, %v9445_v53  ;;  %v812_v62 = vld [vmem:[#allocation2 + $0x13] sm:$0xff]  ;;  %v931_v2 = vld [vmem:[#allocation2 + $0x4] sm:$0xff]  ;;  %v9464_v16 = vld [vmem:[#allocation2 + $0x1f] sm:$0x1] }
  0x80   : > { %7383 = vmatpush3.bf16.msra.mxu0 %v8673_v14  ;;  %v932_v3 = vld [vmem:[#allocation2 + $0xc] sm:$0xff]  ;;  %v933_v4 = vld [vmem:[#allocation2 + $0x14] sm:$0xff]  ;;  %v815_v10 = vpack.c.bf16 %v813_v63, %v812_v62  ;;  %v8728_v49 = vld [vmem:[#allocation3 + $0x1e0] sm:$0xff]  }
  0x81   : > { %7384 = vmatprep.subr.bf16.mxu0 %v8674_v15  ;;  %v1053_v5 = vld [vmem:[#allocation2 + $0xd] sm:$0xff]  ;;  %v9451_v6 = vld [vmem:[#allocation2 + $0x15] sm:$0xff]  ;;  %v935_v14 = vpack.c.bf16 %v932_v3, %v931_v2  ;;  %v9482_v54 = vld [vmem:[#allocation2] sm:$0xff] }
  0x82   : > { %v9453_v7 = vld [vmem:[#allocation2 + $0xe] sm:$0xff]  ;;  %v8703_v18 = vld [vmem:[#allocation3 + $0x118] sm:$0xff]   ;;  %v1173_v34 = vld [vmem:[#allocation2 + $0x6] sm:$0xff]  ;;  %v1057_v35 = vpack.c.bf16 %v9455_v9, %v9451_v6  ;;  %7548 = vmatprep.mubr.msk.bf16.mxu1 %vm9219_vm0, %v9482_v54 }
  0x83   : > { %v9457_v12 = vld [vmem:[#allocation2 + $0x7] sm:$0xff]  ;;  %v9459_v13 = vld [vmem:[#allocation2 + $0xf] sm:$0xff]  ;;  %v8727_v48 = vld [vmem:[#allocation3 + $0x1d8] sm:$0xff]  }
  0x84   : > { %7385 = vmatpush3.bf16.msra.mxu0 %v8674_v15  ;;  %1514 = vst [vmem:[#allocation2 + $0xe] sm:$0xff] %v9218_v0  ;;  %v9462_v15 = vld [vmem:[#allocation2 + $0x17] sm:$0xff]  ;;  %v8705_v20 = vld [vmem:[#allocation3 + $0x128] sm:$0xff]   ;;  %v1298_v46 = vpack.c.bf16 %v9459_v13, %v9457_v12  ;;  %v6544_v63 = vld [vmem:[%s10151_s4] ss:$0 sm:$0xff] }
  0x85   : > { %7386 = vmatprep.subr.bf16.mxu0 %v8675_v19  ;;  %1515 = vst [vmem:[#allocation2 + $0x16] sm:$0xff] %v9218_v0  ;;  %1516 = vst [vmem:[#allocation2 + $0x1e] sm:$0x3] %v9218_v0  ;;  %v8702_v17 = vld [vmem:[#allocation3 + $0x110] sm:$0xff]   ;;  %v8725_v45 = vld [vmem:[#allocation3 + $0x1c8] sm:$0xff]   ;;  %v1299_v53 = vpack.c.bf16 %v9464_v16, %v9462_v15 }
  0x86   : > { %2450 = vst [vmem:[#allocation2 + $0x1b] sm:$0x1f] %v9218_v0  ;;  %v8706_v21 = vld [vmem:[#allocation3 + $0x130] sm:$0xff]   ;;  %v8739_v62 = vld [vmem:[#allocation6 + $0x78] sm:$0xff]   ;;  %v6545_v2 = vld [vmem:[%s10152_s5] ss:$0 sm:$0xff] }
  0x87   : > { %3384 = vst [vmem:[#allocation2 + $0x1b] sm:$0x1f] %v9218_v0 }
  0x88   : > { %7387 = vmatpush3.bf16.msra.mxu0 %v8675_v19  ;;  %4318 = vst [vmem:[#allocation2 + $0x1b] sm:$0x1f] %v9218_v0  ;;  %v8704_v19 = vld [vmem:[#allocation3 + $0x120] sm:$0xff]  }
  0x89   : > { %7392 = vmatprep.subr.bf16.mxu0 %v8676_v22  ;;  %5252 = vst [vmem:[#allocation2 + $0x1b] sm:$0x1f] %v9218_v0  ;;  %v936_v0 = vpack.c.bf16 %v934_v8, %v933_v4 }
  0x8b   : > { %7389 = vmatmul.mubr.bf16.vlgmr.msra.gmra.mrb[0].mxu0 %v480_v23  ;;  %v8708_v23 = vld [vmem:[#allocation3 + $0x140] sm:$0xff]  }
  0x8c   : > { %7393 = vmatpush3.bf16.msra.mxu0 %v8676_v22  ;;  %7408 = vmatprep.mubr.bf16.mxu0 %v457_v24  ;;  %v8707_v22 = vld [vmem:[#allocation3 + $0x138] sm:$0xff]   ;;  %v1052_v24 = vld [vmem:[#allocation2 + $0x5] sm:$0xff] }
  0x8d   : > { %7394 = vmatprep.subr.bf16.mxu0 %v8677_v25 }
  0x90   : > { %7395 = vmatpush3.bf16.msra.mxu0 %v8677_v25  ;;  %v8709_v25 = vld [vmem:[#allocation3 + $0x148] sm:$0xff]  }
  0x91   : > { %7396 = vmatprep.subr.bf16.mxu0 %v8678_v26 }
  0x94   : > { %7397 = vmatpush3.bf16.msra.mxu0 %v8678_v26  ;;  %v1056_v26 = vpack.c.bf16 %v1053_v5, %v1052_v24 }
  0x95   : > { %7398 = vmatprep.subr.bf16.mxu0 %v8679_v27 }
  0x98   : > { %7399 = vmatpush3.bf16.msra.mxu0 %v8679_v27  ;;  %v8710_v27 = vld [vmem:[#allocation3 + $0x150] sm:$0xff]  }
  0x99   : > { %7400 = vmatprep.subr.bf16.mxu0 %v8680_v28 }
  0x9c   : > { %7401 = vmatpush3.bf16.msra.mxu0 %v8680_v28  ;;  %v8711_v28 = vld [vmem:[#allocation3 + $0x158] sm:$0xff]  }
  0x9d   : > { %7402 = vmatprep.subr.bf16.mxu0 %v8681_v29 }
  0xa0   : > { %7403 = vmatpush3.bf16.msra.mxu0 %v8681_v29  ;;  %v8712_v29 = vld [vmem:[#allocation3 + $0x160] sm:$0xff]  }
  0xa1   : > { %7404 = vmatprep.subr.bf16.mxu0 %v8682_v30 }
  0xa4   : > { %7405 = vmatpush3.bf16.msra.mxu0 %v8682_v30  ;;  %v8713_v30 = vld [vmem:[#allocation3 + $0x168] sm:$0xff]  }
  0xa5   : > { %7406 = vmatprep.subr.bf16.mxu0 %v8683_v31 }
  0xa8   : > { %7407 = vmatpush3.bf16.msra.mxu0 %v8683_v31  ;;  %v8714_v31 = vld [vmem:[#allocation3 + $0x170] sm:$0xff]  }
  0xa9   : > { %7412 = vmatprep.subr.bf16.mxu0 %v8684_v33 }
  0xab   : > { %7409 = vmatmul.mubr.bf16.vlgmr.msra.gmra.mrb[0].mxu0 %v458_v36  ;;  %v8717_v36 = vld [vmem:[#allocation3 + $0x188] sm:$0xff]  }
  0xac   : > { %7413 = vmatpush3.bf16.msra.mxu0 %v8684_v33  ;;  %7428 = vmatprep.mubr.bf16.mxu0 %v693_v37  ;;  %v8716_v33 = vld [vmem:[#allocation3 + $0x180] sm:$0xff]   ;;  %v1177_v37 = vpack.c.bf16 %v9453_v7, %v1173_v34 }
  0xad   : > { %7414 = vmatprep.subr.bf16.mxu0 %v8685_v38 }
  0xb0   : > { %7415 = vmatpush3.bf16.msra.mxu0 %v8685_v38  ;;  %v8718_v38 = vld [vmem:[#allocation3 + $0x190] sm:$0xff]  }
  0xb1   : > { %7416 = vmatprep.subr.bf16.mxu0 %v8686_v39 }
  0xb4   : > { %7417 = vmatpush3.bf16.msra.mxu0 %v8686_v39  ;;  %v8719_v39 = vld [vmem:[#allocation3 + $0x198] sm:$0xff]  }
  0xb5   : > { %7418 = vmatprep.subr.bf16.mxu0 %v8687_v40 }
  0xb8   : > { %7419 = vmatpush3.bf16.msra.mxu0 %v8687_v40  ;;  %v8720_v40 = vld [vmem:[#allocation3 + $0x1a0] sm:$0xff]  }
  0xb9   : > { %7420 = vmatprep.subr.bf16.mxu0 %v8688_v41 }
  0xbc   : > { %7421 = vmatpush3.bf16.msra.mxu0 %v8688_v41  ;;  %v8721_v41 = vld [vmem:[#allocation3 + $0x1a8] sm:$0xff]  }
  0xbd   : > { %7422 = vmatprep.subr.bf16.mxu0 %v8689_v42 }
  0xc0   : > { %7423 = vmatpush3.bf16.msra.mxu0 %v8689_v42  ;;  %v8722_v42 = vld [vmem:[#allocation3 + $0x1b0] sm:$0xff]  }
  0xc1   : > { %7424 = vmatprep.subr.bf16.mxu0 %v8690_v43 }
  0xc4   : > { %7425 = vmatpush3.bf16.msra.mxu0 %v8690_v43  ;;  %v8723_v43 = vld [vmem:[#allocation3 + $0x1b8] sm:$0xff]  }
  0xc5   : > { %7426 = vmatprep.subr.bf16.mxu0 %v8691_v44 }
  0xc8   : > { %7427 = vmatpush3.bf16.msra.mxu0 %v8691_v44  ;;  %v8724_v44 = vld [vmem:[#allocation3 + $0x1c0] sm:$0xff]  }
  0xc9   : > { %7432 = vmatprep.subr.bf16.mxu0 %v8692_v47 }
  0xcb   : > { %7429 = vmatmul.mubr.bf16.vlgmr.msra.gmra.mrb[0].mxu0 %v694_v50  ;;  %v8729_v50 = vld [vmem:[#allocation3 + $0x1e8] sm:$0xff]  }
  0xcc   : > { %7433 = vmatpush3.bf16.msra.mxu0 %v8692_v47  ;;  %7448 = vmatprep.mubr.bf16.mxu0 %v814_v52  ;;  %v8726_v47 = vld [vmem:[#allocation3 + $0x1d0] sm:$0xff]   ;;  %v8731_v52 = vld [vmem:[#allocation3 + $0x1f8] sm:$0xff]  }
  0xcd   : > { %7434 = vmatprep.subr.bf16.mxu0 %v8693_v51 }
  0xd0   : > { %7435 = vmatpush3.bf16.msra.mxu0 %v8693_v51  ;;  %v8730_v51 = vld [vmem:[#allocation3 + $0x1f0] sm:$0xff]  }
  0xd1   : > { %7436 = vmatprep.subr.bf16.mxu0 %v8694_v56 }
  0xd4   : > { %7437 = vmatpush3.bf16.msra.mxu0 %v8694_v56  ;;  %v8733_v56 = vld [vmem:[#allocation6 + $0x48] sm:$0xff]  }
  0xd5   : > { %7438 = vmatprep.subr.bf16.mxu0 %v8695_v57 }
  0xd8   : > { %7439 = vmatpush3.bf16.msra.mxu0 %v8695_v57  ;;  %v8734_v57 = vld [vmem:[#allocation6 + $0x50] sm:$0xff]  }
  0xd9   : > { %7440 = vmatprep.subr.bf16.mxu0 %v8696_v58 }
  0xdc   : > { %7441 = vmatpush3.bf16.msra.mxu0 %v8696_v58  ;;  %v8735_v58 = vld [vmem:[#allocation6 + $0x58] sm:$0xff]  }
  0xdd   : > { %7442 = vmatprep.subr.bf16.mxu0 %v8697_v59 }
  0xe0   : > { %7443 = vmatpush3.bf16.msra.mxu0 %v8697_v59  ;;  %v8736_v59 = vld [vmem:[#allocation6 + $0x60] sm:$0xff]  }
  0xe1   : > { %7444 = vmatprep.subr.bf16.mxu0 %v8698_v60 }
  0xe4   : > { %7445 = vmatpush3.bf16.msra.mxu0 %v8698_v60  ;;  %v8737_v60 = vld [vmem:[#allocation6 + $0x68] sm:$0xff]  }
  0xe5   : > { %7446 = vmatprep.subr.bf16.mxu0 %v8699_v61 }
  0xe8   : > { %7447 = vmatpush3.bf16.msra.mxu0 %v8699_v61  ;;  %v8738_v61 = vld [vmem:[#allocation6 + $0x70] sm:$0xff]  }
  0xe9   : > { %7452 = vmatprep.subr.bf16.mxu0 %v8700_v1 }
  0xeb   : > { %7449 = vmatmul.mubr.bf16.vlgmr.msra.gmra.mrb[0].mxu0 %v815_v10 }
  0xec   : > { %7453 = vmatpush3.bf16.msra.mxu0 %v8700_v1  ;;  %7468 = vmatprep.mubr.bf16.mxu0 %v935_v14 }
  0xed   : > { %7454 = vmatprep.subr.bf16.mxu0 %v8701_v11 }
  0xf0   : > { %7455 = vmatpush3.bf16.msra.mxu0 %v8701_v11 }
  0xf1   : > { %7456 = vmatprep.subr.bf16.mxu0 %v8702_v17 }
  0xf4   : > { %7457 = vmatpush3.bf16.msra.mxu0 %v8702_v17 }
  0xf5   : > { %7458 = vmatprep.subr.bf16.mxu0 %v8703_v18 }
  0xf8   : > { %7459 = vmatpush3.bf16.msra.mxu0 %v8703_v18 }
  0xf9   : > { %7460 = vmatprep.subr.bf16.mxu0 %v8704_v19 }
  0xfc   : > { %7461 = vmatpush3.bf16.msra.mxu0 %v8704_v19 }
  0xfd   : > { %7462 = vmatprep.subr.bf16.mxu0 %v8705_v20 }
 0x100   : > { %7463 = vmatpush3.bf16.msra.mxu0 %v8705_v20 }
 0x101   : > { %7464 = vmatprep.subr.bf16.mxu0 %v8706_v21 }
 0x104   : > { %7465 = vmatpush3.bf16.msra.mxu0 %v8706_v21 }
 0x105   : > { %7466 = vmatprep.subr.bf16.mxu0 %v8707_v22 }
 0x108   : > { %7467 = vmatpush3.bf16.msra.mxu0 %v8707_v22 }
 0x109   : > { %7472 = vmatprep.subr.bf16.mxu0 %v8708_v23 }
 0x10b   : > { %7469 = vmatmul.mubr.bf16.vlgmr.msra.gmra.mrb[0].mxu0 %v936_v0 }
 0x10c   : > { %7473 = vmatpush3.bf16.msra.mxu0 %v8708_v23  ;;  %7488 = vmatprep.mubr.bf16.mxu0 %v1056_v26 }
 0x10d   : > { %7474 = vmatprep.subr.bf16.mxu0 %v8709_v25 }
 0x110   : > { %7475 = vmatpush3.bf16.msra.mxu0 %v8709_v25 }
 0x111   : > { %7476 = vmatprep.subr.bf16.mxu0 %v8710_v27 }
 0x114   : > { %7477 = vmatpush3.bf16.msra.mxu0 %v8710_v27 }
 0x115   : > { %7478 = vmatprep.subr.bf16.mxu0 %v8711_v28 }
 0x118   : > { %7479 = vmatpush3.bf16.msra.mxu0 %v8711_v28 }
 0x119   : > { %7480 = vmatprep.subr.bf16.mxu0 %v8712_v29 }
 0x11c   : > { %7481 = vmatpush3.bf16.msra.mxu0 %v8712_v29 }
 0x11d   : > { %7482 = vmatprep.subr.bf16.mxu0 %v8713_v30 }
 0x120   : > { %7483 = vmatpush3.bf16.msra.mxu0 %v8713_v30 }
 0x121   : > { %7484 = vmatprep.subr.bf16.mxu0 %v8714_v31 }
 0x124   : > { %7485 = vmatpush3.bf16.msra.mxu0 %v8714_v31 }
 0x125   : > { %7486 = vmatprep.subr.bf16.mxu0 %v8715_v32 }
 0x128   : > { %7487 = vmatpush3.bf16.msra.mxu0 %v8715_v32 }
 0x129   : > { %7492 = vmatprep.subr.bf16.mxu0 %v8716_v33 }
 0x12b   : > { %7489 = vmatmul.mubr.bf16.vlgmr.msra.gmra.mrb[0].mxu0 %v1057_v35 }
 0x12c   : > { %7493 = vmatpush3.bf16.msra.mxu0 %v8716_v33  ;;  %7508 = vmatprep.mubr.bf16.mxu0 %v1177_v37 }
 0x12d   : > { %7494 = vmatprep.subr.bf16.mxu0 %v8717_v36 }
 0x130   : > { %7495 = vmatpush3.bf16.msra.mxu0 %v8717_v36 }
 0x131   : > { %7496 = vmatprep.subr.bf16.mxu0 %v8718_v38 }
 0x134   : > { %7497 = vmatpush3.bf16.msra.mxu0 %v8718_v38 }
 0x135   : > { %7498 = vmatprep.subr.bf16.mxu0 %v8719_v39 }
 0x138   : > { %7499 = vmatpush3.bf16.msra.mxu0 %v8719_v39 }
 0x139   : > { %7500 = vmatprep.subr.bf16.mxu0 %v8720_v40 }
 0x13c   : > { %7501 = vmatpush3.bf16.msra.mxu0 %v8720_v40 }
 0x13d   : > { %7502 = vmatprep.subr.bf16.mxu0 %v8721_v41 }
 0x140   : > { %7503 = vmatpush3.bf16.msra.mxu0 %v8721_v41 }
 0x141   : > { %7504 = vmatprep.subr.bf16.mxu0 %v8722_v42 }
 0x144   : > { %7505 = vmatpush3.bf16.msra.mxu0 %v8722_v42 }
 0x145   : > { %7506 = vmatprep.subr.bf16.mxu0 %v8723_v43 }
 0x148   : > { %7507 = vmatpush3.bf16.msra.mxu0 %v8723_v43 }
 0x149   : > { %7512 = vmatprep.subr.bf16.mxu0 %v8724_v44 }
 0x14b   : > { %7509 = vmatmul.mubr.bf16.vlgmr.msra.gmra.mrb[0].mxu0 %v1178_v55  ;;  %v8732_v55 = vld [vmem:[#allocation6 + $0x40] sm:$0xff]  }
 0x14c   : > { %7513 = vmatpush3.bf16.msra.mxu0 %v8724_v44  ;;  %7528 = vmatprep.mubr.bf16.mxu0 %v1298_v46 }
 0x14d   : > { %7514 = vmatprep.subr.bf16.mxu0 %v8725_v45  ;;  %7533 = vmatpush3.bf16.msra.mxu1 %v8732_v55 }
 0x14e   : > { %7534 = vmatprep.subr.bf16.mxu1 %v9482_v54 }
 0x150   : > { %7515 = vmatpush3.bf16.msra.mxu0 %v8725_v45 }
 0x151   : > { %7516 = vmatprep.subr.bf16.mxu0 %v8726_v47  ;;  %7535 = vmatpush3.bf16.msra.mxu1 %v8733_v56 }
 0x152   : > { %7536 = vmatprep.subr.bf16.mxu1 %v9482_v54 }
 0x154   : > { %7517 = vmatpush3.bf16.msra.mxu0 %v8726_v47 }
 0x155   : > { %7518 = vmatprep.subr.bf16.mxu0 %v8727_v48  ;;  %7537 = vmatpush3.bf16.msra.mxu1 %v8734_v57 }
 0x156   : > { %7538 = vmatprep.subr.bf16.mxu1 %v9482_v54 }
 0x158   : > { %7519 = vmatpush3.bf16.msra.mxu0 %v8727_v48 }
 0x159   : > { %7520 = vmatprep.subr.bf16.mxu0 %v8728_v49  ;;  %7539 = vmatpush3.bf16.msra.mxu1 %v8735_v58 }
 0x15a   : > { %7540 = vmatprep.subr.bf16.mxu1 %v9482_v54 }
 0x15c   : > { %7521 = vmatpush3.bf16.msra.mxu0 %v8728_v49 }
 0x15d   : > { %7522 = vmatprep.subr.bf16.mxu0 %v8729_v50  ;;  %7541 = vmatpush3.bf16.msra.mxu1 %v8736_v59 }
 0x15e   : > { %7542 = vmatprep.subr.bf16.mxu1 %v9482_v54 }
 0x160   : > { %7523 = vmatpush3.bf16.msra.mxu0 %v8729_v50 }
 0x161   : > { %7524 = vmatprep.subr.bf16.mxu0 %v8730_v51  ;;  %7543 = vmatpush3.bf16.msra.mxu1 %v8737_v60 }
 0x162   : > { %7544 = vmatprep.subr.bf16.mxu1 %v9482_v54 }
 0x164   : > { %7525 = vmatpush3.bf16.msra.mxu0 %v8730_v51 }
 0x165   : > { %7526 = vmatprep.subr.bf16.mxu0 %v8731_v52  ;;  %7545 = vmatpush3.bf16.msra.mxu1 %v8738_v61 }
 0x166   : > { %7546 = vmatprep.subr.bf16.mxu1 %v9482_v54 }
 0x168   : > { %7527 = vmatpush3.bf16.msra.mxu0 %v8731_v52 }
 0x169   : > { %7692 = vmatprep.subr.bf16.mxu0 %v9482_v54  ;;  %7547 = vmatpush3.bf16.msra.mxu1 %v8739_v62 }
 0x16a   : > { %7552 = vmatprep.subr.bf16.mxu1 %v9482_v54 }
 0x16b   : > { %7529 = vmatmul.mubr.bf16.vlgmr.msra.gmra.mrb[0].mxu0 %v1299_v53 }
 0x16c   : > { %7708 = vmatprep.mubr.msk.bf16.mxu0 %vm9219_vm0, %v9482_v54 }
 0x23e   : > { %v7530_v1 = vpop.f32.mrb[0].mxu0 }
 0x23f   : > { %v1424_v3 = vmul.f32 %v7530_v1, %v6544_v63  ;;  %v1398_v4 = vpop.f32.mrb[1].mxu0 }
 0x240   : > { %v1422_v5 = vmul.f32 %v6544_v63, %v1398_v4  ;;  %v7531_v6 = vpop.f32.mrb[2].mxu0 }
 0x241   : > { %v1434_v7 = vadd.f32 %v6545_v2, %v1424_v3  ;;  %v1401_v8 = vpop.f32.mrb[3].mxu0 }
 0x242   : > { %v1432_v9 = vadd.f32 %v6545_v2, %v1422_v5  ;;  %v1423_v10 = vmul.f32 %v6544_v63, %v1401_v8 }
 0x243   : > { %vm1437_vm1 = vcmp.gt.f32.partialorder %v1434_v7, 0.0  ;;  %v1440_v11 = vmul.f32 0.01, %v1434_v7 }
 0x244   : > { %vm1435_vm3 = vcmp.gt.f32.partialorder %v1432_v9, 0.0  ;;  %v1438_v12 = vmul.f32 0.01, %v1432_v9  ;;  %v1433_v13 = vadd.f32 %v6545_v2, %v1423_v10  ;;  %v9513_v10 = vld [vmem:[#allocation2 + $0xf] sm:$0x7f] }
 0x245   : > { %v1443_v14 = vsel %vm1437_vm1, %v1434_v7, %v1440_v11  ;;  %v8740_v7 = vld [vmem:[#allocation6] sm:$0xff]   ;;  %v8741_v11 = vld [vmem:[#allocation6 + $0x8] sm:$0xff]  }
 0x246   : > { %v1449_v15 = vcombine.high %v1443_v14, %v1443_v14  ;;  %v1482_v16 = vsel %vm1453_vm2, %v1443_v14, -inf  ;;  %v1441_v17 = vsel %vm1435_vm3, %v1432_v9, %v1438_v12  ;;  %vm1436_vm4 = vcmp.gt.f32.partialorder %v1433_v13, 0.0  ;;  %v9511_v9 = vld [vmem:[#allocation2 + $0xe] sm:$0x7f] }
 0x247   : > { %v1483_v18 = vrot.slane %v1482_v16, 4  ;;  %v1447_v19 = vcombine.high %v1441_v17, %v1441_v17  ;;  %v1454_v20 = vsel %vm1453_vm2, %v1441_v17, -inf  ;;  %v1439_v21 = vmul.f32 0.01, %v1433_v13 }
 0x248   : > { %v1489_v22 = vsel %vm1453_vm2, %v1449_v15, -inf  ;;  %v1455_v23 = vrot.slane %v1454_v20, 4 }
 0x249   : > { %v1484_v24 = vmax.f32 %v1482_v16, %v1483_v18  ;;  %v1490_v0 = vrot.slane %v1489_v22, 4  ;;  %v1461_v25 = vsel %vm1453_vm2, %v1447_v19, -inf  ;;  %v1442_v26 = vsel %vm1436_vm4, %v1433_v13, %v1439_v21  ;;  %v8742_v21 = vld [vmem:[#allocation6 + $0x10] sm:$0xff]  }
 0x24a   : > { %v1456_v27 = vmax.f32 %v1454_v20, %v1455_v23  ;;  %v1462_v28 = vrot.slane %v1461_v25, 4  ;;  %v1448_v29 = vcombine.high %v1442_v26, %v1442_v26  ;;  %v1468_v30 = vsel %vm1453_vm2, %v1442_v26, -inf  ;;  %v8744_v23 = vld [vmem:[#allocation6 + $0x20] sm:$0xff]  }
 0x24b   : > { %v1491_v31 = vmax.f32 %v1489_v22, %v1490_v0  ;;  %v1469_v32 = vrot.slane %v1468_v30, 4  ;;  %v1485_v33 = vrot.slane %v1484_v24, 2  ;;  %v8743_v22 = vld [vmem:[#allocation6 + $0x18] sm:$0xff]   ;;  %v8746_v0 = vld [vmem:[#allocation6 + $0x30] sm:$0xff]   ;;  %v8748_v26 = vld [vmem:[#allocation6 + $0x80] sm:$0xff]  }
 0x24c   : > { %v1457_v34 = vrot.slane %v1456_v27, 2  ;;  %v1463_v35 = vmax.f32 %v1461_v25, %v1462_v28  ;;  %v1475_v36 = vsel %vm1453_vm2, %v1448_v29, -inf  ;;  %v8747_v25 = vld [vmem:[#allocation6 + $0x38] sm:$0xff]   ;;  %v8749_v28 = vld [vmem:[#allocation6 + $0x88] sm:$0xff]   ;;  %v8750_v29 = vld [vmem:[#allocation6 + $0x90] sm:$0xff]  }
 0x24d   : > { %v1492_v37 = vrot.slane %v1491_v31, 2  ;;  %v1470_v38 = vmax.f32 %v1468_v30, %v1469_v32  ;;  %v1476_v39 = vrot.slane %v1475_v36, 4  ;;  %v1486_v44 = vmax.f32 %v1484_v24, %v1485_v33  ;;  %v8745_v24 = vld [vmem:[#allocation6 + $0x28] sm:$0xff]   ;;  %v8751_v30 = vld [vmem:[#allocation6 + $0x98] sm:$0xff]   ;;  %v8754_v33 = vld [vmem:[#allocation6 + $0xb0] sm:$0xff]  }
 0x24e   : > { %v1458_v40 = vmax.f32 %v1456_v27, %v1457_v34  ;;  %v1464_v41 = vrot.slane %v1463_v35, 2  ;;  %v8753_v32 = vld [vmem:[#allocation6 + $0xa8] sm:$0xff]   ;;  %v8755_v34 = vld [vmem:[#allocation6 + $0xb8] sm:$0xff]  }
 0x24f   : > { %v1471_v42 = vrot.slane %v1470_v38, 2  ;;  %v1477_v43 = vmax.f32 %v1475_v36, %v1476_v39  ;;  %v1493_v47 = vmax.f32 %v1491_v31, %v1492_v37  ;;  %v1487_v53 = vrot.slane %v1486_v44, 1  ;;  %v8752_v31 = vld [vmem:[#allocation6 + $0xa0] sm:$0xff]   ;;  %v8758_v39 = vld [vmem:[#allocation6 + $0xd0] sm:$0xff]  }
 0x250   : > { %v1459_v45 = vrot.slane %v1458_v40, 1  ;;  %v1465_v46 = vmax.f32 %v1463_v35, %v1464_v41  ;;  %v8756_v36 = vld [vmem:[#allocation6 + $0xc0] sm:$0xff]  }
 0x251   : > { %v1472_v48 = vmax.f32 %v1470_v38, %v1471_v42  ;;  %v1478_v49 = vrot.slane %v1477_v43, 2  ;;  %v1494_v57 = vrot.slane %v1493_v47, 1  ;;  %v1488_v63 = vmax.f32 %v1486_v44, %v1487_v53  ;;  %v8757_v38 = vld [vmem:[#allocation6 + $0xc8] sm:$0xff]   ;;  %v8760_v41 = vld [vmem:[#allocation6 + $0xe0] sm:$0xff]   ;;  %v8763_v44 = vld [vmem:[#allocation6 + $0xf8] sm:$0xff]  }
 0x252   : > { %v1466_v50 = vrot.slane %v1465_v46, 1  ;;  %v1460_v55 = vmax.f32 %v1458_v40, %v1459_v45  ;;  %v8759_v40 = vld [vmem:[#allocation6 + $0xd8] sm:$0xff]   ;;  %v8761_v42 = vld [vmem:[#allocation6 + $0xe8] sm:$0xff]   ;;  %v8770_v53 = vld [vmem:[#allocation6 + $0x130] sm:$0xff]  }
 0x253   : > { %v1473_v51 = vrot.slane %v1472_v48, 1  ;;  %v1479_v52 = vmax.f32 %v1477_v43, %v1478_v49  ;;  %v1495_v1 = vmax.f32 %v1493_v47, %v1494_v57  ;;  %v8762_v43 = vld [vmem:[#allocation6 + $0xf0] sm:$0xff]  }
 0x254   : > { %v1467_v56 = vmax.f32 %v1465_v46, %v1466_v50  ;;  %v8764_v46 = vld [vmem:[#allocation6 + $0x100] sm:$0xff]   ;;  %v8766_v49 = vld [vmem:[#allocation6 + $0x110] sm:$0xff]   ;;  %v8767_v50 = vld [vmem:[#allocation6 + $0x118] sm:$0xff]  }
 0x255   : > { %v1474_v58 = vmax.f32 %v1472_v48, %v1473_v51  ;;  %v1480_v59 = vrot.slane %v1479_v52, 1  ;;  %v8765_v48 = vld [vmem:[#allocation6 + $0x108] sm:$0xff]   ;;  %v8768_v51 = vld [vmem:[#allocation6 + $0x120] sm:$0xff]  }
 0x256   : > { %v1503_v60 = vsel %vm1502_vm5, %v1467_v56, %v1460_v55  ;;  %v8771_v55 = vld [vmem:[#allocation6 + $0x138] sm:$0xff]   ;;  %v8772_v56 = vld [vmem:[#allocation6 + $0x140] sm:$0xff]  }
 0x257   : > { %v1481_v61 = vmax.f32 %v1479_v52, %v1480_v59  ;;  %v1505_v62 = vsel %vm1504_vm6, %v1474_v58, %v1503_v60  ;;  %v8769_v52 = vld [vmem:[#allocation6 + $0x128] sm:$0xff]   ;;  %v8774_v59 = vld [vmem:[#allocation6 + $0x150] sm:$0xff]   ;;  %v8775_v60 = vld [vmem:[#allocation6 + $0x158] sm:$0xff]  }
 0x258   : > { %v8773_v58 = vld [vmem:[#allocation6 + $0x148] sm:$0xff]  }
 0x259   : > { %v1507_v2 = vsel %vm1506_vm7, %v1481_v61, %v1505_v62  ;;  %v8776_v61 = vld [vmem:[#allocation6 + $0x160] sm:$0xff]   ;;  %v8777_v62 = vld [vmem:[#allocation6 + $0x168] sm:$0xff]  }
 0x25a   : > { %v1509_v3 = vsel %vm1508_vm8, %v1488_v63, %v1507_v2  ;;  %v8778_v63 = vld [vmem:[#allocation6 + $0x170] sm:$0xff]   ;;  %v8780_v2 = vld [vmem:[#allocation6 + $0x180] sm:$0xff]  }
 0x25b   : > { %v1511_v4 = vsel %vm1510_vm9, %v1495_v1, %v1509_v3  ;;  %v8779_v1 = vld [vmem:[#allocation6 + $0x178] sm:$0xff]  }
 0x25c   : > { %1513 = vst [vmem:[#allocation2 + $0x8] sm:$0x3f] %v1511_v4  ;;  %v8781_v4 = vld [vmem:[#allocation6 + $0x188] sm:$0xff]  }
 0x263   : > { %v1536_v5 = vld [vmem:[#allocation2 + $0x1] sm:$0xff]  ;;  %v1537_v6 = vld [vmem:[#allocation2 + $0x9] sm:$0x7f] }
 0x264   : > { %v1538_v8 = vpack.c.bf16 %v1537_v6, %v1536_v5  ;;  %v1518_v12 = vld [vmem:[#allocation2 + $0x8] sm:$0x7f]  ;;  %v8782_v5 = vld [vmem:[#allocation6 + $0x190] sm:$0xff]   ;;  %v8783_v6 = vld [vmem:[#allocation6 + $0x198] sm:$0xff]  }
 0x265   : > { %v9515_v13 = vld [vmem:[#allocation2 + $0xa] sm:$0x7f]  ;;  %v1519_v27 = vpack.c.bf16 %v1518_v12, %v9482_v54  ;;  %v1733_v35 = vld [vmem:[#allocation2 + $0x2] sm:$0xff]  ;;  %v8787_v12 = vld [vmem:[#allocation6 + $0x1b8] sm:$0xff]  }
 0x266   : > { %v9517_v14 = vld [vmem:[#allocation2 + $0xb] sm:$0x7f]  ;;  %7549 = vmatmul.mubr.bf16.vlgmr.msra.gmra.mrb[0].mxu1 %v1538_v8  ;;  %v1735_v37 = vpack.c.bf16 %v9515_v13, %v1733_v35  ;;  %v1843_v45 = vld [vmem:[#allocation2 + $0x3] sm:$0xff] }
 0x267   : > { %v9519_v15 = vld [vmem:[#allocation2 + $0x4] sm:$0xff]  ;;  %v9521_v16 = vld [vmem:[#allocation2 + $0xc] sm:$0x7f]  ;;  %7553 = vmatpush3.bf16.msra.mxu1 %v8740_v7  ;;  %7568 = vmatprep.mubr.msk.bf16.mxu1 %vm9219_vm0, %v9482_v54  ;;  %v1845_v47 = vpack.c.bf16 %v9517_v14, %v1843_v45 }
 0x268   : > { %v9523_v17 = vld [vmem:[#allocation2 + $0xd] sm:$0x7f]  ;;  %v9527_v18 = vld [vmem:[#allocation2 + $0x5] sm:$0xff]  ;;  %7554 = vmatprep.subr.bf16.mxu1 %v9482_v54  ;;  %v1955_v57 = vpack.c.bf16 %v9521_v16, %v9519_v15 }
 0x269   : > { %v9529_v19 = vld [vmem:[#allocation2 + $0x6] sm:$0xff]  ;;  %5251 = vst [vmem:[#allocation2 + $0x13] sm:$0xff] %v9482_v54  ;;  %v2065_v3 = vpack.c.bf16 %v9523_v17, %v9527_v18  ;;  %v8790_v16 = vld [vmem:[#allocation6 + $0x1d0] sm:$0xff]   ;;  %v8791_v17 = vld [vmem:[#allocation6 + $0x1d8] sm:$0xff]  }
 0x26a   : > { %v9531_v20 = vld [vmem:[#allocation2 + $0x7] sm:$0xff]  ;;  %v2175_v14 = vpack.c.bf16 %v9511_v9, %v9529_v19  ;;  %v8794_v19 = vld [vmem:[#allocation6 + $0x1f0] sm:$0xff]  }
 0x26b   : > { %2448 = vst [vmem:[#allocation2 + $0xb] sm:$0xff] %v9482_v54  ;;  %7555 = vmatpush3.bf16.msra.mxu1 %v8741_v11  ;;  %v8784_v7 = vld [vmem:[#allocation6 + $0x1a0] sm:$0xff]   ;;  %v8785_v8 = vld [vmem:[#allocation6 + $0x1a8] sm:$0xff]   ;;  %v8786_v11 = vld [vmem:[#allocation6 + $0x1b0] sm:$0xff]  }
 0x26c   : > { %7556 = vmatprep.subr.bf16.mxu1 %v9482_v54  ;;  %v8788_v13 = vld [vmem:[#allocation6 + $0x1c0] sm:$0xff]   ;;  %v8789_v15 = vld [vmem:[#allocation6 + $0x1c8] sm:$0xff]  }
 0x26d   : > { %v8792_v9 = vld [vmem:[#allocation6 + $0x1e0] sm:$0xff]   ;;  %v8793_v18 = vld [vmem:[#allocation6 + $0x1e8] sm:$0xff]  }
 0x26f   : > { %7557 = vmatpush3.bf16.msra.mxu1 %v8742_v21  ;;  %v8795_v21 = vld [vmem:[#allocation6 + $0x1f8] sm:$0xff]  }
 0x270   : > { %7558 = vmatprep.subr.bf16.mxu1 %v9482_v54 }
 0x273   : > { %7559 = vmatpush3.bf16.msra.mxu1 %v8743_v22  ;;  %v2285_v22 = vpack.c.bf16 %v9513_v10, %v9531_v20  ;;  %v8800_v10 = vld [vmem:[#allocation6 + $0x60] sm:$0xff]   ;;  %v8801_v20 = vld [vmem:[#allocation6 + $0x68] sm:$0xff]  }
 0x274   : > { %7560 = vmatprep.subr.bf16.mxu1 %v9482_v54 }
 0x277   : > { %7561 = vmatpush3.bf16.msra.mxu1 %v8744_v23  ;;  %v8796_v23 = vld [vmem:[#allocation6 + $0x40] sm:$0xff]  }
 0x278   : > { %7562 = vmatprep.subr.bf16.mxu1 %v9482_v54  ;;  %7693 = vmatpush3.bf16.msra.mxu0 %v8796_v23  ;;  %v8807_v23 = vld [vmem:[#allocation6 + $0x18] sm:$0xff]  }
 0x279   : > { %7694 = vmatprep.subr.bf16.mxu0 %v9482_v54 }
 0x27b   : > { %7563 = vmatpush3.bf16.msra.mxu1 %v8745_v24  ;;  %v8797_v24 = vld [vmem:[#allocation6 + $0x48] sm:$0xff]  }
 0x27c   : > { %7564 = vmatprep.subr.bf16.mxu1 %v9482_v54  ;;  %7695 = vmatpush3.bf16.msra.mxu0 %v8797_v24  ;;  %v8808_v24 = vld [vmem:[#allocation6 + $0x20] sm:$0xff]  }
 0x27d   : > { %7696 = vmatprep.subr.bf16.mxu0 %v9482_v54 }
 0x27f   : > { %7565 = vmatpush3.bf16.msra.mxu1 %v8746_v0  ;;  %v8798_v0 = vld [vmem:[#allocation6 + $0x50] sm:$0xff]  }
 0x280   : > { %7566 = vmatprep.subr.bf16.mxu1 %v9482_v54  ;;  %7697 = vmatpush3.bf16.msra.mxu0 %v8798_v0  ;;  %v8809_v0 = vld [vmem:[#allocation6 + $0x28] sm:$0xff]  }
 0x281   : > { %7698 = vmatprep.subr.bf16.mxu0 %v9482_v54 }
 0x283   : > { %7567 = vmatpush3.bf16.msra.mxu1 %v8747_v25  ;;  %v8799_v25 = vld [vmem:[#allocation6 + $0x58] sm:$0xff]  }
 0x284   : > { %7572 = vmatprep.subr.bf16.mxu1 %v9482_v54  ;;  %7699 = vmatpush3.bf16.msra.mxu0 %v8799_v25  ;;  %v8810_v25 = vld [vmem:[#allocation6 + $0x30] sm:$0xff]  }
 0x285   : > { %7700 = vmatprep.subr.bf16.mxu0 %v9482_v54 }
 0x286   : > { %7569 = vmatmul.mubr.bf16.vlgmr.msra.gmra.mrb[0].mxu1 %v1519_v27  ;;  %v8803_v27 = vld [vmem:[#allocation6 + $0x78] sm:$0xff]  }
 0x287   : > { %7573 = vmatpush3.bf16.msra.mxu1 %v8748_v26  ;;  %7588 = vmatprep.mubr.msk.bf16.mxu1 %vm9219_vm0, %v9482_v54  ;;  %v8802_v26 = vld [vmem:[#allocation6 + $0x70] sm:$0xff]  }
 0x288   : > { %7574 = vmatprep.subr.bf16.mxu1 %v9482_v54  ;;  %7701 = vmatpush3.bf16.msra.mxu0 %v8800_v10  ;;  %v9669_v10 = vld [vmem:[#allocation2] sm:$0xff] }
 0x289   : > { %7702 = vmatprep.subr.bf16.mxu0 %v9482_v54 }
 0x28b   : > { %7575 = vmatpush3.bf16.msra.mxu1 %v8749_v28  ;;  %v9627_v28 = vld [vmem:[%s10154_s7] ss:$0 sm:$0xff] }
 0x28c   : > { %7576 = vmatprep.subr.bf16.mxu1 %v9482_v54  ;;  %7703 = vmatpush3.bf16.msra.mxu0 %v8801_v20  ;;  %v8811_v20 = vld [vmem:[#allocation6 + $0x38] sm:$0xff]  }
 0x28d   : > { %7704 = vmatprep.subr.bf16.mxu0 %v9482_v54 }
 0x28f   : > { %7577 = vmatpush3.bf16.msra.mxu1 %v8750_v29 }
 0x290   : > { %7578 = vmatprep.subr.bf16.mxu1 %v9482_v54  ;;  %7705 = vmatpush3.bf16.msra.mxu0 %v8802_v26  ;;  %v8812_v26 = vld [vmem:[#allocation6 + $0x80] sm:$0xff]  }
 0x291   : > { %7706 = vmatprep.subr.bf16.mxu0 %v9482_v54 }
 0x293   : > { %7579 = vmatpush3.bf16.msra.mxu1 %v8751_v30  ;;  %v9632_v30 = vld [vmem:[%s10155_s8] ss:$0 sm:$0xff] }
 0x294   : > { %7580 = vmatprep.subr.bf16.mxu1 %v9482_v54  ;;  %7707 = vmatpush3.bf16.msra.mxu0 %v8803_v27 }
 0x295   : > { %7712 = vmatprep.subr.bf16.mxu0 %v9482_v54 }
 0x297   : > { %7581 = vmatpush3.bf16.msra.mxu1 %v8752_v31 }
 0x298   : > { %7582 = vmatprep.subr.bf16.mxu1 %v9482_v54 }
 0x29b   : > { %7583 = vmatpush3.bf16.msra.mxu1 %v8753_v32 }
 0x29c   : > { %7584 = vmatprep.subr.bf16.mxu1 %v9482_v54 }
 0x29f   : > { %7585 = vmatpush3.bf16.msra.mxu1 %v8754_v33 }
 0x2a0   : > { %7586 = vmatprep.subr.bf16.mxu1 %v9482_v54 }
 0x2a3   : > { %7587 = vmatpush3.bf16.msra.mxu1 %v8755_v34 }
 0x2a4   : > { %7592 = vmatprep.subr.bf16.mxu1 %v9482_v54 }
 0x2a6   : > { %7589 = vmatmul.mubr.bf16.vlgmr.msra.gmra.mrb[0].mxu1 %v1735_v37 }
 0x2a7   : > { %7593 = vmatpush3.bf16.msra.mxu1 %v8756_v36  ;;  %7608 = vmatprep.mubr.msk.bf16.mxu1 %vm9219_vm0, %v9482_v54 }
 0x2a8   : > { %7594 = vmatprep.subr.bf16.mxu1 %v9482_v54 }
 0x2ab   : > { %7595 = vmatpush3.bf16.msra.mxu1 %v8757_v38 }
 0x2ac   : > { %7596 = vmatprep.subr.bf16.mxu1 %v9482_v54 }
 0x2af   : > { %7597 = vmatpush3.bf16.msra.mxu1 %v8758_v39 }
 0x2b0   : > { %7598 = vmatprep.subr.bf16.mxu1 %v9482_v54 }
 0x2b3   : > { %7599 = vmatpush3.bf16.msra.mxu1 %v8759_v40 }
 0x2b4   : > { %7600 = vmatprep.subr.bf16.mxu1 %v9482_v54 }
 0x2b7   : > { %7601 = vmatpush3.bf16.msra.mxu1 %v8760_v41 }
 0x2b8   : > { %7602 = vmatprep.subr.bf16.mxu1 %v9482_v54 }
 0x2bb   : > { %7603 = vmatpush3.bf16.msra.mxu1 %v8761_v42 }
 0x2bc   : > { %7604 = vmatprep.subr.bf16.mxu1 %v9482_v54 }
 0x2bf   : > { %7605 = vmatpush3.bf16.msra.mxu1 %v8762_v43 }
 0x2c0   : > { %7606 = vmatprep.subr.bf16.mxu1 %v9482_v54 }
 0x2c3   : > { %7607 = vmatpush3.bf16.msra.mxu1 %v8763_v44 }
 0x2c4   : > { %7612 = vmatprep.subr.bf16.mxu1 %v9482_v54 }
 0x2c6   : > { %7609 = vmatmul.mubr.bf16.vlgmr.msra.gmra.mrb[0].mxu1 %v1845_v47 }
 0x2c7   : > { %7613 = vmatpush3.bf16.msra.mxu1 %v8764_v46  ;;  %7628 = vmatprep.mubr.msk.bf16.mxu1 %vm9219_vm0, %v9482_v54 }
 0x2c8   : > { %7614 = vmatprep.subr.bf16.mxu1 %v9482_v54 }
 0x2cb   : > { %7615 = vmatpush3.bf16.msra.mxu1 %v8765_v48 }
 0x2cc   : > { %7616 = vmatprep.subr.bf16.mxu1 %v9482_v54 }
 0x2cf   : > { %7617 = vmatpush3.bf16.msra.mxu1 %v8766_v49 }
 0x2d0   : > { %7618 = vmatprep.subr.bf16.mxu1 %v9482_v54 }
 0x2d3   : > { %7619 = vmatpush3.bf16.msra.mxu1 %v8767_v50 }
 0x2d4   : > { %7620 = vmatprep.subr.bf16.mxu1 %v9482_v54 }
 0x2d7   : > { %7621 = vmatpush3.bf16.msra.mxu1 %v8768_v51 }
 0x2d8   : > { %7622 = vmatprep.subr.bf16.mxu1 %v9482_v54 }
 0x2db   : > { %7623 = vmatpush3.bf16.msra.mxu1 %v8769_v52 }
 0x2dc   : > { %7624 = vmatprep.subr.bf16.mxu1 %v9482_v54 }
 0x2df   : > { %7625 = vmatpush3.bf16.msra.mxu1 %v8770_v53 }
 0x2e0   : > { %7626 = vmatprep.subr.bf16.mxu1 %v9482_v54 }
 0x2e3   : > { %7627 = vmatpush3.bf16.msra.mxu1 %v8771_v55 }
 0x2e4   : > { %7632 = vmatprep.subr.bf16.mxu1 %v9482_v54 }
 0x2e6   : > { %7629 = vmatmul.mubr.bf16.vlgmr.msra.gmra.mrb[0].mxu1 %v1955_v57 }
 0x2e7   : > { %7633 = vmatpush3.bf16.msra.mxu1 %v8772_v56  ;;  %7648 = vmatprep.mubr.msk.bf16.mxu1 %vm9219_vm0, %v9482_v54 }
 0x2e8   : > { %7634 = vmatprep.subr.bf16.mxu1 %v9482_v54 }
 0x2eb   : > { %7635 = vmatpush3.bf16.msra.mxu1 %v8773_v58 }
 0x2ec   : > { %7636 = vmatprep.subr.bf16.mxu1 %v9482_v54 }
 0x2ef   : > { %7637 = vmatpush3.bf16.msra.mxu1 %v8774_v59 }
 0x2f0   : > { %7638 = vmatprep.subr.bf16.mxu1 %v9482_v54 }
 0x2f3   : > { %7639 = vmatpush3.bf16.msra.mxu1 %v8775_v60 }
 0x2f4   : > { %7640 = vmatprep.subr.bf16.mxu1 %v9482_v54 }
 0x2f7   : > { %7641 = vmatpush3.bf16.msra.mxu1 %v8776_v61 }
 0x2f8   : > { %7642 = vmatprep.subr.bf16.mxu1 %v9482_v54 }
 0x2fb   : > { %7643 = vmatpush3.bf16.msra.mxu1 %v8777_v62 }
 0x2fc   : > { %7644 = vmatprep.subr.bf16.mxu1 %v9482_v54 }
 0x2ff   : > { %7645 = vmatpush3.bf16.msra.mxu1 %v8778_v63 }
 0x300   : > { %7646 = vmatprep.subr.bf16.mxu1 %v9482_v54 }
 0x303   : > { %7647 = vmatpush3.bf16.msra.mxu1 %v8779_v1 }
 0x304   : > { %7652 = vmatprep.subr.bf16.mxu1 %v9482_v54 }
 0x306   : > { %7649 = vmatmul.mubr.bf16.vlgmr.msra.gmra.mrb[0].mxu1 %v2065_v3 }
 0x307   : > { %7653 = vmatpush3.bf16.msra.mxu1 %v8780_v2  ;;  %7668 = vmatprep.mubr.msk.bf16.mxu1 %vm9219_vm0, %v9482_v54 }
 0x308   : > { %7654 = vmatprep.subr.bf16.mxu1 %v9482_v54 }
 0x30b   : > { %7655 = vmatpush3.bf16.msra.mxu1 %v8781_v4 }
 0x30c   : > { %7656 = vmatprep.subr.bf16.mxu1 %v9482_v54 }
 0x30f   : > { %7657 = vmatpush3.bf16.msra.mxu1 %v8782_v5 }
 0x310   : > { %7658 = vmatprep.subr.bf16.mxu1 %v9482_v54 }
 0x313   : > { %7659 = vmatpush3.bf16.msra.mxu1 %v8783_v6  ;;  %v8804_v6 = vld [vmem:[#allocation6] sm:$0xff]  }
 0x314   : > { %7660 = vmatprep.subr.bf16.mxu1 %v9482_v54 }
 0x317   : > { %7661 = vmatpush3.bf16.msra.mxu1 %v8784_v7 }
 0x318   : > { %7662 = vmatprep.subr.bf16.mxu1 %v9482_v54 }
 0x31b   : > { %7663 = vmatpush3.bf16.msra.mxu1 %v8785_v8  ;;  %v9643_v8 = vld [vmem:[#allocation2 + $0xb] sm:$0xf] }
 0x31c   : > { %7664 = vmatprep.subr.bf16.mxu1 %v9482_v54 }
 0x31f   : > { %7665 = vmatpush3.bf16.msra.mxu1 %v8786_v11  ;;  %v9645_v11 = vld [vmem:[#allocation2 + $0xc] sm:$0xf] }
 0x320   : > { %7666 = vmatprep.subr.bf16.mxu1 %v9482_v54 }
 0x323   : > { %7667 = vmatpush3.bf16.msra.mxu1 %v8787_v12  ;;  %v9647_v12 = vld [vmem:[#allocation2 + $0xd] sm:$0xf] }
 0x324   : > { %7672 = vmatprep.subr.bf16.mxu1 %v9482_v54 }
 0x326   : > { %7669 = vmatmul.mubr.bf16.vlgmr.msra.gmra.mrb[0].mxu1 %v2175_v14  ;;  %v9651_v14 = vld [vmem:[#allocation2 + $0xf] sm:$0xf] }
 0x327   : > { %7673 = vmatpush3.bf16.msra.mxu1 %v8788_v13  ;;  %7688 = vmatprep.mubr.msk.bf16.mxu1 %vm9219_vm0, %v9482_v54  ;;  %v9649_v13 = vld [vmem:[#allocation2 + $0xe] sm:$0xf] }
 0x328   : > { %7674 = vmatprep.subr.bf16.mxu1 %v9482_v54 }
 0x32b   : > { %7675 = vmatpush3.bf16.msra.mxu1 %v8789_v15 }
 0x32c   : > { %7676 = vmatprep.subr.bf16.mxu1 %v9482_v54 }
 0x32f   : > { %7677 = vmatpush3.bf16.msra.mxu1 %v8790_v16 }
 0x330   : > { %7678 = vmatprep.subr.bf16.mxu1 %v9482_v54 }
 0x333   : > { %7679 = vmatpush3.bf16.msra.mxu1 %v8791_v17 }
 0x334   : > { %7680 = vmatprep.subr.bf16.mxu1 %v9482_v54 }
 0x337   : > { %7681 = vmatpush3.bf16.msra.mxu1 %v8792_v9 }
 0x338   : > { %7682 = vmatprep.subr.bf16.mxu1 %v9482_v54 }
 0x33b   : > { %7683 = vmatpush3.bf16.msra.mxu1 %v8793_v18 }
 0x33c   : > { %7684 = vmatprep.subr.bf16.mxu1 %v9482_v54 }
 0x33f   : > { %7685 = vmatpush3.bf16.msra.mxu1 %v8794_v19 }
 0x340   : > { %7686 = vmatprep.subr.bf16.mxu1 %v9482_v54 }
 0x343   : > { %7687 = vmatpush3.bf16.msra.mxu1 %v8795_v21  ;;  %v8805_v21 = vld [vmem:[#allocation6 + $0x8] sm:$0xff]  }
 0x344   : > { %7852 = vmatprep.subr.bf16.mxu1 %v9482_v54 }
 0x346   : > { %7689 = vmatmul.mubr.bf16.vlgmr.msra.gmra.mrb[0].mxu1 %v2285_v22  ;;  %v8806_v22 = vld [vmem:[#allocation6 + $0x10] sm:$0xff]  }
 0x347   : > { %7868 = vmatprep.mubr.msk.bf16.mxu1 %vm9219_vm0, %v9482_v54 }
 0x419   : > { %v2384_v29 = vpop.f32.mrb[0].mxu1 }
 0x41a   : > { %v2400_v31 = vmul.f32 %v9627_v28, %v2384_v29  ;;  %v7690_v32 = vpop.f32.mrb[1].mxu1  ;;  %v8813_v29 = vld [vmem:[#allocation6 + $0x88] sm:$0xff]  }
 0x41b   : > { %v2387_v33 = vpop.f32.mrb[2].mxu1  ;;  %v8816_v32 = vld [vmem:[#allocation6 + $0xa0] sm:$0xff]  }
 0x41c   : > { %v2409_v34 = vadd.f32 %v9632_v30, %v2400_v31  ;;  %v2401_v35 = vmul.f32 %v9627_v28, %v2387_v33  ;;  %v7691_v36 = vpop.f32.mrb[3].mxu1  ;;  %v8815_v31 = vld [vmem:[#allocation6 + $0x98] sm:$0xff]   ;;  %v8817_v33 = vld [vmem:[#allocation6 + $0xa8] sm:$0xff]  }
 0x41e   : > { %vm2411_vm10 = vcmp.gt.f32.partialorder %v2409_v34, 0.0  ;;  %v2413_v37 = vmul.f32 0.01, %v2409_v34  ;;  %v2410_v38 = vadd.f32 %v9632_v30, %v2401_v35  ;;  %v8819_v35 = vld [vmem:[#allocation6 + $0xb8] sm:$0xff]  }
 0x420   : > { %v2415_v39 = vsel %vm2411_vm10, %v2409_v34, %v2413_v37  ;;  %vm2412_vm11 = vcmp.gt.f32.partialorder %v2410_v38, 0.0  ;;  %v2414_v40 = vmul.f32 0.01, %v2410_v38  ;;  %v8818_v34 = vld [vmem:[#allocation6 + $0xb0] sm:$0xff]   ;;  %v8820_v37 = vld [vmem:[#allocation6 + $0xc0] sm:$0xff]  }
 0x421   : > { %v2418_v41 = vcombine.high %v2415_v39, %v2415_v39  ;;  %v2420_v42 = vsel %vm1453_vm2, %v2415_v39, -inf  ;;  %v8821_v39 = vld [vmem:[#allocation6 + $0xc8] sm:$0xff]  }
 0x422   : > { %v2421_v43 = vrot.slane %v2420_v42, 4  ;;  %v2416_v44 = vsel %vm2412_vm11, %v2410_v38, %v2414_v40  ;;  %v8822_v40 = vld [vmem:[#allocation6 + $0xd0] sm:$0xff]  }
 0x423   : > { %v2427_v45 = vsel %vm1453_vm2, %v2418_v41, -inf  ;;  %v2434_v46 = vsel %vm1453_vm2, %v2416_v44, -inf  ;;  %v8823_v41 = vld [vmem:[#allocation6 + $0xd8] sm:$0xff]   ;;  %v8826_v44 = vld [vmem:[#allocation6 + $0xf0] sm:$0xff]  }
 0x424   : > { %v2422_v47 = vmax.f32 %v2420_v42, %v2421_v43  ;;  %v2428_v48 = vrot.slane %v2427_v45, 4  ;;  %v2435_v49 = vrot.slane %v2434_v46, 4  ;;  %v8824_v42 = vld [vmem:[#allocation6 + $0xe0] sm:$0xff]   ;;  %v8825_v43 = vld [vmem:[#allocation6 + $0xe8] sm:$0xff]  }
 0x426   : > { %v2423_v50 = vrot.slane %v2422_v47, 2  ;;  %v2429_v51 = vmax.f32 %v2427_v45, %v2428_v48  ;;  %v2436_v52 = vmax.f32 %v2434_v46, %v2435_v49  ;;  %v8827_v45 = vld [vmem:[#allocation6 + $0xf8] sm:$0xff]   ;;  %v8829_v49 = vld [vmem:[#allocation6 + $0x108] sm:$0xff]  }
 0x428   : > { %v2424_v53 = vmax.f32 %v2422_v47, %v2423_v50  ;;  %v2430_v55 = vrot.slane %v2429_v51, 2  ;;  %v2437_v56 = vrot.slane %v2436_v52, 2  ;;  %v8828_v47 = vld [vmem:[#allocation6 + $0x100] sm:$0xff]   ;;  %v8830_v50 = vld [vmem:[#allocation6 + $0x110] sm:$0xff]  }
 0x42a   : > { %v2425_v57 = vrot.slane %v2424_v53, 1  ;;  %v2431_v58 = vmax.f32 %v2429_v51, %v2430_v55  ;;  %v2438_v59 = vmax.f32 %v2436_v52, %v2437_v56  ;;  %v8831_v51 = vld [vmem:[#allocation6 + $0x118] sm:$0xff]   ;;  %v8832_v52 = vld [vmem:[#allocation6 + $0x120] sm:$0xff]   ;;  %v8834_v55 = vld [vmem:[#allocation6 + $0x130] sm:$0xff]  }
 0x42b   : > { %v8835_v56 = vld [vmem:[#allocation6 + $0x138] sm:$0xff]  }
 0x42c   : > { %v2432_v60 = vrot.slane %v2431_v58, 1  ;;  %v2439_v61 = vrot.slane %v2438_v59, 1  ;;  %v2426_v62 = vmax.f32 %v2424_v53, %v2425_v57  ;;  %v8833_v53 = vld [vmem:[#allocation6 + $0x128] sm:$0xff]   ;;  %v8836_v57 = vld [vmem:[#allocation6 + $0x140] sm:$0xff]  }
 0x42e   : > { %v2433_v63 = vmax.f32 %v2431_v58, %v2432_v60  ;;  %v2440_v1 = vmax.f32 %v2438_v59, %v2439_v61  ;;  %v8837_v59 = vld [vmem:[#allocation6 + $0x148] sm:$0xff]   ;;  %v8838_v60 = vld [vmem:[#allocation6 + $0x150] sm:$0xff]   ;;  %v8839_v61 = vld [vmem:[#allocation6 + $0x158] sm:$0xff]  }
 0x430   : > { %v2444_v2 = vsel %vm1502_vm5, %v2433_v63, %v2426_v62  ;;  %v8840_v62 = vld [vmem:[#allocation6 + $0x160] sm:$0xff]   ;;  %v8841_v63 = vld [vmem:[#allocation6 + $0x168] sm:$0xff]  }
 0x431   : > { %v2445_v3 = vsel %vm1504_vm6, %v2440_v1, %v2444_v2  ;;  %v8842_v1 = vld [vmem:[#allocation6 + $0x170] sm:$0xff]   ;;  %v8843_v2 = vld [vmem:[#allocation6 + $0x178] sm:$0xff]  }
 0x432   : > { %2447 = vst [vmem:[#allocation2 + $0x8] sm:$0x7] %v2445_v3  ;;  %v8844_v3 = vld [vmem:[#allocation6 + $0x180] sm:$0xff]  }
 0x439   : > { %v2470_v4 = vld [vmem:[#allocation2 + $0x1] sm:$0xff]  ;;  %v2471_v5 = vld [vmem:[#allocation2 + $0x9] sm:$0xf] }
 0x43a   : > { %v2472_v7 = vpack.c.bf16 %v2471_v5, %v2470_v4  ;;  %v2452_v15 = vld [vmem:[#allocation2 + $0x8] sm:$0xf] }
 0x43b   : > { %v2668_v16 = vld [vmem:[#allocation2 + $0xa] sm:$0xf]  ;;  %v2453_v27 = vpack.c.bf16 %v2452_v15, %v9669_v10  ;;  %v2667_v36 = vld [vmem:[#allocation2 + $0x2] sm:$0xff]  ;;  %v8851_v15 = vld [vmem:[#allocation6 + $0x1b8] sm:$0xff]  }
 0x43c   : > { %v9653_v17 = vld [vmem:[#allocation2 + $0x4] sm:$0xff]  ;;  %7709 = vmatmul.mubr.bf16.vlgmr.msra.gmra.mrb[4].mxu0 %v2472_v7  ;;  %v2669_v38 = vpack.c.bf16 %v2668_v16, %v2667_v36  ;;  %v8847_v7 = vld [vmem:[#allocation6 + $0x198] sm:$0xff]  }
 0x43d   : > { %v9655_v9 = vld [vmem:[#allocation2 + $0x5] sm:$0xff]  ;;  %7713 = vmatpush3.bf16.msra.mxu0 %v8804_v6  ;;  %7728 = vmatprep.mubr.msk.bf16.mxu0 %vm9219_vm0, %v9482_v54  ;;  %v2889_v58 = vpack.c.bf16 %v9645_v11, %v9653_v17  ;;  %v8846_v6 = vld [vmem:[#allocation6 + $0x190] sm:$0xff]  }
 0x43e   : > { %v9657_v18 = vld [vmem:[#allocation2 + $0x6] sm:$0xff]  ;;  %7714 = vmatprep.subr.bf16.mxu0 %v9482_v54  ;;  %v2999_v4 = vpack.c.bf16 %v9647_v12, %v9655_v9  ;;  %v8850_v12 = vld [vmem:[#allocation6 + $0x1b0] sm:$0xff]  }
 0x43f   : > { %v9659_v19 = vld [vmem:[#allocation2 + $0x7] sm:$0xff]  ;;  %v3109_v17 = vpack.c.bf16 %v9649_v13, %v9657_v18 }
 0x440   : > { %3382 = vst [vmem:[#allocation2 + $0xb] sm:$0xff] %v9482_v54  ;;  %v2777_v46 = vld [vmem:[#allocation2 + $0x3] sm:$0xff] }
 0x441   : > { %7715 = vmatpush3.bf16.msra.mxu0 %v8805_v21  ;;  %v2779_v48 = vpack.c.bf16 %v9643_v8, %v2777_v46  ;;  %v8845_v5 = vld [vmem:[#allocation6 + $0x188] sm:$0xff]   ;;  %v8848_v8 = vld [vmem:[#allocation6 + $0x1a0] sm:$0xff]   ;;  %v8854_v21 = vld [vmem:[#allocation6 + $0x1d0] sm:$0xff]  }
 0x442   : > { %7716 = vmatprep.subr.bf16.mxu0 %v9482_v54  ;;  %v8849_v11 = vld [vmem:[#allocation6 + $0x1a8] sm:$0xff]   ;;  %v8852_v16 = vld [vmem:[#allocation6 + $0x1c0] sm:$0xff]  }
 0x443   : > { %v8853_v9 = vld [vmem:[#allocation6 + $0x1c8] sm:$0xff]   ;;  %v8856_v13 = vld [vmem:[#allocation6 + $0x1e0] sm:$0xff]  }
 0x444   : > { %v8857_v18 = vld [vmem:[#allocation6 + $0x1e8] sm:$0xff]  }
 0x445   : > { %7717 = vmatpush3.bf16.msra.mxu0 %v8806_v22  ;;  %v8855_v22 = vld [vmem:[#allocation6 + $0x1d8] sm:$0xff]  }
 0x446   : > { %7718 = vmatprep.subr.bf16.mxu0 %v9482_v54 }
 0x449   : > { %7719 = vmatpush3.bf16.msra.mxu0 %v8807_v23  ;;  %v8858_v23 = vld [vmem:[#allocation6 + $0x1f0] sm:$0xff]  }
 0x44a   : > { %7720 = vmatprep.subr.bf16.mxu0 %v9482_v54 }
 0x44d   : > { %7721 = vmatpush3.bf16.msra.mxu0 %v8808_v24  ;;  %v8859_v24 = vld [vmem:[#allocation6 + $0x1f8] sm:$0xff]  }
 0x44e   : > { %7722 = vmatprep.subr.bf16.mxu0 %v9482_v54  ;;  %v8814_v54 = vld [vmem:[#allocation6 + $0x90] sm:$0xff]  }
 0x451   : > { %7723 = vmatpush3.bf16.msra.mxu0 %v8809_v0  ;;  %v3219_v0 = vpack.c.bf16 %v9651_v14, %v9659_v19  ;;  %v8864_v14 = vld [vmem:[#allocation6 + $0x60] sm:$0xff]   ;;  %v8865_v19 = vld [vmem:[#allocation6 + $0x68] sm:$0xff]  }
 0x452   : > { %7724 = vmatprep.subr.bf16.mxu0 %v9669_v10 }
 0x455   : > { %7725 = vmatpush3.bf16.msra.mxu0 %v8810_v25  ;;  %v8860_v25 = vld [vmem:[#allocation6 + $0x40] sm:$0xff]  }
 0x456   : > { %7726 = vmatprep.subr.bf16.mxu0 %v9669_v10  ;;  %7853 = vmatpush3.bf16.msra.mxu1 %v8860_v25  ;;  %v8873_v25 = vld [vmem:[#allocation6 + $0x28] sm:$0xff]  }
 0x457   : > { %7854 = vmatprep.subr.bf16.mxu1 %v9669_v10 }
 0x459   : > { %7727 = vmatpush3.bf16.msra.mxu0 %v8811_v20  ;;  %v8861_v20 = vld [vmem:[#allocation6 + $0x48] sm:$0xff]  }
 0x45a   : > { %7732 = vmatprep.subr.bf16.mxu0 %v9669_v10  ;;  %7855 = vmatpush3.bf16.msra.mxu1 %v8861_v20  ;;  %v8874_v20 = vld [vmem:[#allocation6 + $0x30] sm:$0xff]  }
 0x45b   : > { %7856 = vmatprep.subr.bf16.mxu1 %v9669_v10 }
 0x45c   : > { %7729 = vmatmul.mubr.bf16.vlgmr.msra.gmra.mrb[4].mxu0 %v2453_v27  ;;  %v8863_v27 = vld [vmem:[#allocation6 + $0x58] sm:$0xff]  }
 0x45d   : > { %7733 = vmatpush3.bf16.msra.mxu0 %v8812_v26  ;;  %7748 = vmatprep.mubr.msk.bf16.mxu0 %vm9219_vm0, %v9669_v10  ;;  %v8862_v26 = vld [vmem:[#allocation6 + $0x50] sm:$0xff]  }
 0x45e   : > { %7734 = vmatprep.subr.bf16.mxu0 %v9669_v10  ;;  %7857 = vmatpush3.bf16.msra.mxu1 %v8862_v26  ;;  %v8875_v26 = vld [vmem:[#allocation6 + $0x38] sm:$0xff]  }
 0x45f   : > { %7858 = vmatprep.subr.bf16.mxu1 %v9669_v10 }
 0x461   : > { %7735 = vmatpush3.bf16.msra.mxu0 %v8813_v29  ;;  %v8866_v29 = vld [vmem:[#allocation6 + $0x70] sm:$0xff]  }
 0x462   : > { %7736 = vmatprep.subr.bf16.mxu0 %v9669_v10  ;;  %7859 = vmatpush3.bf16.msra.mxu1 %v8863_v27  ;;  %v8876_v27 = vld [vmem:[#allocation6 + $0x80] sm:$0xff]  }
 0x463   : > { %7860 = vmatprep.subr.bf16.mxu1 %v9669_v10 }
 0x465   : > { %7737 = vmatpush3.bf16.msra.mxu0 %v8814_v54  ;;  %v8867_v54 = vld [vmem:[#allocation6 + $0x78] sm:$0xff]  }
 0x466   : > { %7738 = vmatprep.subr.bf16.mxu0 %v9669_v10  ;;  %7861 = vmatpush3.bf16.msra.mxu1 %v8864_v14 }
 0x467   : > { %7862 = vmatprep.subr.bf16.mxu1 %v9669_v10 }
 0x469   : > { %7739 = vmatpush3.bf16.msra.mxu0 %v8815_v31 }
 0x46a   : > { %7740 = vmatprep.subr.bf16.mxu0 %v9669_v10  ;;  %7863 = vmatpush3.bf16.msra.mxu1 %v8865_v19  ;;  %v8877_v19 = vld [vmem:[#allocation6 + $0x88] sm:$0xff]  }
 0x46b   : > { %7864 = vmatprep.subr.bf16.mxu1 %v9669_v10 }
 0x46d   : > { %7741 = vmatpush3.bf16.msra.mxu0 %v8816_v32 }
 0x46e   : > { %7742 = vmatprep.subr.bf16.mxu0 %v9669_v10  ;;  %7865 = vmatpush3.bf16.msra.mxu1 %v8866_v29  ;;  %v8878_v29 = vld [vmem:[#allocation6 + $0x90] sm:$0xff]  }
 0x46f   : > { %7866 = vmatprep.subr.bf16.mxu1 %v9669_v10 }
 0x471   : > { %7743 = vmatpush3.bf16.msra.mxu0 %v8817_v33 }
 0x472   : > { %7744 = vmatprep.subr.bf16.mxu0 %v9669_v10  ;;  %7867 = vmatpush3.bf16.msra.mxu1 %v8867_v54  ;;  %v8879_v54 = vld [vmem:[#allocation6 + $0x98] sm:$0xff]  }
 0x473   : > { %7872 = vmatprep.subr.bf16.mxu1 %v9669_v10 }
 0x475   : > { %7745 = vmatpush3.bf16.msra.mxu0 %v8818_v34 }
 0x476   : > { %7746 = vmatprep.subr.bf16.mxu0 %v9669_v10 }
 0x479   : > { %7747 = vmatpush3.bf16.msra.mxu0 %v8819_v35 }
 0x47a   : > { %7752 = vmatprep.subr.bf16.mxu0 %v9669_v10 }
 0x47c   : > { %7749 = vmatmul.mubr.bf16.vlgmr.msra.gmra.mrb[4].mxu0 %v2669_v38 }
 0x47d   : > { %7753 = vmatpush3.bf16.msra.mxu0 %v8820_v37  ;;  %7768 = vmatprep.mubr.msk.bf16.mxu0 %vm9219_vm0, %v9669_v10 }
 0x47e   : > { %7754 = vmatprep.subr.bf16.mxu0 %v9669_v10 }
 0x481   : > { %7755 = vmatpush3.bf16.msra.mxu0 %v8821_v39 }
 0x482   : > { %7756 = vmatprep.subr.bf16.mxu0 %v9669_v10 }
 0x485   : > { %7757 = vmatpush3.bf16.msra.mxu0 %v8822_v40 }
 0x486   : > { %7758 = vmatprep.subr.bf16.mxu0 %v9669_v10 }
 0x489   : > { %7759 = vmatpush3.bf16.msra.mxu0 %v8823_v41 }
 0x48a   : > { %7760 = vmatprep.subr.bf16.mxu0 %v9669_v10 }
 0x48d   : > { %7761 = vmatpush3.bf16.msra.mxu0 %v8824_v42 }
 0x48e   : > { %7762 = vmatprep.subr.bf16.mxu0 %v9669_v10 }
 0x491   : > { %7763 = vmatpush3.bf16.msra.mxu0 %v8825_v43 }
 0x492   : > { %7764 = vmatprep.subr.bf16.mxu0 %v9669_v10 }
 0x495   : > { %7765 = vmatpush3.bf16.msra.mxu0 %v8826_v44 }
 0x496   : > { %7766 = vmatprep.subr.bf16.mxu0 %v9669_v10 }
 0x499   : > { %7767 = vmatpush3.bf16.msra.mxu0 %v8827_v45 }
 0x49a   : > { %7772 = vmatprep.subr.bf16.mxu0 %v9669_v10 }
 0x49c   : > { %7769 = vmatmul.mubr.bf16.vlgmr.msra.gmra.mrb[4].mxu0 %v2779_v48 }
 0x49d   : > { %7773 = vmatpush3.bf16.msra.mxu0 %v8828_v47  ;;  %7788 = vmatprep.mubr.msk.bf16.mxu0 %vm9219_vm0, %v9669_v10 }
 0x49e   : > { %7774 = vmatprep.subr.bf16.mxu0 %v9669_v10 }
 0x4a1   : > { %7775 = vmatpush3.bf16.msra.mxu0 %v8829_v49 }
 0x4a2   : > { %7776 = vmatprep.subr.bf16.mxu0 %v9669_v10 }
 0x4a5   : > { %7777 = vmatpush3.bf16.msra.mxu0 %v8830_v50 }
 0x4a6   : > { %7778 = vmatprep.subr.bf16.mxu0 %v9669_v10 }
 0x4a9   : > { %7779 = vmatpush3.bf16.msra.mxu0 %v8831_v51 }
 0x4aa   : > { %7780 = vmatprep.subr.bf16.mxu0 %v9669_v10 }
 0x4ad   : > { %7781 = vmatpush3.bf16.msra.mxu0 %v8832_v52 }
 0x4ae   : > { %7782 = vmatprep.subr.bf16.mxu0 %v9669_v10 }
 0x4b1   : > { %7783 = vmatpush3.bf16.msra.mxu0 %v8833_v53 }
 0x4b2   : > { %7784 = vmatprep.subr.bf16.mxu0 %v9669_v10 }
 0x4b5   : > { %7785 = vmatpush3.bf16.msra.mxu0 %v8834_v55 }
 0x4b6   : > { %7786 = vmatprep.subr.bf16.mxu0 %v9669_v10 }
 0x4b9   : > { %7787 = vmatpush3.bf16.msra.mxu0 %v8835_v56 }
 0x4ba   : > { %7792 = vmatprep.subr.bf16.mxu0 %v9669_v10 }
 0x4bc   : > { %7789 = vmatmul.mubr.bf16.vlgmr.msra.gmra.mrb[4].mxu0 %v2889_v58 }
 0x4bd   : > { %7793 = vmatpush3.bf16.msra.mxu0 %v8836_v57  ;;  %7808 = vmatprep.mubr.msk.bf16.mxu0 %vm9219_vm0, %v9669_v10 }
 0x4be   : > { %7794 = vmatprep.subr.bf16.mxu0 %v9669_v10 }
 0x4c1   : > { %7795 = vmatpush3.bf16.msra.mxu0 %v8837_v59 }
 0x4c2   : > { %7796 = vmatprep.subr.bf16.mxu0 %v9669_v10 }
 0x4c5   : > { %7797 = vmatpush3.bf16.msra.mxu0 %v8838_v60 }
 0x4c6   : > { %7798 = vmatprep.subr.bf16.mxu0 %v9669_v10 }
 0x4c9   : > { %7799 = vmatpush3.bf16.msra.mxu0 %v8839_v61 }
 0x4ca   : > { %7800 = vmatprep.subr.bf16.mxu0 %v9669_v10 }
 0x4cd   : > { %7801 = vmatpush3.bf16.msra.mxu0 %v8840_v62 }
 0x4ce   : > { %7802 = vmatprep.subr.bf16.mxu0 %v9669_v10 }
 0x4d1   : > { %7803 = vmatpush3.bf16.msra.mxu0 %v8841_v63 }
 0x4d2   : > { %7804 = vmatprep.subr.bf16.mxu0 %v9669_v10 }
 0x4d5   : > { %7805 = vmatpush3.bf16.msra.mxu0 %v8842_v1 }
 0x4d6   : > { %7806 = vmatprep.subr.bf16.mxu0 %v9669_v10 }
 0x4d9   : > { %7807 = vmatpush3.bf16.msra.mxu0 %v8843_v2 }
 0x4da   : > { %7812 = vmatprep.subr.bf16.mxu0 %v9669_v10 }
 0x4dc   : > { %7809 = vmatmul.mubr.bf16.vlgmr.msra.gmra.mrb[4].mxu0 %v2999_v4 }
 0x4dd   : > { %7813 = vmatpush3.bf16.msra.mxu0 %v8844_v3  ;;  %7828 = vmatprep.mubr.msk.bf16.mxu0 %vm9219_vm0, %v9669_v10 }
 0x4de   : > { %7814 = vmatprep.subr.bf16.mxu0 %v9669_v10 }
 0x4e1   : > { %7815 = vmatpush3.bf16.msra.mxu0 %v8845_v5  ;;  %v8868_v5 = vld [vmem:[#allocation6] sm:$0xff]  }
 0x4e2   : > { %7816 = vmatprep.subr.bf16.mxu0 %v9669_v10 }
 0x4e5   : > { %7817 = vmatpush3.bf16.msra.mxu0 %v8846_v6 }
 0x4e6   : > { %7818 = vmatprep.subr.bf16.mxu0 %v9669_v10 }
 0x4e9   : > { %7819 = vmatpush3.bf16.msra.mxu0 %v8847_v7  ;;  %v9763_v7 = vld [vmem:[#allocation2 + $0xb] sm:$0xf] }
 0x4ea   : > { %7820 = vmatprep.subr.bf16.mxu0 %v9669_v10 }
 0x4ed   : > { %7821 = vmatpush3.bf16.msra.mxu0 %v8848_v8  ;;  %v9765_v8 = vld [vmem:[#allocation2 + $0xc] sm:$0xf] }
 0x4ee   : > { %7822 = vmatprep.subr.bf16.mxu0 %v9669_v10 }
 0x4f1   : > { %7823 = vmatpush3.bf16.msra.mxu0 %v8849_v11  ;;  %v9767_v11 = vld [vmem:[#allocation2 + $0xd] sm:$0xf] }
 0x4f2   : > { %7824 = vmatprep.subr.bf16.mxu0 %v9669_v10 }
 0x4f5   : > { %7825 = vmatpush3.bf16.msra.mxu0 %v8850_v12  ;;  %v9769_v12 = vld [vmem:[#allocation2 + $0xe] sm:$0xf] }
 0x4f6   : > { %7826 = vmatprep.subr.bf16.mxu0 %v9669_v10 }
 0x4f9   : > { %7827 = vmatpush3.bf16.msra.mxu0 %v8851_v15  ;;  %v9771_v15 = vld [vmem:[#allocation2 + $0xf] sm:$0xf] }
 0x4fa   : > { %7832 = vmatprep.subr.bf16.mxu0 %v9669_v10 }
 0x4fc   : > { %7829 = vmatmul.mubr.bf16.vlgmr.msra.gmra.mrb[4].mxu0 %v3109_v17 }
 0x4fd   : > { %7833 = vmatpush3.bf16.msra.mxu0 %v8852_v16  ;;  %7848 = vmatprep.mubr.msk.bf16.mxu0 %vm9219_vm0, %v9669_v10 }
 0x4fe   : > { %7834 = vmatprep.subr.bf16.mxu0 %v9669_v10 }
 0x501   : > { %7835 = vmatpush3.bf16.msra.mxu0 %v8853_v9 }
 0x502   : > { %7836 = vmatprep.subr.bf16.mxu0 %v9669_v10 }
 0x505   : > { %7837 = vmatpush3.bf16.msra.mxu0 %v8854_v21 }
 0x506   : > { %7838 = vmatprep.subr.bf16.mxu0 %v9669_v10 }
 0x509   : > { %7839 = vmatpush3.bf16.msra.mxu0 %v8855_v22 }
 0x50a   : > { %7840 = vmatprep.subr.bf16.mxu0 %v9669_v10 }
 0x50d   : > { %7841 = vmatpush3.bf16.msra.mxu0 %v8856_v13 }
 0x50e   : > { %7842 = vmatprep.subr.bf16.mxu0 %v9669_v10 }
 0x511   : > { %7843 = vmatpush3.bf16.msra.mxu0 %v8857_v18  ;;  %v8869_v18 = vld [vmem:[#allocation6 + $0x8] sm:$0xff]  }
 0x512   : > { %7844 = vmatprep.subr.bf16.mxu0 %v9669_v10 }
 0x515   : > { %7845 = vmatpush3.bf16.msra.mxu0 %v8858_v23  ;;  %v8870_v23 = vld [vmem:[#allocation6 + $0x10] sm:$0xff]  }
 0x516   : > { %7846 = vmatprep.subr.bf16.mxu0 %v9669_v10 }
 0x519   : > { %7847 = vmatpush3.bf16.msra.mxu0 %v8859_v24  ;;  %v8871_v24 = vld [vmem:[#allocation6 + $0x18] sm:$0xff]  }
 0x51a   : > { %8012 = vmatprep.subr.bf16.mxu0 %v9669_v10 }
 0x51c   : > { %7849 = vmatmul.mubr.bf16.vlgmr.msra.gmra.mrb[4].mxu0 %v3219_v0  ;;  %v8872_v0 = vld [vmem:[#allocation6 + $0x20] sm:$0xff]  }
 0x51d   : > { %8028 = vmatprep.mubr.msk.bf16.mxu0 %vm9219_vm0, %v9669_v10 }
 0x5ef   : > { %v3318_v31 = vpop.f32.mrb[4].mxu0 }
 0x5f0   : > { %v3334_v32 = vmul.f32 %v9627_v28, %v3318_v31  ;;  %v7850_v33 = vpop.f32.mrb[5].mxu0  ;;  %v8880_v31 = vld [vmem:[#allocation6 + $0xa0] sm:$0xff]  }
 0x5f1   : > { %v3321_v34 = vpop.f32.mrb[6].mxu0  ;;  %v8882_v33 = vld [vmem:[#allocation6 + $0xb0] sm:$0xff]  }
 0x5f2   : > { %v3343_v35 = vadd.f32 %v9632_v30, %v3334_v32  ;;  %v3335_v36 = vmul.f32 %v9627_v28, %v3321_v34  ;;  %v7851_v37 = vpop.f32.mrb[7].mxu0  ;;  %v8881_v32 = vld [vmem:[#allocation6 + $0xa8] sm:$0xff]   ;;  %v8883_v34 = vld [vmem:[#allocation6 + $0xb8] sm:$0xff]  }
 0x5f4   : > { %vm3345_vm12 = vcmp.gt.f32.partialorder %v3343_v35, 0.0  ;;  %v3347_v38 = vmul.f32 0.01, %v3343_v35  ;;  %v3344_v39 = vadd.f32 %v9632_v30, %v3335_v36  ;;  %v8884_v36 = vld [vmem:[#allocation6 + $0xc0] sm:$0xff]  }
 0x5f6   : > { %v3349_v40 = vsel %vm3345_vm12, %v3343_v35, %v3347_v38  ;;  %vm3346_vm13 = vcmp.gt.f32.partialorder %v3344_v39, 0.0  ;;  %v3348_v41 = vmul.f32 0.01, %v3344_v39  ;;  %v8885_v38 = vld [vmem:[#allocation6 + $0xc8] sm:$0xff]  }
 0x5f7   : > { %v3352_v42 = vcombine.high %v3349_v40, %v3349_v40  ;;  %v3354_v43 = vsel %vm1453_vm2, %v3349_v40, -inf  ;;  %v8887_v40 = vld [vmem:[#allocation6 + $0xd8] sm:$0xff]  }
 0x5f8   : > { %v3355_v44 = vrot.slane %v3354_v43, 4  ;;  %v3350_v45 = vsel %vm3346_vm13, %v3344_v39, %v3348_v41  ;;  %v8886_v39 = vld [vmem:[#allocation6 + $0xd0] sm:$0xff]   ;;  %v8888_v41 = vld [vmem:[#allocation6 + $0xe0] sm:$0xff]  }
 0x5f9   : > { %v3361_v46 = vsel %vm1453_vm2, %v3352_v42, -inf  ;;  %v3368_v47 = vsel %vm1453_vm2, %v3350_v45, -inf  ;;  %v8889_v42 = vld [vmem:[#allocation6 + $0xe8] sm:$0xff]  }
 0x5fa   : > { %v3356_v48 = vmax.f32 %v3354_v43, %v3355_v44  ;;  %v3362_v49 = vrot.slane %v3361_v46, 4  ;;  %v3369_v28 = vrot.slane %v3368_v47, 4  ;;  %v8890_v43 = vld [vmem:[#allocation6 + $0xf0] sm:$0xff]   ;;  %v8891_v44 = vld [vmem:[#allocation6 + $0xf8] sm:$0xff]  }
 0x5fc   : > { %v3357_v50 = vrot.slane %v3356_v48, 2  ;;  %v3363_v51 = vmax.f32 %v3361_v46, %v3362_v49  ;;  %v3370_v52 = vmax.f32 %v3368_v47, %v3369_v28  ;;  %v8892_v46 = vld [vmem:[#allocation6 + $0x100] sm:$0xff]   ;;  %v8894_v49 = vld [vmem:[#allocation6 + $0x110] sm:$0xff]   ;;  %v8895_v28 = vld [vmem:[#allocation6 + $0x118] sm:$0xff]  }
 0x5fe   : > { %v3358_v53 = vmax.f32 %v3356_v48, %v3357_v50  ;;  %v3364_v30 = vrot.slane %v3363_v51, 2  ;;  %v3371_v55 = vrot.slane %v3370_v52, 2  ;;  %v8893_v48 = vld [vmem:[#allocation6 + $0x108] sm:$0xff]   ;;  %v8896_v50 = vld [vmem:[#allocation6 + $0x120] sm:$0xff]  }
 0x600   : > { %v3359_v56 = vrot.slane %v3358_v53, 1  ;;  %v3365_v57 = vmax.f32 %v3363_v51, %v3364_v30  ;;  %v3372_v58 = vmax.f32 %v3370_v52, %v3371_v55  ;;  %v8897_v51 = vld [vmem:[#allocation6 + $0x128] sm:$0xff]   ;;  %v8898_v52 = vld [vmem:[#allocation6 + $0x130] sm:$0xff]   ;;  %v8900_v30 = vld [vmem:[#allocation6 + $0x140] sm:$0xff]  }
 0x602   : > { %v3366_v59 = vrot.slane %v3365_v57, 1  ;;  %v3373_v60 = vrot.slane %v3372_v58, 1  ;;  %v3360_v61 = vmax.f32 %v3358_v53, %v3359_v56  ;;  %v8899_v53 = vld [vmem:[#allocation6 + $0x138] sm:$0xff]   ;;  %v8901_v56 = vld [vmem:[#allocation6 + $0x148] sm:$0xff]  }
 0x604   : > { %v3367_v62 = vmax.f32 %v3365_v57, %v3366_v59  ;;  %v3374_v63 = vmax.f32 %v3372_v58, %v3373_v60  ;;  %v8902_v57 = vld [vmem:[#allocation6 + $0x150] sm:$0xff]   ;;  %v8903_v58 = vld [vmem:[#allocation6 + $0x158] sm:$0xff]   ;;  %v8904_v59 = vld [vmem:[#allocation6 + $0x160] sm:$0xff]  }
 0x605   : > { %v8905_v60 = vld [vmem:[#allocation6 + $0x168] sm:$0xff]  }
 0x606   : > { %v3378_v1 = vsel %vm1502_vm5, %v3367_v62, %v3360_v61  ;;  %v8906_v61 = vld [vmem:[#allocation6 + $0x170] sm:$0xff]   ;;  %v8907_v62 = vld [vmem:[#allocation6 + $0x178] sm:$0xff]  }
 0x607   : > { %v3379_v2 = vsel %vm1504_vm6, %v3374_v63, %v3378_v1  ;;  %v8908_v63 = vld [vmem:[#allocation6 + $0x180] sm:$0xff]  }
 0x608   : > { %3381 = vst [vmem:[#allocation2 + $0x8] sm:$0x7] %v3379_v2  ;;  %v8909_v2 = vld [vmem:[#allocation6 + $0x188] sm:$0xff]  }
 0x60f   : > { %v3404_v3 = vld [vmem:[#allocation2 + $0x1] sm:$0xff]  ;;  %v3405_v4 = vld [vmem:[#allocation2 + $0x9] sm:$0xf] }
 0x610   : > { %v3406_v6 = vpack.c.bf16 %v3405_v4, %v3404_v3  ;;  %v3386_v16 = vld [vmem:[#allocation2 + $0x8] sm:$0xf]  ;;  %v8910_v3 = vld [vmem:[#allocation6 + $0x190] sm:$0xff]   ;;  %v8911_v4 = vld [vmem:[#allocation6 + $0x198] sm:$0xff]  }
 0x611   : > { %v3602_v17 = vld [vmem:[#allocation2 + $0xa] sm:$0xf]  ;;  %v3387_v14 = vpack.c.bf16 %v3386_v16, %v9669_v10  ;;  %v3601_v35 = vld [vmem:[#allocation2 + $0x2] sm:$0xff] }
 0x612   : > { %v9773_v9 = vld [vmem:[#allocation2 + $0x4] sm:$0xff]  ;;  %7869 = vmatmul.mubr.bf16.vlgmr.msra.gmra.mrb[4].mxu1 %v3406_v6  ;;  %v3603_v37 = vpack.c.bf16 %v3602_v17, %v3601_v35 }
 0x613   : > { %v9775_v21 = vld [vmem:[#allocation2 + $0x5] sm:$0xff]  ;;  %7873 = vmatpush3.bf16.msra.mxu1 %v8868_v5  ;;  %7888 = vmatprep.mubr.msk.bf16.mxu1 %vm9219_vm0, %v9669_v10  ;;  %v3823_v55 = vpack.c.bf16 %v9765_v8, %v9773_v9  ;;  %v8915_v8 = vld [vmem:[#allocation6 + $0x1b8] sm:$0xff]   ;;  %v8918_v9 = vld [vmem:[#allocation6 + $0x1d0] sm:$0xff]  }
 0x614   : > { %v9777_v22 = vld [vmem:[#allocation2 + $0x6] sm:$0xff]  ;;  %7874 = vmatprep.subr.bf16.mxu1 %v9669_v10  ;;  %v3933_v1 = vpack.c.bf16 %v9767_v11, %v9775_v21  ;;  %v8919_v21 = vld [vmem:[#allocation6 + $0x1d8] sm:$0xff]  }
 0x615   : > { %v9779_v13 = vld [vmem:[#allocation2 + $0x7] sm:$0xff]  ;;  %v4043_v16 = vpack.c.bf16 %v9769_v12, %v9777_v22 }
 0x616   : > { %4316 = vst [vmem:[#allocation2 + $0xb] sm:$0xff] %v9669_v10  ;;  %v3711_v45 = vld [vmem:[#allocation2 + $0x3] sm:$0xff] }
 0x617   : > { %7875 = vmatpush3.bf16.msra.mxu1 %v8869_v18  ;;  %v3713_v47 = vpack.c.bf16 %v9763_v7, %v3711_v45  ;;  %v8912_v5 = vld [vmem:[#allocation6 + $0x1a0] sm:$0xff]   ;;  %v8913_v6 = vld [vmem:[#allocation6 + $0x1a8] sm:$0xff]   ;;  %v8914_v7 = vld [vmem:[#allocation6 + $0x1b0] sm:$0xff]  }
 0x618   : > { %7876 = vmatprep.subr.bf16.mxu1 %v9669_v10  ;;  %v8916_v11 = vld [vmem:[#allocation6 + $0x1c0] sm:$0xff]   ;;  %v8917_v17 = vld [vmem:[#allocation6 + $0x1c8] sm:$0xff]   ;;  %v8922_v18 = vld [vmem:[#allocation6 + $0x1f0] sm:$0xff]  }
 0x619   : > { %v8920_v12 = vld [vmem:[#allocation6 + $0x1e0] sm:$0xff]   ;;  %v8921_v22 = vld [vmem:[#allocation6 + $0x1e8] sm:$0xff]  }
 0x61b   : > { %7877 = vmatpush3.bf16.msra.mxu1 %v8870_v23  ;;  %v8923_v23 = vld [vmem:[#allocation6 + $0x1f8] sm:$0xff]  }
 0x61c   : > { %7878 = vmatprep.subr.bf16.mxu1 %v9669_v10 }
 0x61f   : > { %7879 = vmatpush3.bf16.msra.mxu1 %v8871_v24  ;;  %v4153_v24 = vpack.c.bf16 %v9771_v15, %v9779_v13  ;;  %v8928_v15 = vld [vmem:[#allocation6 + $0x60] sm:$0xff]   ;;  %v8929_v13 = vld [vmem:[#allocation6 + $0x68] sm:$0xff]  }
 0x620   : > { %7880 = vmatprep.subr.bf16.mxu1 %v9669_v10 }
 0x623   : > { %7881 = vmatpush3.bf16.msra.mxu1 %v8872_v0  ;;  %v8924_v0 = vld [vmem:[#allocation6 + $0x40] sm:$0xff]  }
 0x624   : > { %7882 = vmatprep.subr.bf16.mxu1 %v9669_v10  ;;  %8013 = vmatpush3.bf16.msra.mxu0 %v8924_v0  ;;  %v8935_v0 = vld [vmem:[#allocation6 + $0x18] sm:$0xff]  }
 0x625   : > { %8014 = vmatprep.subr.bf16.mxu0 %v9669_v10 }
 0x627   : > { %7883 = vmatpush3.bf16.msra.mxu1 %v8873_v25  ;;  %v8925_v25 = vld [vmem:[#allocation6 + $0x48] sm:$0xff]  }
 0x628   : > { %7884 = vmatprep.subr.bf16.mxu1 %v9669_v10  ;;  %8015 = vmatpush3.bf16.msra.mxu0 %v8925_v25  ;;  %v8936_v25 = vld [vmem:[#allocation6 + $0x20] sm:$0xff]  }
 0x629   : > { %8016 = vmatprep.subr.bf16.mxu0 %v9669_v10 }
 0x62b   : > { %7885 = vmatpush3.bf16.msra.mxu1 %v8874_v20  ;;  %v8926_v20 = vld [vmem:[#allocation6 + $0x50] sm:$0xff]  }
 0x62c   : > { %7886 = vmatprep.subr.bf16.mxu1 %v9669_v10  ;;  %8017 = vmatpush3.bf16.msra.mxu0 %v8926_v20  ;;  %v8937_v20 = vld [vmem:[#allocation6 + $0x28] sm:$0xff]  }
 0x62d   : > { %8018 = vmatprep.subr.bf16.mxu0 %v9669_v10 }
 0x62f   : > { %7887 = vmatpush3.bf16.msra.mxu1 %v8875_v26  ;;  %v8927_v26 = vld [vmem:[#allocation6 + $0x58] sm:$0xff]  }
 0x630   : > { %7892 = vmatprep.subr.bf16.mxu1 %v9669_v10  ;;  %8019 = vmatpush3.bf16.msra.mxu0 %v8927_v26  ;;  %v8938_v26 = vld [vmem:[#allocation6 + $0x30] sm:$0xff]  }
 0x631   : > { %8020 = vmatprep.subr.bf16.mxu0 %v9669_v10 }
 0x632   : > { %7889 = vmatmul.mubr.bf16.vlgmr.msra.gmra.mrb[4].mxu1 %v3387_v14  ;;  %v8931_v14 = vld [vmem:[#allocation6 + $0x78] sm:$0xff]  }
 0x633   : > { %7893 = vmatpush3.bf16.msra.mxu1 %v8876_v27  ;;  %7908 = vmatprep.mubr.msk.bf16.mxu1 %vm9219_vm0, %v9669_v10  ;;  %v8930_v27 = vld [vmem:[#allocation6 + $0x70] sm:$0xff]  }
 0x634   : > { %7894 = vmatprep.subr.bf16.mxu1 %v9669_v10  ;;  %8021 = vmatpush3.bf16.msra.mxu0 %v8928_v15  ;;  %v8939_v15 = vld [vmem:[#allocation6 + $0x38] sm:$0xff]  }
 0x635   : > { %8022 = vmatprep.subr.bf16.mxu0 %v9669_v10 }
 0x637   : > { %7895 = vmatpush3.bf16.msra.mxu1 %v8877_v19  ;;  %v9875_v19 = vld [vmem:[%s10154_s7] ss:$0 sm:$0xff] }
 0x638   : > { %7896 = vmatprep.subr.bf16.mxu1 %v9669_v10  ;;  %8023 = vmatpush3.bf16.msra.mxu0 %v8929_v13  ;;  %v8940_v13 = vld [vmem:[#allocation6 + $0x80] sm:$0xff]  }
 0x639   : > { %8024 = vmatprep.subr.bf16.mxu0 %v9669_v10 }
 0x63b   : > { %7897 = vmatpush3.bf16.msra.mxu1 %v8878_v29 }
 0x63c   : > { %7898 = vmatprep.subr.bf16.mxu1 %v9669_v10  ;;  %8025 = vmatpush3.bf16.msra.mxu0 %v8930_v27 }
 0x63d   : > { %8026 = vmatprep.subr.bf16.mxu0 %v9669_v10 }
 0x63f   : > { %7899 = vmatpush3.bf16.msra.mxu1 %v8879_v54  ;;  %v9880_v54 = vld [vmem:[%s10155_s8] ss:$0 sm:$0xff] }
 0x640   : > { %7900 = vmatprep.subr.bf16.mxu1 %v9669_v10  ;;  %8027 = vmatpush3.bf16.msra.mxu0 %v8931_v14  ;;  %v8941_v14 = vld [vmem:[#allocation6 + $0x88] sm:$0xff]  }
 0x641   : > { %8032 = vmatprep.subr.bf16.mxu0 %v9669_v10 }
 0x643   : > { %7901 = vmatpush3.bf16.msra.mxu1 %v8880_v31 }
 0x644   : > { %7902 = vmatprep.subr.bf16.mxu1 %v9669_v10 }
 0x647   : > { %7903 = vmatpush3.bf16.msra.mxu1 %v8881_v32 }
 0x648   : > { %7904 = vmatprep.subr.bf16.mxu1 %v9669_v10 }
 0x64b   : > { %7905 = vmatpush3.bf16.msra.mxu1 %v8882_v33 }
 0x64c   : > { %7906 = vmatprep.subr.bf16.mxu1 %v9669_v10 }
 0x64f   : > { %7907 = vmatpush3.bf16.msra.mxu1 %v8883_v34 }
 0x650   : > { %7912 = vmatprep.subr.bf16.mxu1 %v9669_v10 }
 0x652   : > { %7909 = vmatmul.mubr.bf16.vlgmr.msra.gmra.mrb[4].mxu1 %v3603_v37 }
 0x653   : > { %7913 = vmatpush3.bf16.msra.mxu1 %v8884_v36  ;;  %7928 = vmatprep.mubr.msk.bf16.mxu1 %vm9219_vm0, %v9669_v10 }
 0x654   : > { %7914 = vmatprep.subr.bf16.mxu1 %v9669_v10 }
 0x657   : > { %7915 = vmatpush3.bf16.msra.mxu1 %v8885_v38 }
 0x658   : > { %7916 = vmatprep.subr.bf16.mxu1 %v9669_v10 }
 0x65b   : > { %7917 = vmatpush3.bf16.msra.mxu1 %v8886_v39 }
 0x65c   : > { %7918 = vmatprep.subr.bf16.mxu1 %v9669_v10 }
 0x65f   : > { %7919 = vmatpush3.bf16.msra.mxu1 %v8887_v40 }
 0x660   : > { %7920 = vmatprep.subr.bf16.mxu1 %v9669_v10 }
 0x663   : > { %7921 = vmatpush3.bf16.msra.mxu1 %v8888_v41 }
 0x664   : > { %7922 = vmatprep.subr.bf16.mxu1 %v9669_v10 }
 0x667   : > { %7923 = vmatpush3.bf16.msra.mxu1 %v8889_v42 }
 0x668   : > { %7924 = vmatprep.subr.bf16.mxu1 %v9669_v10 }
 0x66b   : > { %7925 = vmatpush3.bf16.msra.mxu1 %v8890_v43 }
 0x66c   : > { %7926 = vmatprep.subr.bf16.mxu1 %v9669_v10 }
 0x66f   : > { %7927 = vmatpush3.bf16.msra.mxu1 %v8891_v44 }
 0x670   : > { %7932 = vmatprep.subr.bf16.mxu1 %v9669_v10 }
 0x672   : > { %7929 = vmatmul.mubr.bf16.vlgmr.msra.gmra.mrb[4].mxu1 %v3713_v47 }
 0x673   : > { %7933 = vmatpush3.bf16.msra.mxu1 %v8892_v46  ;;  %7948 = vmatprep.mubr.msk.bf16.mxu1 %vm9219_vm0, %v9669_v10 }
 0x674   : > { %7934 = vmatprep.subr.bf16.mxu1 %v9669_v10 }
 0x677   : > { %7935 = vmatpush3.bf16.msra.mxu1 %v8893_v48 }
 0x678   : > { %7936 = vmatprep.subr.bf16.mxu1 %v9669_v10 }
 0x67b   : > { %7937 = vmatpush3.bf16.msra.mxu1 %v8894_v49 }
 0x67c   : > { %7938 = vmatprep.subr.bf16.mxu1 %v9669_v10 }
 0x67f   : > { %7939 = vmatpush3.bf16.msra.mxu1 %v8895_v28 }
 0x680   : > { %7940 = vmatprep.subr.bf16.mxu1 %v9669_v10 }
 0x683   : > { %7941 = vmatpush3.bf16.msra.mxu1 %v8896_v50 }
 0x684   : > { %7942 = vmatprep.subr.bf16.mxu1 %v9669_v10 }
 0x687   : > { %7943 = vmatpush3.bf16.msra.mxu1 %v8897_v51 }
 0x688   : > { %7944 = vmatprep.subr.bf16.mxu1 %v9669_v10 }
 0x68b   : > { %7945 = vmatpush3.bf16.msra.mxu1 %v8898_v52 }
 0x68c   : > { %7946 = vmatprep.subr.bf16.mxu1 %v9669_v10 }
 0x68f   : > { %7947 = vmatpush3.bf16.msra.mxu1 %v8899_v53 }
 0x690   : > { %7952 = vmatprep.subr.bf16.mxu1 %v9669_v10 }
 0x692   : > { %7949 = vmatmul.mubr.bf16.vlgmr.msra.gmra.mrb[4].mxu1 %v3823_v55 }
 0x693   : > { %7953 = vmatpush3.bf16.msra.mxu1 %v8900_v30  ;;  %7968 = vmatprep.mubr.msk.bf16.mxu1 %vm9219_vm0, %v9669_v10 }
 0x694   : > { %7954 = vmatprep.subr.bf16.mxu1 %v9669_v10 }
 0x697   : > { %7955 = vmatpush3.bf16.msra.mxu1 %v8901_v56 }
 0x698   : > { %7956 = vmatprep.subr.bf16.mxu1 %v9669_v10 }
 0x69b   : > { %7957 = vmatpush3.bf16.msra.mxu1 %v8902_v57 }
 0x69c   : > { %7958 = vmatprep.subr.bf16.mxu1 %v9669_v10 }
 0x69f   : > { %7959 = vmatpush3.bf16.msra.mxu1 %v8903_v58 }
 0x6a0   : > { %7960 = vmatprep.subr.bf16.mxu1 %v9669_v10 }
 0x6a3   : > { %7961 = vmatpush3.bf16.msra.mxu1 %v8904_v59 }
 0x6a4   : > { %7962 = vmatprep.subr.bf16.mxu1 %v9669_v10 }
 0x6a7   : > { %7963 = vmatpush3.bf16.msra.mxu1 %v8905_v60 }
 0x6a8   : > { %7964 = vmatprep.subr.bf16.mxu1 %v9669_v10 }
 0x6ab   : > { %7965 = vmatpush3.bf16.msra.mxu1 %v8906_v61 }
 0x6ac   : > { %7966 = vmatprep.subr.bf16.mxu1 %v9669_v10 }
 0x6af   : > { %7967 = vmatpush3.bf16.msra.mxu1 %v8907_v62 }
 0x6b0   : > { %7972 = vmatprep.subr.bf16.mxu1 %v9669_v10 }
 0x6b2   : > { %7969 = vmatmul.mubr.bf16.vlgmr.msra.gmra.mrb[4].mxu1 %v3933_v1 }
 0x6b3   : > { %7973 = vmatpush3.bf16.msra.mxu1 %v8908_v63  ;;  %7988 = vmatprep.mubr.msk.bf16.mxu1 %vm9219_vm0, %v9669_v10 }
 0x6b4   : > { %7974 = vmatprep.subr.bf16.mxu1 %v9669_v10 }
 0x6b7   : > { %7975 = vmatpush3.bf16.msra.mxu1 %v8909_v2 }
 0x6b8   : > { %7976 = vmatprep.subr.bf16.mxu1 %v9669_v10 }
 0x6bb   : > { %7977 = vmatpush3.bf16.msra.mxu1 %v8910_v3  ;;  %v8932_v3 = vld [vmem:[#allocation6] sm:$0xff]  }
 0x6bc   : > { %7978 = vmatprep.subr.bf16.mxu1 %v9669_v10 }
 0x6bf   : > { %7979 = vmatpush3.bf16.msra.mxu1 %v8911_v4 }
 0x6c0   : > { %7980 = vmatprep.subr.bf16.mxu1 %v9669_v10 }
 0x6c3   : > { %7981 = vmatpush3.bf16.msra.mxu1 %v8912_v5  ;;  %v9891_v5 = vld [vmem:[#allocation2 + $0xb] sm:$0xf] }
 0x6c4   : > { %7982 = vmatprep.subr.bf16.mxu1 %v9669_v10 }
 0x6c7   : > { %7983 = vmatpush3.bf16.msra.mxu1 %v8913_v6  ;;  %v9893_v6 = vld [vmem:[#allocation2 + $0xc] sm:$0xf] }
 0x6c8   : > { %7984 = vmatprep.subr.bf16.mxu1 %v9669_v10 }
 0x6cb   : > { %7985 = vmatpush3.bf16.msra.mxu1 %v8914_v7  ;;  %v9895_v7 = vld [vmem:[#allocation2 + $0xd] sm:$0xf] }
 0x6cc   : > { %7986 = vmatprep.subr.bf16.mxu1 %v9669_v10 }
 0x6cf   : > { %7987 = vmatpush3.bf16.msra.mxu1 %v8915_v8  ;;  %v9897_v8 = vld [vmem:[#allocation2 + $0xe] sm:$0xf] }
 0x6d0   : > { %7992 = vmatprep.subr.bf16.mxu1 %v9669_v10 }
 0x6d2   : > { %7989 = vmatmul.mubr.bf16.vlgmr.msra.gmra.mrb[4].mxu1 %v4043_v16 }
 0x6d3   : > { %7993 = vmatpush3.bf16.msra.mxu1 %v8916_v11  ;;  %8008 = vmatprep.mubr.msk.bf16.mxu1 %vm9219_vm0, %v9669_v10  ;;  %v9899_v11 = vld [vmem:[#allocation2 + $0xf] sm:$0xf] }
 0x6d4   : > { %7994 = vmatprep.subr.bf16.mxu1 %v9669_v10 }
 0x6d7   : > { %7995 = vmatpush3.bf16.msra.mxu1 %v8917_v17 }
 0x6d8   : > { %7996 = vmatprep.subr.bf16.mxu1 %v9669_v10 }
 0x6db   : > { %7997 = vmatpush3.bf16.msra.mxu1 %v8918_v9 }
 0x6dc   : > { %7998 = vmatprep.subr.bf16.mxu1 %v9669_v10 }
 0x6df   : > { %7999 = vmatpush3.bf16.msra.mxu1 %v8919_v21 }
 0x6e0   : > { %8000 = vmatprep.subr.bf16.mxu1 %v9669_v10 }
 0x6e3   : > { %8001 = vmatpush3.bf16.msra.mxu1 %v8920_v12 }
 0x6e4   : > { %8002 = vmatprep.subr.bf16.mxu1 %v9669_v10 }
 0x6e7   : > { %8003 = vmatpush3.bf16.msra.mxu1 %v8921_v22 }
 0x6e8   : > { %8004 = vmatprep.subr.bf16.mxu1 %v9669_v10 }
 0x6eb   : > { %8005 = vmatpush3.bf16.msra.mxu1 %v8922_v18  ;;  %v8933_v18 = vld [vmem:[#allocation6 + $0x8] sm:$0xff]  }
 0x6ec   : > { %8006 = vmatprep.subr.bf16.mxu1 %v9669_v10 }
 0x6ef   : > { %8007 = vmatpush3.bf16.msra.mxu1 %v8923_v23  ;;  %v9909_v23 = vld [vmem:[#allocation2] sm:$0xff] }
 0x6f0   : > { %8172 = vmatprep.subr.bf16.mxu1 %v9669_v10 }
 0x6f2   : > { %8009 = vmatmul.mubr.bf16.vlgmr.msra.gmra.mrb[4].mxu1 %v4153_v24  ;;  %v8934_v24 = vld [vmem:[#allocation6 + $0x10] sm:$0xff]  }
 0x6f3   : > { %8188 = vmatprep.mubr.msk.bf16.mxu1 %vm9219_vm0, %v9669_v10 }
 0x7c5   : > { %v4252_v29 = vpop.f32.mrb[4].mxu1 }
 0x7c6   : > { %v4268_v31 = vmul.f32 %v9875_v19, %v4252_v29  ;;  %v8010_v32 = vpop.f32.mrb[5].mxu1  ;;  %v8942_v29 = vld [vmem:[#allocation6 + $0x90] sm:$0xff]  }
 0x7c7   : > { %v4255_v33 = vpop.f32.mrb[6].mxu1  ;;  %v8944_v32 = vld [vmem:[#allocation6 + $0xa0] sm:$0xff]  }
 0x7c8   : > { %v4277_v34 = vadd.f32 %v9880_v54, %v4268_v31  ;;  %v4269_v35 = vmul.f32 %v9875_v19, %v4255_v33  ;;  %v8011_v10 = vpop.f32.mrb[7].mxu1  ;;  %v8943_v31 = vld [vmem:[#allocation6 + $0x98] sm:$0xff]   ;;  %v8945_v33 = vld [vmem:[#allocation6 + $0xa8] sm:$0xff]  }
 0x7ca   : > { %vm4279_vm14 = vcmp.gt.f32.partialorder %v4277_v34, 0.0  ;;  %v4281_v36 = vmul.f32 0.01, %v4277_v34  ;;  %v4278_v37 = vadd.f32 %v9880_v54, %v4269_v35  ;;  %v8947_v35 = vld [vmem:[#allocation6 + $0xb8] sm:$0xff]  }
 0x7cc   : > { %v4283_v38 = vsel %vm4279_vm14, %v4277_v34, %v4281_v36  ;;  %vm4280_vm15 = vcmp.gt.f32.partialorder %v4278_v37, 0.0  ;;  %v4282_v39 = vmul.f32 0.01, %v4278_v37  ;;  %v8946_v34 = vld [vmem:[#allocation6 + $0xb0] sm:$0xff]   ;;  %v8948_v36 = vld [vmem:[#allocation6 + $0xc0] sm:$0xff]  }
 0x7cd   : > { %v4286_v40 = vcombine.high %v4283_v38, %v4283_v38  ;;  %v4288_v41 = vsel %vm1453_vm2, %v4283_v38, -inf  ;;  %v8949_v38 = vld [vmem:[#allocation6 + $0xc8] sm:$0xff]  }
 0x7ce   : > { %v4289_v42 = vrot.slane %v4288_v41, 4  ;;  %v4284_v43 = vsel %vm4280_vm15, %v4278_v37, %v4282_v39  ;;  %v8950_v39 = vld [vmem:[#allocation6 + $0xd0] sm:$0xff]  }
 0x7cf   : > { %v4295_v44 = vsel %vm1453_vm2, %v4286_v40, -inf  ;;  %v4302_v45 = vsel %vm1453_vm2, %v4284_v43, -inf  ;;  %v8951_v40 = vld [vmem:[#allocation6 + $0xd8] sm:$0xff]   ;;  %v8954_v43 = vld [vmem:[#allocation6 + $0xf0] sm:$0xff]  }
 0x7d0   : > { %v4290_v46 = vmax.f32 %v4288_v41, %v4289_v42  ;;  %v4296_v47 = vrot.slane %v4295_v44, 4  ;;  %v4303_v48 = vrot.slane %v4302_v45, 4  ;;  %v8952_v41 = vld [vmem:[#allocation6 + $0xe0] sm:$0xff]   ;;  %v8953_v42 = vld [vmem:[#allocation6 + $0xe8] sm:$0xff]  }
 0x7d2   : > { %v4291_v49 = vrot.slane %v4290_v46, 2  ;;  %v4297_v28 = vmax.f32 %v4295_v44, %v4296_v47  ;;  %v4304_v50 = vmax.f32 %v4302_v45, %v4303_v48  ;;  %v8955_v44 = vld [vmem:[#allocation6 + $0xf8] sm:$0xff]   ;;  %v8957_v48 = vld [vmem:[#allocation6 + $0x108] sm:$0xff]  }
 0x7d4   : > { %v4292_v51 = vmax.f32 %v4290_v46, %v4291_v49  ;;  %v4298_v52 = vrot.slane %v4297_v28, 2  ;;  %v4305_v53 = vrot.slane %v4304_v50, 2  ;;  %v8956_v46 = vld [vmem:[#allocation6 + $0x100] sm:$0xff]   ;;  %v8958_v49 = vld [vmem:[#allocation6 + $0x110] sm:$0xff]  }
 0x7d6   : > { %v4293_v30 = vrot.slane %v4292_v51, 1  ;;  %v4299_v55 = vmax.f32 %v4297_v28, %v4298_v52  ;;  %v4306_v56 = vmax.f32 %v4304_v50, %v4305_v53  ;;  %v8959_v28 = vld [vmem:[#allocation6 + $0x118] sm:$0xff]   ;;  %v8960_v50 = vld [vmem:[#allocation6 + $0x120] sm:$0xff]   ;;  %v8962_v52 = vld [vmem:[#allocation6 + $0x130] sm:$0xff]  }
 0x7d7   : > { %v8963_v53 = vld [vmem:[#allocation6 + $0x138] sm:$0xff]  }
 0x7d8   : > { %v4300_v57 = vrot.slane %v4299_v55, 1  ;;  %v4307_v58 = vrot.slane %v4306_v56, 1  ;;  %v4294_v59 = vmax.f32 %v4292_v51, %v4293_v30  ;;  %v8961_v51 = vld [vmem:[#allocation6 + $0x128] sm:$0xff]   ;;  %v8964_v30 = vld [vmem:[#allocation6 + $0x140] sm:$0xff]  }
 0x7da   : > { %v4301_v60 = vmax.f32 %v4299_v55, %v4300_v57  ;;  %v4308_v61 = vmax.f32 %v4306_v56, %v4307_v58  ;;  %v8965_v56 = vld [vmem:[#allocation6 + $0x148] sm:$0xff]   ;;  %v8966_v57 = vld [vmem:[#allocation6 + $0x150] sm:$0xff]   ;;  %v8967_v58 = vld [vmem:[#allocation6 + $0x158] sm:$0xff]  }
 0x7dc   : > { %v4312_v62 = vsel %vm1502_vm5, %v4301_v60, %v4294_v59  ;;  %v8968_v59 = vld [vmem:[#allocation6 + $0x160] sm:$0xff]   ;;  %v8969_v60 = vld [vmem:[#allocation6 + $0x168] sm:$0xff]  }
 0x7dd   : > { %v4313_v63 = vsel %vm1504_vm6, %v4308_v61, %v4312_v62  ;;  %v8970_v61 = vld [vmem:[#allocation6 + $0x170] sm:$0xff]   ;;  %v8971_v62 = vld [vmem:[#allocation6 + $0x178] sm:$0xff]  }
 0x7de   : > { %4315 = vst [vmem:[#allocation2 + $0x8] sm:$0x7] %v4313_v63  ;;  %v8972_v63 = vld [vmem:[#allocation6 + $0x180] sm:$0xff]  }
 0x7e5   : > { %v4338_v1 = vld [vmem:[#allocation2 + $0x1] sm:$0xff]  ;;  %v4339_v2 = vld [vmem:[#allocation2 + $0x9] sm:$0xf] }
 0x7e6   : > { %v4340_v4 = vpack.c.bf16 %v4339_v2, %v4338_v1  ;;  %v4320_v16 = vld [vmem:[#allocation2 + $0x8] sm:$0xf] }
 0x7e7   : > { %v4536_v17 = vld [vmem:[#allocation2 + $0xa] sm:$0xf]  ;;  %v4321_v27 = vpack.c.bf16 %v4320_v16, %v9909_v23  ;;  %v4535_v10 = vld [vmem:[#allocation2 + $0x2] sm:$0xff]  ;;  %v8979_v16 = vld [vmem:[#allocation6 + $0x1b8] sm:$0xff]  }
 0x7e8   : > { %v9901_v9 = vld [vmem:[#allocation2 + $0x4] sm:$0xff]  ;;  %8029 = vmatmul.mubr.bf16.vlgmr.msra.gmra.mrb[8].mxu0 %v4340_v4  ;;  %v4537_v37 = vpack.c.bf16 %v4536_v17, %v4535_v10  ;;  %v8975_v4 = vld [vmem:[#allocation6 + $0x198] sm:$0xff]  }
 0x7e9   : > { %v9903_v21 = vld [vmem:[#allocation2 + $0x5] sm:$0xff]  ;;  %8033 = vmatpush3.bf16.msra.mxu0 %v8932_v3  ;;  %8048 = vmatprep.mubr.msk.bf16.mxu0 %vm9219_vm0, %v9909_v23  ;;  %v4757_v55 = vpack.c.bf16 %v9893_v6, %v9901_v9  ;;  %v8974_v3 = vld [vmem:[#allocation6 + $0x190] sm:$0xff]  }
 0x7ea   : > { %v9905_v12 = vld [vmem:[#allocation2 + $0x6] sm:$0xff]  ;;  %8034 = vmatprep.subr.bf16.mxu0 %v9909_v23  ;;  %v4867_v1 = vpack.c.bf16 %v9895_v7, %v9903_v21  ;;  %v8978_v7 = vld [vmem:[#allocation6 + $0x1b0] sm:$0xff]  }
 0x7eb   : > { %v9907_v22 = vld [vmem:[#allocation2 + $0x7] sm:$0xff]  ;;  %v4977_v9 = vpack.c.bf16 %v9897_v8, %v9905_v12 }
 0x7ec   : > { %5250 = vst [vmem:[#allocation2 + $0xb] sm:$0xff] %v9909_v23  ;;  %v4645_v45 = vld [vmem:[#allocation2 + $0x3] sm:$0xff] }
 0x7ed   : > { %8035 = vmatpush3.bf16.msra.mxu0 %v8933_v18  ;;  %v4647_v47 = vpack.c.bf16 %v9891_v5, %v4645_v45  ;;  %v8973_v2 = vld [vmem:[#allocation6 + $0x188] sm:$0xff]   ;;  %v8976_v5 = vld [vmem:[#allocation6 + $0x1a0] sm:$0xff]   ;;  %v8982_v18 = vld [vmem:[#allocation6 + $0x1d0] sm:$0xff]  }
 0x7ee   : > { %8036 = vmatprep.subr.bf16.mxu0 %v9909_v23  ;;  %v8977_v6 = vld [vmem:[#allocation6 + $0x1a8] sm:$0xff]   ;;  %v8980_v17 = vld [vmem:[#allocation6 + $0x1c0] sm:$0xff]  }
 0x7ef   : > { %v8981_v21 = vld [vmem:[#allocation6 + $0x1c8] sm:$0xff]   ;;  %v8984_v8 = vld [vmem:[#allocation6 + $0x1e0] sm:$0xff]  }
 0x7f0   : > { %v8985_v12 = vld [vmem:[#allocation6 + $0x1e8] sm:$0xff]  }
 0x7f1   : > { %8037 = vmatpush3.bf16.msra.mxu0 %v8934_v24  ;;  %v8983_v24 = vld [vmem:[#allocation6 + $0x1d8] sm:$0xff]  }
 0x7f2   : > { %8038 = vmatprep.subr.bf16.mxu0 %v9909_v23 }
 0x7f5   : > { %8039 = vmatpush3.bf16.msra.mxu0 %v8935_v0  ;;  %v8986_v0 = vld [vmem:[#allocation6 + $0x1f0] sm:$0xff]  }
 0x7f6   : > { %8040 = vmatprep.subr.bf16.mxu0 %v9909_v23 }
 0x7f9   : > { %8041 = vmatpush3.bf16.msra.mxu0 %v8936_v25  ;;  %v8987_v25 = vld [vmem:[#allocation6 + $0x1f8] sm:$0xff]  }
 0x7fa   : > { %8042 = vmatprep.subr.bf16.mxu0 %v9909_v23 }
 0x7fd   : > { %8043 = vmatpush3.bf16.msra.mxu0 %v8937_v20  ;;  %v5087_v20 = vpack.c.bf16 %v9899_v11, %v9907_v22  ;;  %v8993_v11 = vld [vmem:[#allocation6 + $0x68] sm:$0xff]   ;;  %v8994_v22 = vld [vmem:[#allocation6 + $0x70] sm:$0xff]  }
 0x7fe   : > { %8044 = vmatprep.subr.bf16.mxu0 %v9909_v23 }
 0x801   : > { %8045 = vmatpush3.bf16.msra.mxu0 %v8938_v26  ;;  %v8988_v26 = vld [vmem:[#allocation6 + $0x40] sm:$0xff]  }
 0x802   : > { %8046 = vmatprep.subr.bf16.mxu0 %v9909_v23  ;;  %8173 = vmatpush3.bf16.msra.mxu1 %v8988_v26  ;;  %v9010_v26 = vld [vmem:[#allocation6 + $0xb0] sm:$0xff]  }
 0x803   : > { %8174 = vmatprep.subr.bf16.mxu1 %v9909_v23 }
 0x805   : > { %8047 = vmatpush3.bf16.msra.mxu0 %v8939_v15  ;;  %v8989_v15 = vld [vmem:[#allocation6 + $0x48] sm:$0xff]  }
 0x806   : > { %8052 = vmatprep.subr.bf16.mxu0 %v9909_v23  ;;  %8175 = vmatpush3.bf16.msra.mxu1 %v8989_v15  ;;  %v9011_v15 = vld [vmem:[#allocation6 + $0xb8] sm:$0xff]  }
 0x807   : > { %8176 = vmatprep.subr.bf16.mxu1 %v9909_v23 }
 0x808   : > { %8049 = vmatmul.mubr.bf16.vlgmr.msra.gmra.mrb[8].mxu0 %v4321_v27  ;;  %v8991_v27 = vld [vmem:[#allocation6 + $0x58] sm:$0xff]  }
 0x809   : > { %8053 = vmatpush3.bf16.msra.mxu0 %v8940_v13  ;;  %8068 = vmatprep.mubr.msk.bf16.mxu0 %vm9219_vm0, %v9909_v23  ;;  %v8990_v13 = vld [vmem:[#allocation6 + $0x50] sm:$0xff]  }
 0x80a   : > { %8054 = vmatprep.subr.bf16.mxu0 %v9909_v23  ;;  %8177 = vmatpush3.bf16.msra.mxu1 %v8990_v13 }
 0x80b   : > { %8178 = vmatprep.subr.bf16.mxu1 %v9909_v23 }
 0x80d   : > { %8055 = vmatpush3.bf16.msra.mxu0 %v8941_v14  ;;  %v8992_v14 = vld [vmem:[#allocation6 + $0x60] sm:$0xff]  }
 0x80e   : > { %8056 = vmatprep.subr.bf16.mxu0 %v9909_v23  ;;  %8179 = vmatpush3.bf16.msra.mxu1 %v8991_v27 }
 0x80f   : > { %8180 = vmatprep.subr.bf16.mxu1 %v9909_v23 }
 0x811   : > { %8057 = vmatpush3.bf16.msra.mxu0 %v8942_v29  ;;  %v8995_v29 = vld [vmem:[#allocation6 + $0x78] sm:$0xff]  }
 0x812   : > { %8058 = vmatprep.subr.bf16.mxu0 %v9909_v23  ;;  %8181 = vmatpush3.bf16.msra.mxu1 %v8992_v14  ;;  %v9012_v14 = vld [vmem:[#allocation6 + $0xc0] sm:$0xff]  }
 0x813   : > { %8182 = vmatprep.subr.bf16.mxu1 %v9909_v23 }
 0x815   : > { %8059 = vmatpush3.bf16.msra.mxu0 %v8943_v31 }
 0x816   : > { %8060 = vmatprep.subr.bf16.mxu0 %v9909_v23  ;;  %8183 = vmatpush3.bf16.msra.mxu1 %v8993_v11 }
 0x817   : > { %8184 = vmatprep.subr.bf16.mxu1 %v9909_v23 }
 0x819   : > { %8061 = vmatpush3.bf16.msra.mxu0 %v8944_v32 }
 0x81a   : > { %8062 = vmatprep.subr.bf16.mxu0 %v9909_v23  ;;  %8185 = vmatpush3.bf16.msra.mxu1 %v8994_v22  ;;  %v9013_v22 = vld [vmem:[#allocation6 + $0xc8] sm:$0xff]  }
 0x81b   : > { %8186 = vmatprep.subr.bf16.mxu1 %v9909_v23 }
 0x81d   : > { %8063 = vmatpush3.bf16.msra.mxu0 %v8945_v33 }
 0x81e   : > { %8064 = vmatprep.subr.bf16.mxu0 %v9909_v23  ;;  %8187 = vmatpush3.bf16.msra.mxu1 %v8995_v29  ;;  %v9014_v29 = vld [vmem:[#allocation6 + $0xd0] sm:$0xff]  }
 0x81f   : > { %8192 = vmatprep.subr.bf16.mxu1 %v9909_v23 }
 0x821   : > { %8065 = vmatpush3.bf16.msra.mxu0 %v8946_v34 }
 0x822   : > { %8066 = vmatprep.subr.bf16.mxu0 %v9909_v23 }
 0x825   : > { %8067 = vmatpush3.bf16.msra.mxu0 %v8947_v35 }
 0x826   : > { %8072 = vmatprep.subr.bf16.mxu0 %v9909_v23 }
 0x828   : > { %8069 = vmatmul.mubr.bf16.vlgmr.msra.gmra.mrb[8].mxu0 %v4537_v37 }
 0x829   : > { %8073 = vmatpush3.bf16.msra.mxu0 %v8948_v36  ;;  %8088 = vmatprep.mubr.msk.bf16.mxu0 %vm9219_vm0, %v9909_v23 }
 0x82a   : > { %8074 = vmatprep.subr.bf16.mxu0 %v9909_v23 }
 0x82d   : > { %8075 = vmatpush3.bf16.msra.mxu0 %v8949_v38 }
 0x82e   : > { %8076 = vmatprep.subr.bf16.mxu0 %v9909_v23 }
 0x831   : > { %8077 = vmatpush3.bf16.msra.mxu0 %v8950_v39 }
 0x832   : > { %8078 = vmatprep.subr.bf16.mxu0 %v9909_v23 }
 0x835   : > { %8079 = vmatpush3.bf16.msra.mxu0 %v8951_v40 }
 0x836   : > { %8080 = vmatprep.subr.bf16.mxu0 %v9909_v23 }
 0x839   : > { %8081 = vmatpush3.bf16.msra.mxu0 %v8952_v41 }
 0x83a   : > { %8082 = vmatprep.subr.bf16.mxu0 %v9909_v23 }
 0x83d   : > { %8083 = vmatpush3.bf16.msra.mxu0 %v8953_v42 }
 0x83e   : > { %8084 = vmatprep.subr.bf16.mxu0 %v9909_v23 }
 0x841   : > { %8085 = vmatpush3.bf16.msra.mxu0 %v8954_v43 }
 0x842   : > { %8086 = vmatprep.subr.bf16.mxu0 %v9909_v23 }
 0x845   : > { %8087 = vmatpush3.bf16.msra.mxu0 %v8955_v44 }
 0x846   : > { %8092 = vmatprep.subr.bf16.mxu0 %v9909_v23 }
 0x848   : > { %8089 = vmatmul.mubr.bf16.vlgmr.msra.gmra.mrb[8].mxu0 %v4647_v47 }
 0x849   : > { %8093 = vmatpush3.bf16.msra.mxu0 %v8956_v46  ;;  %8108 = vmatprep.mubr.msk.bf16.mxu0 %vm9219_vm0, %v9909_v23 }
 0x84a   : > { %8094 = vmatprep.subr.bf16.mxu0 %v9909_v23 }
 0x84d   : > { %8095 = vmatpush3.bf16.msra.mxu0 %v8957_v48 }
 0x84e   : > { %8096 = vmatprep.subr.bf16.mxu0 %v9909_v23 }
 0x851   : > { %8097 = vmatpush3.bf16.msra.mxu0 %v8958_v49 }
 0x852   : > { %8098 = vmatprep.subr.bf16.mxu0 %v9909_v23 }
 0x855   : > { %8099 = vmatpush3.bf16.msra.mxu0 %v8959_v28 }
 0x856   : > { %8100 = vmatprep.subr.bf16.mxu0 %v9909_v23 }
 0x859   : > { %8101 = vmatpush3.bf16.msra.mxu0 %v8960_v50 }
 0x85a   : > { %8102 = vmatprep.subr.bf16.mxu0 %v9909_v23 }
 0x85d   : > { %8103 = vmatpush3.bf16.msra.mxu0 %v8961_v51 }
 0x85e   : > { %8104 = vmatprep.subr.bf16.mxu0 %v9909_v23 }
 0x861   : > { %8105 = vmatpush3.bf16.msra.mxu0 %v8962_v52 }
 0x862   : > { %8106 = vmatprep.subr.bf16.mxu0 %v9909_v23 }
 0x865   : > { %8107 = vmatpush3.bf16.msra.mxu0 %v8963_v53 }
 0x866   : > { %8112 = vmatprep.subr.bf16.mxu0 %v9909_v23 }
 0x868   : > { %8109 = vmatmul.mubr.bf16.vlgmr.msra.gmra.mrb[8].mxu0 %v4757_v55 }
 0x869   : > { %8113 = vmatpush3.bf16.msra.mxu0 %v8964_v30  ;;  %8128 = vmatprep.mubr.msk.bf16.mxu0 %vm9219_vm0, %v9909_v23 }
 0x86a   : > { %8114 = vmatprep.subr.bf16.mxu0 %v9909_v23 }
 0x86d   : > { %8115 = vmatpush3.bf16.msra.mxu0 %v8965_v56 }
 0x86e   : > { %8116 = vmatprep.subr.bf16.mxu0 %v9909_v23 }
 0x871   : > { %8117 = vmatpush3.bf16.msra.mxu0 %v8966_v57 }
 0x872   : > { %8118 = vmatprep.subr.bf16.mxu0 %v9909_v23 }
 0x875   : > { %8119 = vmatpush3.bf16.msra.mxu0 %v8967_v58 }
 0x876   : > { %8120 = vmatprep.subr.bf16.mxu0 %v9909_v23 }
 0x879   : > { %8121 = vmatpush3.bf16.msra.mxu0 %v8968_v59 }
 0x87a   : > { %8122 = vmatprep.subr.bf16.mxu0 %v9909_v23 }
 0x87d   : > { %8123 = vmatpush3.bf16.msra.mxu0 %v8969_v60 }
 0x87e   : > { %8124 = vmatprep.subr.bf16.mxu0 %v9909_v23 }
 0x881   : > { %8125 = vmatpush3.bf16.msra.mxu0 %v8970_v61 }
 0x882   : > { %8126 = vmatprep.subr.bf16.mxu0 %v9909_v23 }
 0x885   : > { %8127 = vmatpush3.bf16.msra.mxu0 %v8971_v62 }
 0x886   : > { %8132 = vmatprep.subr.bf16.mxu0 %v9909_v23 }
 0x888   : > { %8129 = vmatmul.mubr.bf16.vlgmr.msra.gmra.mrb[8].mxu0 %v4867_v1 }
 0x889   : > { %8133 = vmatpush3.bf16.msra.mxu0 %v8972_v63  ;;  %8148 = vmatprep.mubr.msk.bf16.mxu0 %vm9219_vm0, %v9909_v23 }
 0x88a   : > { %8134 = vmatprep.subr.bf16.mxu0 %v9909_v23 }
 0x88d   : > { %8135 = vmatpush3.bf16.msra.mxu0 %v8973_v2  ;;  %v8996_v2 = vld [vmem:[#allocation6] sm:$0xff]  }
 0x88e   : > { %8136 = vmatprep.subr.bf16.mxu0 %v9909_v23 }
 0x891   : > { %8137 = vmatpush3.bf16.msra.mxu0 %v8974_v3 }
 0x892   : > { %8138 = vmatprep.subr.bf16.mxu0 %v9909_v23 }
 0x895   : > { %8139 = vmatpush3.bf16.msra.mxu0 %v8975_v4  ;;  %v8997_v4 = vld [vmem:[#allocation6 + $0x8] sm:$0xff]  }
 0x896   : > { %8140 = vmatprep.subr.bf16.mxu0 %v9909_v23 }
 0x899   : > { %8141 = vmatpush3.bf16.msra.mxu0 %v8976_v5  ;;  %v8998_v5 = vld [vmem:[#allocation6 + $0x10] sm:$0xff]  }
 0x89a   : > { %8142 = vmatprep.subr.bf16.mxu0 %v9909_v23 }
 0x89d   : > { %8143 = vmatpush3.bf16.msra.mxu0 %v8977_v6  ;;  %v8999_v6 = vld [vmem:[#allocation6 + $0x18] sm:$0xff]  }
 0x89e   : > { %8144 = vmatprep.subr.bf16.mxu0 %v9909_v23 }
 0x8a1   : > { %8145 = vmatpush3.bf16.msra.mxu0 %v8978_v7  ;;  %v9000_v7 = vld [vmem:[#allocation6 + $0x20] sm:$0xff]  }
 0x8a2   : > { %8146 = vmatprep.subr.bf16.mxu0 %v9909_v23 }
 0x8a5   : > { %8147 = vmatpush3.bf16.msra.mxu0 %v8979_v16  ;;  %v9001_v16 = vld [vmem:[#allocation6 + $0x28] sm:$0xff]  }
 0x8a6   : > { %8152 = vmatprep.subr.bf16.mxu0 %v9909_v23 }
 0x8a8   : > { %8149 = vmatmul.mubr.bf16.vlgmr.msra.gmra.mrb[8].mxu0 %v4977_v9  ;;  %v9003_v9 = vld [vmem:[#allocation6 + $0x38] sm:$0xff]  }
 0x8a9   : > { %8153 = vmatpush3.bf16.msra.mxu0 %v8980_v17  ;;  %8168 = vmatprep.mubr.msk.bf16.mxu0 %vm9219_vm0, %v9909_v23  ;;  %v9002_v17 = vld [vmem:[#allocation6 + $0x30] sm:$0xff]  }
 0x8aa   : > { %8154 = vmatprep.subr.bf16.mxu0 %v9909_v23 }
 0x8ad   : > { %8155 = vmatpush3.bf16.msra.mxu0 %v8981_v21 }
 0x8ae   : > { %8156 = vmatprep.subr.bf16.mxu0 %v9909_v23 }
 0x8b1   : > { %8157 = vmatpush3.bf16.msra.mxu0 %v8982_v18  ;;  %v9004_v18 = vld [vmem:[#allocation6 + $0x80] sm:$0xff]  }
 0x8b2   : > { %8158 = vmatprep.subr.bf16.mxu0 %v9909_v23 }
 0x8b5   : > { %8159 = vmatpush3.bf16.msra.mxu0 %v8983_v24 }
 0x8b6   : > { %8160 = vmatprep.subr.bf16.mxu0 %v9909_v23 }
 0x8b9   : > { %8161 = vmatpush3.bf16.msra.mxu0 %v8984_v8  ;;  %v9005_v8 = vld [vmem:[#allocation6 + $0x88] sm:$0xff]  }
 0x8ba   : > { %8162 = vmatprep.subr.bf16.mxu0 %v9909_v23 }
 0x8bd   : > { %8163 = vmatpush3.bf16.msra.mxu0 %v8985_v12  ;;  %v9006_v12 = vld [vmem:[#allocation6 + $0x90] sm:$0xff]  }
 0x8be   : > { %8164 = vmatprep.subr.bf16.mxu0 %v9909_v23 }
 0x8c1   : > { %8165 = vmatpush3.bf16.msra.mxu0 %v8986_v0  ;;  %v9007_v0 = vld [vmem:[#allocation6 + $0x98] sm:$0xff]  }
 0x8c2   : > { %8166 = vmatprep.subr.bf16.mxu0 %v9909_v23 }
 0x8c5   : > { %8167 = vmatpush3.bf16.msra.mxu0 %v8987_v25  ;;  %v9008_v25 = vld [vmem:[#allocation6 + $0xa0] sm:$0xff]  }
 0x8c8   : > { %8169 = vmatmul.mubr.bf16.vlgmr.msra.gmra.mrb[8].mxu0 %v5087_v20  ;;  %v9009_v20 = vld [vmem:[#allocation6 + $0xa8] sm:$0xff]  }
 0x99b   : > { %v5186_v31 = vpop.f32.mrb[8].mxu0 }
 0x99c   : > { %v5202_v32 = vmul.f32 %v9875_v19, %v5186_v31  ;;  %v8170_v33 = vpop.f32.mrb[9].mxu0  ;;  %v9015_v31 = vld [vmem:[#allocation6 + $0xd8] sm:$0xff]  }
 0x99d   : > { %v5189_v34 = vpop.f32.mrb[10].mxu0  ;;  %v9017_v33 = vld [vmem:[#allocation6 + $0xe8] sm:$0xff]  }
 0x99e   : > { %v5211_v35 = vadd.f32 %v9880_v54, %v5202_v32  ;;  %v5203_v10 = vmul.f32 %v9875_v19, %v5189_v34  ;;  %v8171_v36 = vpop.f32.mrb[11].mxu0  ;;  %v9016_v32 = vld [vmem:[#allocation6 + $0xe0] sm:$0xff]   ;;  %v9018_v34 = vld [vmem:[#allocation6 + $0xf0] sm:$0xff]  }
 0x99f   : > { %v5580_v36 = vld [vmem:[#allocation2 + $0xb] sm:$0xf] }
 0x9a0   : > { %vm5213_vm1 = vcmp.gt.f32.partialorder %v5211_v35, 0.0  ;;  %v5215_v37 = vmul.f32 0.01, %v5211_v35  ;;  %v5212_v38 = vadd.f32 %v9880_v54, %v5203_v10 }
 0x9a2   : > { %v5217_v39 = vsel %vm5213_vm1, %v5211_v35, %v5215_v37  ;;  %vm5214_vm3 = vcmp.gt.f32.partialorder %v5212_v38, 0.0  ;;  %v5216_v40 = vmul.f32 0.01, %v5212_v38  ;;  %v9019_v35 = vld [vmem:[#allocation6 + $0xf8] sm:$0xff]   ;;  %v9020_v37 = vld [vmem:[#allocation6 + $0x100] sm:$0xff]  }
 0x9a3   : > { %v5220_v41 = vcombine.high %v5217_v39, %v5217_v39  ;;  %v5222_v42 = vsel %vm1453_vm2, %v5217_v39, -inf  ;;  %v6193_v39 = vld [vmem:[#allocation8 + $0x80] sm:$0xff] }
 0x9a4   : > { %v5223_v43 = vrot.slane %v5222_v42, 4  ;;  %v5218_v44 = vsel %vm5214_vm3, %v5212_v38, %v5216_v40  ;;  %v6194_v40 = vld [vmem:[#allocation8 + $0x88] sm:$0xff] }
 0x9a5   : > { %v5229_v45 = vsel %vm1453_vm2, %v5220_v41, -inf  ;;  %v5236_v46 = vsel %vm1453_vm2, %v5218_v44, -inf  ;;  %v9021_v41 = vld [vmem:[#allocation6 + $0x108] sm:$0xff]  }
 0x9a6   : > { %v5224_v47 = vmax.f32 %v5222_v42, %v5223_v43  ;;  %v5230_v48 = vrot.slane %v5229_v45, 4  ;;  %v5237_v19 = vrot.slane %v5236_v46, 4  ;;  %v8367_v42 = vpack.c.bf16 %v6194_v40, %v6193_v39  ;;  %v6177_v43 = vld [vmem:[#allocation8] sm:$0xff]  ;;  %v6178_v44 = vld [vmem:[#allocation8 + $0x8] sm:$0xff] }
 0x9a7   : > { %v6198_v39 = vld [vmem:[#allocation8 + $0xa8] sm:$0xff]  ;;  %v6213_v40 = vld [vmem:[#allocation8 + $0x120] sm:$0xff] }
 0x9a8   : > { %v5225_v49 = vrot.slane %v5224_v47, 2  ;;  %v5231_v28 = vmax.f32 %v5229_v45, %v5230_v48  ;;  %v5238_v50 = vmax.f32 %v5236_v46, %v5237_v19  ;;  %v8369_v45 = vpack.c.bf16 %v6178_v44, %v6177_v43  ;;  %v6195_v46 = vld [vmem:[#allocation8 + $0x90] sm:$0xff]  ;;  %8368 = vmatprep.subr.bf16.mxu0 %v8367_v42  ;;  %v6214_v42 = vld [vmem:[#allocation8 + $0x128] sm:$0xff]  ;;  %v6181_v43 = vld [vmem:[#allocation8 + $0x20] sm:$0xff] }
 0x9a9   : > { %v9022_v19 = vld [vmem:[#allocation6 + $0x110] sm:$0xff]   ;;  %v8406_v44 = vpack.c.bf16 %v6214_v42, %v6213_v40 }
 0x9aa   : > { %v5226_v51 = vmax.f32 %v5224_v47, %v5225_v49  ;;  %v5232_v54 = vrot.slane %v5231_v28, 2  ;;  %v5239_v52 = vrot.slane %v5238_v50, 2  ;;  %v6196_v47 = vld [vmem:[#allocation8 + $0x98] sm:$0xff]  ;;  %8370 = vmatpush3.bf16.msra.mxu0 %v8369_v45  ;;  %v6179_v49 = vld [vmem:[#allocation8 + $0x10] sm:$0xff]  ;;  %v6182_v45 = vld [vmem:[#allocation8 + $0x28] sm:$0xff] }
 0x9ab   : > { %v8371_v48 = vpack.c.bf16 %v6196_v47, %v6195_v46  ;;  %v8377_v46 = vpack.c.bf16 %v6182_v45, %v6181_v43  ;;  %v6199_v47 = vld [vmem:[#allocation8 + $0xb0] sm:$0xff] }
 0x9ac   : > { %v5227_v53 = vrot.slane %v5226_v51, 1  ;;  %v5233_v30 = vmax.f32 %v5231_v28, %v5232_v54  ;;  %v5240_v55 = vmax.f32 %v5238_v50, %v5239_v52  ;;  %v6180_v28 = vld [vmem:[#allocation8 + $0x18] sm:$0xff]  ;;  %v9024_v54 = vld [vmem:[#allocation6 + $0x120] sm:$0xff]   ;;  %v9025_v52 = vld [vmem:[#allocation6 + $0x128] sm:$0xff]  }
 0x9ad   : > { %8372 = vmatprep.subr.bf16.mxu0 %v8371_v48  ;;  %v8373_v50 = vpack.c.bf16 %v6180_v28, %v6179_v49  ;;  %v6200_v48 = vld [vmem:[#allocation8 + $0xb8] sm:$0xff]  ;;  %v6183_v28 = vld [vmem:[#allocation8 + $0x30] sm:$0xff] }
 0x9ae   : > { %v5234_v56 = vrot.slane %v5233_v30, 1  ;;  %v5241_v57 = vrot.slane %v5240_v55, 1  ;;  %v5228_v58 = vmax.f32 %v5226_v51, %v5227_v53  ;;  %v9023_v51 = vld [vmem:[#allocation6 + $0x118] sm:$0xff]   ;;  %v9026_v53 = vld [vmem:[#allocation6 + $0x130] sm:$0xff]  }
 0x9af   : > { %8374 = vmatpush3.bf16.msra.mxu0 %v8373_v50  ;;  %v6216_v49 = vld [vmem:[#allocation8 + $0x138] sm:$0xff] }
 0x9b0   : > { %v5235_v59 = vmax.f32 %v5233_v30, %v5234_v56  ;;  %v5242_v60 = vmax.f32 %v5240_v55, %v5241_v57  ;;  %v9027_v30 = vld [vmem:[#allocation6 + $0x138] sm:$0xff]   ;;  %v5690_v56 = vld [vmem:[#allocation2 + $0xc] sm:$0xf]  ;;  %v9028_v57 = vld [vmem:[#allocation6 + $0x140] sm:$0xff]  }
 0x9b1   : > { %v6184_v50 = vld [vmem:[#allocation8 + $0x38] sm:$0xff] }
 0x9b2   : > { %v5246_v61 = vsel %vm1502_vm5, %v5235_v59, %v5228_v58  ;;  %v9029_v59 = vld [vmem:[#allocation6 + $0x148] sm:$0xff]  }
 0x9b3   : > { %v5247_v62 = vsel %vm1504_vm6, %v5242_v60, %v5246_v61  ;;  %v9030_v60 = vld [vmem:[#allocation6 + $0x150] sm:$0xff]   ;;  %v9031_v61 = vld [vmem:[#allocation6 + $0x158] sm:$0xff]  }
 0x9b4   : > { %5249 = vst [vmem:[#allocation2 + $0x8] sm:$0x7] %v5247_v62  ;;  %v9032_v62 = vld [vmem:[#allocation6 + $0x160] sm:$0xff]  }
 0x9bb   : > { %v5272_v63 = vld [vmem:[#allocation2 + $0x1] sm:$0xff]  ;;  %v5273_v1 = vld [vmem:[#allocation2 + $0x9] sm:$0xf] }
 0x9bc   : > { %v5274_v3 = vpack.c.bf16 %v5273_v1, %v5272_v63  ;;  %v5254_v21 = vld [vmem:[#allocation2 + $0x8] sm:$0xf]  ;;  %v9034_v1 = vld [vmem:[#allocation6 + $0x170] sm:$0xff]  }
 0x9bd   : > { %v5255_v24 = vpack.c.bf16 %v5254_v21, %v9909_v23  ;;  %v5469_v13 = vld [vmem:[#allocation2 + $0x2] sm:$0xff]  ;;  %v5470_v27 = vld [vmem:[#allocation2 + $0xa] sm:$0xf] }
 0x9be   : > { %8189 = vmatmul.mubr.bf16.vlgmr.msra.gmra.mrb[8].mxu1 %v5274_v3  ;;  %v5471_v11 = vpack.c.bf16 %v5470_v27, %v5469_v13  ;;  %v5579_v10 = vld [vmem:[#allocation2 + $0x3] sm:$0xff] }
 0x9bf   : > { %8193 = vmatpush3.bf16.msra.mxu1 %v8996_v2  ;;  %8208 = vmatprep.mubr.msk.bf16.mxu1 %vm9219_vm0, %v9909_v23  ;;  %v5581_v38 = vpack.c.bf16 %v5580_v36, %v5579_v10  ;;  %v5689_v55 = vld [vmem:[#allocation2 + $0x4] sm:$0xff]  ;;  %v9035_v2 = vld [vmem:[#allocation6 + $0x178] sm:$0xff]   ;;  %v6211_v10 = vld [vmem:[#allocation8 + $0x110] sm:$0xff] }
 0x9c0   : > { %8194 = vmatprep.subr.bf16.mxu1 %v9909_v23  ;;  %v5691_v58 = vpack.c.bf16 %v5690_v56, %v5689_v55  ;;  %v9033_v63 = vld [vmem:[#allocation6 + $0x168] sm:$0xff]   ;;  %v9048_v13 = vld [vmem:[#allocation6 + $0x1e0] sm:$0xff]   ;;  %v6212_v36 = vld [vmem:[#allocation8 + $0x118] sm:$0xff] }
 0x9c1   : > { %v5799_v3 = vld [vmem:[#allocation2 + $0x5] sm:$0xff] }
 0x9c2   : > { %v9041_v21 = vld [vmem:[#allocation6 + $0x1a8] sm:$0xff]  }
 0x9c3   : > { %8195 = vmatpush3.bf16.msra.mxu1 %v8997_v4  ;;  %v5800_v4 = vld [vmem:[#allocation2 + $0xd] sm:$0xf] }
 0x9c4   : > { %8196 = vmatprep.subr.bf16.mxu1 %v9909_v23  ;;  %v9049_v27 = vld [vmem:[#allocation6 + $0x1e8] sm:$0xff]  }
 0x9c5   : > { %v6218_v56 = vld [vmem:[#allocation8 + $0x148] sm:$0xff] }
 0x9c7   : > { %8197 = vmatpush3.bf16.msra.mxu1 %v8998_v5  ;;  %v9036_v5 = vld [vmem:[#allocation6 + $0x180] sm:$0xff]  }
 0x9c8   : > { %8198 = vmatprep.subr.bf16.mxu1 %v9909_v23 }
 0x9cb   : > { %8199 = vmatpush3.bf16.msra.mxu1 %v8999_v6  ;;  %v5801_v6 = vpack.c.bf16 %v5800_v4, %v5799_v3  ;;  %v6187_v3 = vld [vmem:[#allocation8 + $0x50] sm:$0xff]  ;;  %v6188_v4 = vld [vmem:[#allocation8 + $0x58] sm:$0xff] }
 0x9cc   : > { %8200 = vmatprep.subr.bf16.mxu1 %v9909_v23 }
 0x9cf   : > { %8201 = vmatpush3.bf16.msra.mxu1 %v9000_v7  ;;  %v9037_v7 = vld [vmem:[#allocation6 + $0x188] sm:$0xff]  }
 0x9d0   : > { %8202 = vmatprep.subr.bf16.mxu1 %v9909_v23 }
 0x9d3   : > { %8203 = vmatpush3.bf16.msra.mxu1 %v9001_v16  ;;  %v9038_v16 = vld [vmem:[#allocation6 + $0x190] sm:$0xff]  }
 0x9d4   : > { %8204 = vmatprep.subr.bf16.mxu1 %v9909_v23 }
 0x9d7   : > { %8205 = vmatpush3.bf16.msra.mxu1 %v9002_v17  ;;  %v9039_v17 = vld [vmem:[#allocation6 + $0x198] sm:$0xff]  }
 0x9d8   : > { %8206 = vmatprep.subr.bf16.mxu1 %v9909_v23 }
 0x9db   : > { %8207 = vmatpush3.bf16.msra.mxu1 %v9003_v9  ;;  %v9040_v9 = vld [vmem:[#allocation6 + $0x1a0] sm:$0xff]  }
 0x9dc   : > { %8212 = vmatprep.subr.bf16.mxu1 %v9909_v23 }
 0x9de   : > { %8209 = vmatmul.mubr.bf16.vlgmr.msra.gmra.mrb[8].mxu1 %v5255_v24  ;;  %v9043_v24 = vld [vmem:[#allocation6 + $0x1b8] sm:$0xff]  }
 0x9df   : > { %8213 = vmatpush3.bf16.msra.mxu1 %v9004_v18  ;;  %8228 = vmatprep.mubr.msk.bf16.mxu1 %vm9219_vm0, %v9909_v23  ;;  %v9042_v18 = vld [vmem:[#allocation6 + $0x1b0] sm:$0xff]  }
 0x9e0   : > { %8214 = vmatprep.subr.bf16.mxu1 %v9909_v23 }
 0x9e3   : > { %8215 = vmatpush3.bf16.msra.mxu1 %v9005_v8  ;;  %v5909_v8 = vld [vmem:[#allocation2 + $0x6] sm:$0xff] }
 0x9e4   : > { %8216 = vmatprep.subr.bf16.mxu1 %v9909_v23 }
 0x9e7   : > { %8217 = vmatpush3.bf16.msra.mxu1 %v9006_v12  ;;  %v5910_v12 = vld [vmem:[#allocation2 + $0xe] sm:$0xf] }
 0x9e8   : > { %8218 = vmatprep.subr.bf16.mxu1 %v9909_v23 }
 0x9eb   : > { %8219 = vmatpush3.bf16.msra.mxu1 %v9007_v0  ;;  %v9044_v0 = vld [vmem:[#allocation6 + $0x1c0] sm:$0xff]  }
 0x9ec   : > { %8220 = vmatprep.subr.bf16.mxu1 %v9909_v23 }
 0x9ef   : > { %8221 = vmatpush3.bf16.msra.mxu1 %v9008_v25  ;;  %v5911_v25 = vpack.c.bf16 %v5910_v12, %v5909_v8 }
 0x9f0   : > { %8222 = vmatprep.subr.bf16.mxu1 %v9909_v23 }
 0x9f3   : > { %8223 = vmatpush3.bf16.msra.mxu1 %v9009_v20  ;;  %v9045_v20 = vld [vmem:[#allocation6 + $0x1c8] sm:$0xff]  }
 0x9f4   : > { %8224 = vmatprep.subr.bf16.mxu1 %v9909_v23 }
 0x9f7   : > { %8225 = vmatpush3.bf16.msra.mxu1 %v9010_v26  ;;  %v9046_v26 = vld [vmem:[#allocation6 + $0x1d0] sm:$0xff]  }
 0x9f8   : > { %8226 = vmatprep.subr.bf16.mxu1 %v9909_v23 }
 0x9fb   : > { %8227 = vmatpush3.bf16.msra.mxu1 %v9011_v15  ;;  %v9047_v15 = vld [vmem:[#allocation6 + $0x1d8] sm:$0xff]  }
 0x9fc   : > { %8232 = vmatprep.subr.bf16.mxu1 %v9909_v23 }
 0x9fe   : > { %8229 = vmatmul.mubr.bf16.vlgmr.msra.gmra.mrb[8].mxu1 %v5471_v11  ;;  %v9051_v11 = vld [vmem:[#allocation6 + $0x1f8] sm:$0xff]  }
 0x9ff   : > { %8233 = vmatpush3.bf16.msra.mxu1 %v9012_v14  ;;  %8248 = vmatprep.mubr.msk.bf16.mxu1 %vm9219_vm0, %v9909_v23  ;;  %v9050_v14 = vld [vmem:[#allocation6 + $0x1f0] sm:$0xff]  }
 0xa00   : > { %8234 = vmatprep.subr.bf16.mxu1 %v9909_v23 }
 0xa03   : > { %8235 = vmatpush3.bf16.msra.mxu1 %v9013_v22  ;;  %v6209_v22 = vld [vmem:[#allocation8 + $0x100] sm:$0xff] }
 0xa04   : > { %8236 = vmatprep.subr.bf16.mxu1 %v9909_v23 }
 0xa07   : > { %8237 = vmatpush3.bf16.msra.mxu1 %v9014_v29  ;;  %v6210_v29 = vld [vmem:[#allocation8 + $0x108] sm:$0xff] }
 0xa08   : > { %8238 = vmatprep.subr.bf16.mxu1 %v9909_v23 }
 0xa0b   : > { %8239 = vmatpush3.bf16.msra.mxu1 %v9015_v31  ;;  %v6019_v31 = vld [vmem:[#allocation2 + $0x7] sm:$0xff] }
 0xa0c   : > { %8240 = vmatprep.subr.bf16.mxu1 %v9909_v23 }
 0xa0f   : > { %8241 = vmatpush3.bf16.msra.mxu1 %v9016_v32  ;;  %v6020_v32 = vld [vmem:[#allocation2 + $0xf] sm:$0xf] }
 0xa10   : > { %8242 = vmatprep.subr.bf16.mxu1 %v9909_v23 }
 0xa13   : > { %8243 = vmatpush3.bf16.msra.mxu1 %v9017_v33  ;;  %v8400_v33 = vpack.c.bf16 %v6210_v29, %v6209_v22  ;;  %v6874_v22 = vld [vmem:[%s10154_s7] ss:$0 sm:$0xff] }
 0xa14   : > { %8244 = vmatprep.subr.bf16.mxu1 %v9909_v23 }
 0xa17   : > { %8245 = vmatpush3.bf16.msra.mxu1 %v9018_v34  ;;  %v6021_v34 = vpack.c.bf16 %v6020_v32, %v6019_v31  ;;  %v6875_v31 = vld [vmem:[%s10155_s8] ss:$0 sm:$0xff] }
 0xa18   : > { %8246 = vmatprep.subr.bf16.mxu1 %v9909_v23 }
 0xa1b   : > { %8247 = vmatpush3.bf16.msra.mxu1 %v9019_v35  ;;  %v9220_v35 = vmov 0.0|0.0  }
 0xa1c   : > { %8252 = vmatprep.subr.bf16.mxu1 %v9909_v23 }
 0xa1e   : > { %8249 = vmatmul.mubr.bf16.vlgmr.msra.gmra.mrb[8].mxu1 %v5581_v38  ;;  %v6197_v38 = vld [vmem:[#allocation8 + $0xa0] sm:$0xff] }
 0xa1f   : > { %8253 = vmatpush3.bf16.msra.mxu1 %v9020_v37  ;;  %8268 = vmatprep.mubr.msk.bf16.mxu1 %vm9219_vm0, %v9909_v23  ;;  %v8403_v37 = vpack.c.bf16 %v6212_v36, %v6211_v10 }
 0xa20   : > { %8254 = vmatprep.subr.bf16.mxu1 %v9909_v23 }
 0xa23   : > { %8255 = vmatpush3.bf16.msra.mxu1 %v9021_v41  ;;  %v8375_v41 = vpack.c.bf16 %v6198_v39, %v6197_v38 }
 0xa24   : > { %8256 = vmatprep.subr.bf16.mxu1 %v9909_v23 }
 0xa25   : > { %8376 = vmatprep.subr.bf16.mxu0 %v8375_v41 }
 0xa26   : > { %8378 = vmatpush3.bf16.msra.mxu0 %v8377_v46 }
 0xa27   : > { %8257 = vmatpush3.bf16.msra.mxu1 %v9022_v19  ;;  %v6215_v19 = vld [vmem:[#allocation8 + $0x130] sm:$0xff] }
 0xa28   : > { %8258 = vmatprep.subr.bf16.mxu1 %v9909_v23 }
 0xa2b   : > { %8259 = vmatpush3.bf16.msra.mxu1 %v9023_v51  ;;  %v8409_v51 = vpack.c.bf16 %v6216_v49, %v6215_v19 }
 0xa2c   : > { %8260 = vmatprep.subr.bf16.mxu1 %v9909_v23 }
 0xa2f   : > { %8261 = vmatpush3.bf16.msra.mxu1 %v9024_v54  ;;  %v8381_v54 = vpack.c.bf16 %v6184_v50, %v6183_v28 }
 0xa30   : > { %8262 = vmatprep.subr.bf16.mxu1 %v9909_v23 }
 0xa33   : > { %8263 = vmatpush3.bf16.msra.mxu1 %v9025_v52  ;;  %v6201_v52 = vld [vmem:[#allocation8 + $0xc0] sm:$0xff] }
 0xa34   : > { %8264 = vmatprep.subr.bf16.mxu1 %v9909_v23 }
 0xa37   : > { %8265 = vmatpush3.bf16.msra.mxu1 %v9026_v53  ;;  %v6202_v53 = vld [vmem:[#allocation8 + $0xc8] sm:$0xff] }
 0xa38   : > { %8266 = vmatprep.subr.bf16.mxu1 %v9909_v23  ;;  %v8383_v55 = vpack.c.bf16 %v6202_v53, %v6201_v52 }
 0xa3b   : > { %8267 = vmatpush3.bf16.msra.mxu1 %v9027_v30  ;;  %v6217_v30 = vld [vmem:[#allocation8 + $0x140] sm:$0xff] }
 0xa3c   : > { %8272 = vmatprep.subr.bf16.mxu1 %v9909_v23 }
 0xa3e   : > { %8269 = vmatmul.mubr.bf16.vlgmr.msra.gmra.mrb[8].mxu1 %v5691_v58  ;;  %v6186_v58 = vld [vmem:[#allocation8 + $0x48] sm:$0xff] }
 0xa3f   : > { %8273 = vmatpush3.bf16.msra.mxu1 %v9028_v57  ;;  %8288 = vmatprep.mubr.msk.bf16.mxu1 %vm9219_vm0, %v9909_v23  ;;  %v6185_v57 = vld [vmem:[#allocation8 + $0x40] sm:$0xff] }
 0xa40   : > { %8274 = vmatprep.subr.bf16.mxu1 %v9909_v23 }
 0xa43   : > { %8275 = vmatpush3.bf16.msra.mxu1 %v9029_v59  ;;  %v8412_v59 = vpack.c.bf16 %v6218_v56, %v6217_v30 }
 0xa44   : > { %8276 = vmatprep.subr.bf16.mxu1 %v9909_v23 }
 0xa47   : > { %8277 = vmatpush3.bf16.msra.mxu1 %v9030_v60  ;;  %v8385_v60 = vpack.c.bf16 %v6186_v58, %v6185_v57 }
 0xa48   : > { %8278 = vmatprep.subr.bf16.mxu1 %v9909_v23 }
 0xa4b   : > { %8279 = vmatpush3.bf16.msra.mxu1 %v9031_v61  ;;  %v6203_v61 = vld [vmem:[#allocation8 + $0xd0] sm:$0xff] }
 0xa4c   : > { %8280 = vmatprep.subr.bf16.mxu1 %v9909_v23 }
 0xa4f   : > { %8281 = vmatpush3.bf16.msra.mxu1 %v9032_v62  ;;  %v6204_v62 = vld [vmem:[#allocation8 + $0xd8] sm:$0xff] }
 0xa50   : > { %8282 = vmatprep.subr.bf16.mxu1 %v9909_v23 }
 0xa53   : > { %8283 = vmatpush3.bf16.msra.mxu1 %v9033_v63  ;;  %v6219_v63 = vld [vmem:[#allocation8 + $0x150] sm:$0xff] }
 0xa54   : > { %8284 = vmatprep.subr.bf16.mxu1 %v9909_v23 }
 0xa57   : > { %8285 = vmatpush3.bf16.msra.mxu1 %v9034_v1  ;;  %v8387_v1 = vpack.c.bf16 %v6204_v62, %v6203_v61 }
 0xa58   : > { %8286 = vmatprep.subr.bf16.mxu1 %v9909_v23 }
 0xa5b   : > { %8287 = vmatpush3.bf16.msra.mxu1 %v9035_v2  ;;  %v6220_v2 = vld [vmem:[#allocation8 + $0x158] sm:$0xff] }
 0xa5c   : > { %8292 = vmatprep.subr.bf16.mxu1 %v9909_v23 }
 0xa5e   : > { %8289 = vmatmul.mubr.bf16.vlgmr.msra.gmra.mrb[8].mxu1 %v5801_v6  ;;  %v8389_v6 = vpack.c.bf16 %v6188_v4, %v6187_v3 }
 0xa5f   : > { %8293 = vmatpush3.bf16.msra.mxu1 %v9036_v5  ;;  %8308 = vmatprep.mubr.msk.bf16.mxu1 %vm9219_vm0, %v9909_v23  ;;  %v8415_v5 = vpack.c.bf16 %v6220_v2, %v6219_v63  ;;  %v6225_v63 = vld [vmem:[%s10157_s10] sm:$0x1] }
 0xa60   : > { %8294 = vmatprep.subr.bf16.mxu1 %v9909_v23 }
 0xa63   : > { %8295 = vmatpush3.bf16.msra.mxu1 %v9037_v7  ;;  %v6205_v7 = vld [vmem:[#allocation8 + $0xe0] sm:$0xff] }
 0xa64   : > { %8296 = vmatprep.subr.bf16.mxu1 %v9909_v23 }
 0xa67   : > { %8297 = vmatpush3.bf16.msra.mxu1 %v9038_v16  ;;  %v6206_v16 = vld [vmem:[#allocation8 + $0xe8] sm:$0xff] }
 0xa68   : > { %8298 = vmatprep.subr.bf16.mxu1 %v9909_v23 }
 0xa6b   : > { %8299 = vmatpush3.bf16.msra.mxu1 %v9039_v17  ;;  %v6221_v17 = vld [vmem:[#allocation8 + $0x160] sm:$0xff] }
 0xa6c   : > { %8300 = vmatprep.subr.bf16.mxu1 %v9909_v23 }
 0xa6f   : > { %8301 = vmatpush3.bf16.msra.mxu1 %v9040_v9  ;;  %v8391_v9 = vpack.c.bf16 %v6206_v16, %v6205_v7 }
 0xa70   : > { %8302 = vmatprep.subr.bf16.mxu1 %v9909_v23 }
 0xa73   : > { %8303 = vmatpush3.bf16.msra.mxu1 %v9041_v21  ;;  %v6222_v21 = vld [vmem:[#allocation8 + $0x168] sm:$0xff] }
 0xa74   : > { %8304 = vmatprep.subr.bf16.mxu1 %v9909_v23  ;;  %v8418_v8 = vpack.c.bf16 %v6222_v21, %v6221_v17 }
 0xa77   : > { %8305 = vmatpush3.bf16.msra.mxu1 %v9042_v18  ;;  %v6189_v18 = vld [vmem:[#allocation8 + $0x60] sm:$0xff] }
 0xa78   : > { %8306 = vmatprep.subr.bf16.mxu1 %v9909_v23 }
 0xa7b   : > { %8307 = vmatpush3.bf16.msra.mxu1 %v9043_v24  ;;  %v6190_v24 = vld [vmem:[#allocation8 + $0x68] sm:$0xff] }
 0xa7c   : > { %8312 = vmatprep.subr.bf16.mxu1 %v9909_v23  ;;  %v8393_v12 = vpack.c.bf16 %v6190_v24, %v6189_v18 }
 0xa7e   : > { %8309 = vmatmul.mubr.bf16.vlgmr.msra.gmra.mrb[8].mxu1 %v5911_v25  ;;  %v6208_v25 = vld [vmem:[#allocation8 + $0xf8] sm:$0xff] }
 0xa7f   : > { %8313 = vmatpush3.bf16.msra.mxu1 %v9044_v0  ;;  %8328 = vmatprep.mubr.msk.bf16.mxu1 %vm9219_vm0, %v9909_v23  ;;  %v6207_v0 = vld [vmem:[#allocation8 + $0xf0] sm:$0xff] }
 0xa80   : > { %8314 = vmatprep.subr.bf16.mxu1 %v9909_v23 }
 0xa83   : > { %8315 = vmatpush3.bf16.msra.mxu1 %v9045_v20  ;;  %v6223_v20 = vld [vmem:[#allocation8 + $0x170] sm:$0xff] }
 0xa84   : > { %8316 = vmatprep.subr.bf16.mxu1 %v9909_v23 }
 0xa87   : > { %8317 = vmatpush3.bf16.msra.mxu1 %v9046_v26  ;;  %v8395_v26 = vpack.c.bf16 %v6208_v25, %v6207_v0 }
 0xa88   : > { %8318 = vmatprep.subr.bf16.mxu1 %v9909_v23 }
 0xa8b   : > { %8319 = vmatpush3.bf16.msra.mxu1 %v9047_v15  ;;  %v6224_v15 = vld [vmem:[#allocation8 + $0x178] sm:$0xff] }
 0xa8c   : > { %8320 = vmatprep.subr.bf16.mxu1 %v9909_v23 }
 0xa8f   : > { %8321 = vmatpush3.bf16.msra.mxu1 %v9048_v13  ;;  %v6191_v13 = vld [vmem:[#allocation8 + $0x70] sm:$0xff] }
 0xa90   : > { %8322 = vmatprep.subr.bf16.mxu1 %v9909_v23 }
 0xa93   : > { %8323 = vmatpush3.bf16.msra.mxu1 %v9049_v27  ;;  %v6192_v27 = vld [vmem:[#allocation8 + $0x78] sm:$0xff] }
 0xa94   : > { %8324 = vmatprep.subr.bf16.mxu1 %v9909_v23 }
 0xa97   : > { %8325 = vmatpush3.bf16.msra.mxu1 %v9050_v14  ;;  %v8421_v14 = vpack.c.bf16 %v6224_v15, %v6223_v20 }
 0xa98   : > { %8326 = vmatprep.subr.bf16.mxu1 %v9909_v23 }
 0xa9b   : > { %8327 = vmatpush3.bf16.msra.mxu1 %v9051_v11  ;;  %v8397_v11 = vpack.c.bf16 %v6192_v27, %v6191_v13 }
 0xa9c   : > { %8399 = vmatprep.subr.bf16.mxu1 %v9220_v35 }
 0xa9e   : > { %8329 = vmatmul.mubr.bf16.vlgmr.msra.gmra.mrb[8].mxu1 %v6021_v34 }
 0xa9f   : > { %8401 = vmatpush3.bf16.msra.mxu1 %v8400_v33  ;;  %8364 = vmatprep.mubr.msk.f32.mxu1 %vm9219_vm0, %v9909_v23  ;;  %v8379_v23 = vpack.c.bf16 %v6200_v48, %v6199_v47 }
 0xaa0   : > { %8402 = vmatprep.subr.bf16.mxu1 %v9220_v35 }
 0xaa1   : > { %8380 = vmatprep.subr.bf16.mxu0 %v8379_v23 }
 0xaa2   : > { %8382 = vmatpush3.bf16.msra.mxu0 %v8381_v54 }
 0xaa3   : > { %8404 = vmatpush3.bf16.msra.mxu1 %v8403_v37  ;;  %8384 = vmatprep.subr.bf16.mxu0 %v8383_v55 }
 0xaa4   : > { %8405 = vmatprep.subr.bf16.mxu1 %v9220_v35 }
 0xaa6   : > { %8386 = vmatpush3.bf16.msra.mxu0 %v8385_v60 }
 0xaa7   : > { %8407 = vmatpush3.bf16.msra.mxu1 %v8406_v44  ;;  %8388 = vmatprep.subr.bf16.mxu0 %v8387_v1 }
 0xaa8   : > { %8408 = vmatprep.subr.bf16.mxu1 %v9220_v35 }
 0xaaa   : > { %8390 = vmatpush3.bf16.msra.mxu0 %v8389_v6 }
 0xaab   : > { %8410 = vmatpush3.bf16.msra.mxu1 %v8409_v51  ;;  %8392 = vmatprep.subr.bf16.mxu0 %v8391_v9 }
 0xaac   : > { %8411 = vmatprep.subr.bf16.mxu1 %v9220_v35 }
 0xaae   : > { %8394 = vmatpush3.bf16.msra.mxu0 %v8393_v12 }
 0xaaf   : > { %8413 = vmatpush3.bf16.msra.mxu1 %v8412_v59  ;;  %8396 = vmatprep.subr.bf16.mxu0 %v8395_v26 }
 0xab0   : > { %8414 = vmatprep.subr.bf16.mxu1 %v9220_v35 }
 0xab2   : > { %8398 = vmatpush3.bf16.msra.mxu0 %v8397_v11 }
 0xab3   : > { %8416 = vmatpush3.bf16.msra.mxu1 %v8415_v5 }
 0xab4   : > { %8417 = vmatprep.subr.bf16.mxu1 %v9220_v35 }
 0xab7   : > { %8419 = vmatpush3.bf16.msra.mxu1 %v8418_v8 }
 0xab8   : > { %8420 = vmatprep.subr.bf16.mxu1 %v9220_v35 }
 0xabb   : > { %8422 = vmatpush3.bf16.msra.mxu1 %v8421_v14 }
 0xb71   : > { %v6120_v29 = vpop.f32.mrb[8].mxu1 }
 0xb72   : > { %v6136_v32 = vmul.f32 %v6874_v22, %v6120_v29  ;;  %v8330_v33 = vpop.f32.mrb[9].mxu1 }
 0xb73   : > { %v6123_v34 = vpop.f32.mrb[10].mxu1 }
 0xb74   : > { %v6145_v10 = vadd.f32 %v6875_v31, %v6136_v32  ;;  %v6137_v36 = vmul.f32 %v6874_v22, %v6123_v34  ;;  %v8331_v37 = vpop.f32.mrb[11].mxu1 }
 0xb76   : > { %vm6147_vm0 = vcmp.gt.f32.partialorder %v6145_v10, 0.0  ;;  %v6149_v35 = vmul.f32 0.01, %v6145_v10  ;;  %v6146_v38 = vadd.f32 %v6875_v31, %v6137_v36 }
 0xb78   : > { %v6151_v39 = vsel %vm6147_vm0, %v6145_v10, %v6149_v35  ;;  %vm6148_vm4 = vcmp.gt.f32.partialorder %v6146_v38, 0.0  ;;  %v6150_v40 = vmul.f32 0.01, %v6146_v38 }
 0xb79   : > { %v6154_v41 = vcombine.high %v6151_v39, %v6151_v39  ;;  %v6156_v42 = vsel %vm1453_vm2, %v6151_v39, -inf }
 0xb7a   : > { %v6157_v43 = vrot.slane %v6156_v42, 4  ;;  %v6152_v44 = vsel %vm6148_vm4, %v6146_v38, %v6150_v40 }
 0xb7b   : > { %v6170_v45 = vsel %vm1453_vm2, %v6152_v44, -inf  ;;  %v6163_v46 = vsel %vm1453_vm2, %v6154_v41, -inf }
 0xb7c   : > { %v6158_v47 = vmax.f32 %v6156_v42, %v6157_v43  ;;  %v6171_v48 = vrot.slane %v6170_v45, 4  ;;  %v6164_v19 = vrot.slane %v6163_v46, 4 }
 0xb7e   : > { %v6159_v23 = vrot.slane %v6158_v47, 2  ;;  %v6172_v49 = vmax.f32 %v6170_v45, %v6171_v48  ;;  %v6165_v28 = vmax.f32 %v6163_v46, %v6164_v19 }
 0xb80   : > { %v6173_v50 = vrot.slane %v6172_v49, 2  ;;  %v6166_v51 = vrot.slane %v6165_v28, 2  ;;  %v6160_v54 = vmax.f32 %v6158_v47, %v6159_v23 }
 0xb82   : > { %v6167_v52 = vmax.f32 %v6165_v28, %v6166_v51  ;;  %v6174_v53 = vmax.f32 %v6172_v49, %v6173_v50  ;;  %v6161_v30 = vrot.slane %v6160_v54, 1 }
 0xb84   : > { %v6168_v55 = vrot.slane %v6167_v52, 1  ;;  %v6175_v56 = vrot.slane %v6174_v53, 1  ;;  %v6162_v59 = vmax.f32 %v6160_v54, %v6161_v30 }
 0xb86   : > { %v6169_v57 = vmax.f32 %v6167_v52, %v6168_v55  ;;  %v6176_v58 = vmax.f32 %v6174_v53, %v6175_v56 }
 0xb88   : > { %6290 = vmatprep.mubr.f32.mxu0 %v6169_v57  ;;  %8365 = vmatmul.mubr.f32.vlgmr.msra.gmra.mrb[12].mxu1 %v6176_v58 }
 0xb89   : > { %6291 = vmatmul.mubr.f32.vlgmr.msra.gmra.mrb[12].mxu0 %v6162_v59 }
 0xc5b   : > { %v6362_v60 = vpop.f32.mrb[12].mxu1 }
 0xc5c   : > { %v7352_v61 = vpop.f32.mrb[12].mxu0  ;;  %v8366_v62 = vpop.f32.mrb[13].mxu1 }
 0xc5d   : > { %v7353_v1 = vpop.f32.mrb[13].mxu0 }
 0xc5e   : > { %v7354_v2 = vadd.f32 %v7353_v1, %v7352_v61 }
 0xc60   : > { %v6293_v3 = vadd.f32 %v7354_v2, %v6225_v63 }
 0xc62   : > { %v6363_v4 = vadd.f32 %v6362_v60, %v6293_v3 }
 0xc64   : > { %6366 = vst [vmem:[%s422_s12] sm:$0x1] %v6363_v4 }
 0xc65   : > { %9152 = shalt.err (!%p9149_p9)
}
 0xc66   : > { %s9153_s20 = scalar_lea.hbm %s10105_s23, 16  ;;  %s9157_s30 = scalar_lea.hbm %s10186_s11, 32 }
 0xc67   : > { %p9154_p2 = scmp.ne.s32.totalorder %s10105_s23, %s9153_s20  ;;  %p9158_p5 = scmp.lt.u32.totalorder %s10105_s23, %s10186_s11 }
 0xc68   : > { %p9159_p10 = scmp.lt.u32.totalorder %s9157_s30, %s9153_s20  ;;  %p9161_p12 = scmp.lt.u32.totalorder %s9153_s20, %s10105_s23 }
 0xc69   : > { %p9155_p3 = pnand %p9154_p2, %p10187_p7 }
 0xc6a   : > { %p9160_p4 = por %p9159_p10, %p9158_p5 }
 0xc6b   : > { %p9156_p0 = pneg %p9155_p3 }
 0xc6c   : > { %p9162_p8 = por %p9161_p12, %p9160_p4 }
 0xc6e   : > { %p9163_p11 = pnand %p9162_p8, %p9156_p0 }
 0xc70   : > { %9166 = shalt.err (!%p9163_p11)
}
 0xc71   : > { %8603 = dma.vmem_to_hbm [thread:$0]  (%p10187_p7), %s10107_s15, 16, %s10105_s23, %s6368_s29  }
 0xc72 PF: > { %s10188_s19 = sld [smem:[#allocation15_spill]]  ;;  %s10189_s12 = sld [smem:[#allocation13_spill]] }
 0xc73   : > { %s10190_s24 = sld [smem:[#allocation18_spill]] }
 0xc78   : > { %p8625_p13 = scmp.ge.s32.totalorder %s10188_s19, 2  ;;  %s6392_s26 = sand.u32 1, %s10189_s12  }
 0xc79   : > { %p10191_p1 = scmp.ne.s32.totalorder %s10190_s24, 0  ;;  %s6393_s13 = scalar_lea.sflag [#allocation5], %s6392_s26 }
 0xc7b   : > { %p8616_p6 = pnand %p8625_p13, %p10191_p1 }
 0xc7d   : > { %9192 = dma.done.wait (!%p8616_p6), %s6393_s13, 16  }
 0xc7e   : > { %9194 = vsyncadd (!%p8616_p6), %s6393_s13, 4294967280  ;;  %s10192_s20 = sld [smem:[#allocation16_spill]]  ;;  %s10193_s21 = sld [smem:[#allocation14_spill]] }
 0xc7f   : > { %s10194_s19 = sld [smem:[#allocation17_spill]]  ;;  %s10195_s17 = smov %s9201_s18 }
 0xc84   : > { %p23_p9 = scmp.ge.s32.totalorder %s10192_s20, 4   ;;  %s10196_s18 = smov %s10193_s21 }
 0xc86   :  { %25 = sbr.rel (!%p23_p9) target bundleno = 7 (0x7), region = 112 }
 0xc8d   :  { %6397 = vsyncpa [#allocation4], 1 }
 0xc8e   :  { %6399 = vsyncpa [#allocation4 + $0x1], 1 }
 0xc8f   :  { %6400 = vsyncpa [#allocation7], 1 }
 0xc90   :  { %6401 = vsyncpa [#allocation5], 1 }
 0xc91   :  { %6403 = vsyncpa [#allocation5 + $0x1], 1 }

</bundles_post_ra>
